<compile_context>
chip_gen: v7x
topology: tpu7x:2x2x1
jax: 0.10.0
libtpu: 0.0.40
codegen_flags: <defaults>
</compile_context>

<pallas_src>
import jax
import jax.numpy as jnp
import numpy as np
from jax.experimental import pallas as pl
from jax.experimental.pallas import tpu as pltpu


def _bottleneck_kernel(x_ref, edge_ref, w1_ref, b1_ref, w2_ref, b2_ref,
                       w3_ref, b3_ref, out_ref):
    _, H, W, Cin = x_ref.shape
    P = w1_ref.shape[1]          # planes
    Cout = w3_ref.shape[1]       # planes * 4
    rows = H * W

    # ---- conv1 (1x1, no bias) + bn1 (scale folded into w1) + relu ---------
    xb = x_ref[0].reshape(rows, Cin).astype(jnp.bfloat16)
    h1 = jnp.dot(xb, w1_ref[...], preferred_element_type=jnp.float32)
    h1 = jnp.maximum(h1 + b1_ref[...], 0.0)                  # (rows, P) f32

    # ---- conv2 (3x3, stride=1, pad=1, no bias) + bn2 + relu ---------------
    # Shift-based taps: each (kh, kw) tap of the flattened (rows, P) map is a
    # single sublane roll by -(dh*W + dw), zeroed at the image border with a
    # precomputed {0,1} mask, then one K=P matmul accumulated in f32.
    acc = jnp.zeros((rows, P), jnp.float32)
    for kh in range(3):
        for kw in range(3):
            t = kh * 3 + kw
            off = (kh - 1) * W + (kw - 1)
            tap = h1 if off == 0 else pltpu.roll(h1, shift=(-off) % rows,
                                                 axis=0)
            if t != 4:                                        # center: no mask
                tap = tap * edge_ref[:, t:t + 1]              # (rows,1) bcast
            acc = acc + jnp.dot(tap.astype(jnp.bfloat16),
                                w2_ref[t * P:(t + 1) * P, :],
                                preferred_element_type=jnp.float32)
    h2 = jnp.maximum(acc + b2_ref[...], 0.0)                  # (rows, P) f32

    # ---- conv3 (1x1, no bias) + bn3 + residual add + relu -----------------
    h3 = jnp.dot(h2.astype(jnp.bfloat16), w3_ref[...],
                 preferred_element_type=jnp.float32)
    res = x_ref[0].reshape(rows, Cin)            # residual re-read (late)
    out = jnp.maximum(h3 + b3_ref[...] + res, 0.0)
    out_ref[0] = out.reshape(H, W, Cout)


def _edge_masks(H, W):
    """(rows, 9) f32 {0,1} validity masks for the nine 3x3 taps."""
    rows = H * W
    h_idx = np.repeat(np.arange(H), W)
    w_idx = np.tile(np.arange(W), H)
    m = np.ones((rows, 9), np.float32)
    for kh in range(3):
        for kw in range(3):
            valid = np.ones(rows, np.bool_)
            if kh == 0:
                valid &= h_idx >= 1
            if kh == 2:
                valid &= h_idx <= H - 2
            if kw == 0:
                valid &= w_idx >= 1
            if kw == 2:
                valid &= w_idx <= W - 2
            m[:, kh * 3 + kw] = valid.astype(np.float32)
    return m


def bottleneck_forward_nhwc(x_nhwc, kp):
    """NHWC-native entry point (no layout transposes around the kernel)."""
    N, H, W, Cin = x_nhwc.shape
    P = kp["b1"].shape[-1]
    Cout = kp["w3"].shape[1]
    assert Cout == Cin, "downsample=None requires inplanes == planes * 4"
    rows = H * W

    edges = jnp.asarray(_edge_masks(H, W))

    flops = 2 * N * rows * (Cin * P + 9 * P * P + P * Cout)
    bytes_accessed = (4 * N * rows * (Cin + Cout)        # x in + out (f32)
                      + 2 * (Cin * P + 9 * P * P + P * Cout)   # bf16 weights
                      + 4 * (2 * P + Cout)                     # f32 biases
                      + 4 * rows * 9)                          # edge masks

    return pl.pallas_call(
        _bottleneck_kernel,
        out_shape=jax.ShapeDtypeStruct((N, H, W, Cout), jnp.float32),
        grid_spec=pltpu.PrefetchScalarGridSpec(
            num_scalar_prefetch=0,
            grid=(N,),
            in_specs=[
                pl.BlockSpec((1, H, W, Cin), lambda n: (n, 0, 0, 0)),
                # Edge masks / weights / biases: constant index_map ->
                # fetched once, resident across grid steps.
                pl.BlockSpec((rows, 9), lambda n: (0, 0)),
                pl.BlockSpec((Cin, P), lambda n: (0, 0)),
                pl.BlockSpec((1, P), lambda n: (0, 0)),
                pl.BlockSpec((9 * P, P), lambda n: (0, 0)),
                pl.BlockSpec((1, P), lambda n: (0, 0)),
                pl.BlockSpec((P, Cout), lambda n: (0, 0)),
                pl.BlockSpec((1, Cout), lambda n: (0, 0)),
            ],
            out_specs=pl.BlockSpec((1, H, W, Cout), lambda n: (n, 0, 0, 0)),
        ),
        compiler_params=pltpu.CompilerParams(
            dimension_semantics=("parallel",),
            vmem_limit_bytes=32 * 1024 * 1024),
        cost_estimate=pl.CostEstimate(
            flops=int(flops), transcendentals=0,
            bytes_accessed=int(bytes_accessed)),
    )(x_nhwc, edges, kp["w1"], kp["b1"], kp["w2"], kp["b2"],
      kp["w3"], kp["b3"])


def bottleneck_forward(x_nchw, kp):
    """NCHW wrapper matching the PyTorch interface (transposes are outside
    the kernel; stacked blocks should call bottleneck_forward_nhwc)."""
    x_nhwc = jnp.transpose(x_nchw, (0, 2, 3, 1))             # NCHW -> NHWC
    out_nhwc = bottleneck_forward_nhwc(x_nhwc, kp)
    return jnp.transpose(out_nhwc, (0, 3, 1, 2))             # NHWC -> NCHW


def make_params(key, inplanes, planes):
    """Deterministic synthetic parameters.

    Returns (raw, kern):
      raw  - unfolded f32 params for the pure-f32 reference.
      kern - kernel params: BN scales folded into conv weights, weights bf16,
             3x3 weight pre-reshaped to the (9*P, P) tap layout.
    """
    ks = jax.random.split(key, 16)
    eps = 1e-5
    out_c = planes * 4

    def bn(kg, kb, km, kv, c):
        gamma = jax.random.uniform(kg, (c,), jnp.float32, 0.5, 1.5)
        beta = 0.1 * jax.random.normal(kb, (c,), jnp.float32)
        mean = 0.1 * jax.random.normal(km, (c,), jnp.float32)
        var = jax.random.uniform(kv, (c,), jnp.float32, 0.5, 1.5)
        scale = gamma / jnp.sqrt(var + eps)
        bias = beta - mean * scale
        return scale, bias

    w1 = jax.random.normal(ks[0], (inplanes, planes), jnp.float32) / np.sqrt(inplanes)
    w2_hwio = jax.random.normal(ks[1], (3, 3, planes, planes), jnp.float32) / np.sqrt(9 * planes)
    w3 = jax.random.normal(ks[2], (planes, out_c), jnp.float32) / np.sqrt(planes)

    s1, b1 = bn(ks[3], ks[4], ks[5], ks[6], planes)
    s2, b2 = bn(ks[7], ks[8], ks[9], ks[10], planes)
    s3, b3 = bn(ks[11], ks[12], ks[13], ks[14], out_c)

    raw = dict(w1=w1, w2_hwio=w2_hwio, w3=w3,
               s1=s1, b1=b1, s2=s2, b2=b2, s3=s3, b3=b3)

    kern = dict(
        w1=(w1 * s1[None, :]).astype(jnp.bfloat16),
        b1=b1.reshape(1, planes),
        w2=(w2_hwio * s2[None, None, None, :]
            ).reshape(9 * planes, planes).astype(jnp.bfloat16),
        b2=b2.reshape(1, planes),
        w3=(w3 * s3[None, :]).astype(jnp.bfloat16),
        b3=b3.reshape(1, out_c),
    )
    return raw, kern


def _conv(v, w, pad):
    return jax.lax.conv_general_dilated(
        v, w, (1, 1), pad, dimension_numbers=("NHWC", "HWIO", "NHWC"),
        precision=jax.lax.Precision.HIGHEST)


def reference_f32(x_nchw, raw):
    """Pure-f32 eval-mode reference (matches the PyTorch module)."""
    x = jnp.transpose(x_nchw, (0, 2, 3, 1))
    cin, p = raw["w1"].shape
    h = jnp.maximum(_conv(x, raw["w1"].reshape(1, 1, cin, p), "VALID")
                    * raw["s1"] + raw["b1"], 0.0)
    h = jnp.maximum(_conv(h, raw["w2_hwio"], "SAME")
                    * raw["s2"] + raw["b2"], 0.0)
    h = _conv(h, raw["w3"].reshape(1, 1, p, -1), "VALID") * raw["s3"] + raw["b3"]
    h = jnp.maximum(h + x, 0.0)
    return jnp.transpose(h, (0, 3, 1, 2))


def reference_bf16(x_nchw, kern, planes):
    """Mirrors the kernel's bf16-operand / f32-accumulate MXU math."""
    x = jnp.transpose(x_nchw, (0, 2, 3, 1))
    cin = kern["w1"].shape[0]
    w1 = kern["w1"].astype(jnp.float32).reshape(1, 1, cin, planes)
    w2 = kern["w2"].astype(jnp.float32).reshape(3, 3, planes, planes)
    w3 = kern["w3"].astype(jnp.float32).reshape(1, 1, planes, -1)

    def q(v):  # simulate bf16 rounding of the matmul LHS
        return v.astype(jnp.bfloat16).astype(jnp.float32)

    h = jnp.maximum(_conv(q(x), w1, "VALID") + kern["b1"], 0.0)
    h = jnp.maximum(_conv(q(h), w2, "SAME") + kern["b2"], 0.0)
    h = _conv(q(h), w3, "VALID") + kern["b3"]
    h = jnp.maximum(h + x, 0.0)
    return jnp.transpose(h, (0, 3, 1, 2))


if __name__ == "__main__":
    # Bottleneck(inplanes=128, planes=32): identity residual requires
    # inplanes == planes*4 (downsample=None).
    N, H, W = 2, 16, 16
    planes = 32
    inplanes = planes * 4

    key = jax.random.PRNGKey(0)
    kx, kparam = jax.random.split(key)
    x = jax.random.normal(kx, (N, inplanes, H, W), jnp.float32)
    raw, kern = make_params(kparam, inplanes, planes)

    out = jax.block_until_ready(bottleneck_forward(x, kern))

    # Tight check against a reference that reproduces the kernel's bf16 math.
    ref_tight = jax.block_until_ready(reference_bf16(x, kern, planes))
    np.testing.assert_allclose(np.asarray(out), np.asarray(ref_tight),
                               rtol=2e-3, atol=2e-3)

    # Loose check against the exact f32 (PyTorch-semantics) reference.
    ref = jax.block_until_ready(reference_f32(x, raw))
    np.testing.assert_allclose(np.asarray(out), np.asarray(ref),
                               rtol=5e-2, atol=5e-2)

    assert out.shape == (N, inplanes, H, W)
    print("KERNEL_OK")
</pallas_src>

<mosaic_0001>
module attributes {stable_mosaic.version = 11 : i64} {
  func.func @_bottleneck_kernel(%arg0: i32, %arg1: memref<1x16x16x128xf32, #tpu.memory_space<vmem>>, %arg2: memref<256x9xf32, #tpu.memory_space<vmem>>, %arg3: memref<128x32xbf16, #tpu.memory_space<vmem>>, %arg4: memref<1x32xf32, #tpu.memory_space<vmem>>, %arg5: memref<288x32xbf16, #tpu.memory_space<vmem>>, %arg6: memref<1x32xf32, #tpu.memory_space<vmem>>, %arg7: memref<32x128xbf16, #tpu.memory_space<vmem>>, %arg8: memref<1x128xf32, #tpu.memory_space<vmem>>, %arg9: memref<1x16x16x128xf32, #tpu.memory_space<vmem>>) attributes {dimension_semantics = [#tpu.dimension_semantics<parallel>], iteration_bounds = array<i64: 2>, scalar_prefetch = 0 : i64, scratch_operands = 0 : i64, tpu.core_type = #tpu.core_type<tc>, window_params = [{transform_indices = @transform_0, window_bounds = array<i64: 1, 16, 16, 128>}, {pipeline_mode = #tpu.pipeline_mode<synchronous>, transform_indices = @transform_1, window_bounds = array<i64: 256, 9>}, {pipeline_mode = #tpu.pipeline_mode<synchronous>, transform_indices = @transform_2, window_bounds = array<i64: 128, 32>}, {pipeline_mode = #tpu.pipeline_mode<synchronous>, transform_indices = @transform_3, window_bounds = array<i64: 1, 32>}, {pipeline_mode = #tpu.pipeline_mode<synchronous>, transform_indices = @transform_4, window_bounds = array<i64: 288, 32>}, {pipeline_mode = #tpu.pipeline_mode<synchronous>, transform_indices = @transform_5, window_bounds = array<i64: 1, 32>}, {pipeline_mode = #tpu.pipeline_mode<synchronous>, transform_indices = @transform_6, window_bounds = array<i64: 32, 128>}, {pipeline_mode = #tpu.pipeline_mode<synchronous>, transform_indices = @transform_7, window_bounds = array<i64: 1, 128>}, {transform_indices = @transform_8, window_bounds = array<i64: 1, 16, 16, 128>}]} {
    %c0 = arith.constant 0 : index
    %c0_0 = arith.constant 0 : index
    %c0_1 = arith.constant 0 : index
    %c0_2 = arith.constant 0 : index
    %0 = vector.load %arg1[%c0, %c0_0, %c0_1, %c0_2] : memref<1x16x16x128xf32, #tpu.memory_space<vmem>>, vector<1x16x16x128xf32>
    %1 = vector.shape_cast %0 : vector<1x16x16x128xf32> to vector<16x16x128xf32>
    %2 = vector.shape_cast %1 : vector<16x16x128xf32> to vector<256x128xf32>
    %3 = arith.truncf %2 : vector<256x128xf32> to vector<256x128xbf16>
    %c0_3 = arith.constant 0 : index
    %c0_4 = arith.constant 0 : index
    %4 = vector.load %arg3[%c0_3, %c0_4] : memref<128x32xbf16, #tpu.memory_space<vmem>>, vector<128x32xbf16>
    %cst = arith.constant dense<0.000000e+00> : vector<256x32xf32>
    %5 = tpu.matmul %3, %4, %cst {dimension_numbers = #tpu.dot_dimension_numbers<[1], [0], [0], [1], [0, 0, 1, 1], [], []>} : vector<256x128xbf16>, vector<128x32xbf16>, vector<256x32xf32> -> vector<256x32xf32>
    %c0_5 = arith.constant 0 : index
    %c0_6 = arith.constant 0 : index
    %6 = vector.load %arg4[%c0_5, %c0_6] : memref<1x32xf32, #tpu.memory_space<vmem>>, vector<1x32xf32>
    %7 = vector.broadcast %6 : vector<1x32xf32> to vector<256x32xf32>
    %8 = arith.addf %5, %7 : vector<256x32xf32>
    %cst_7 = arith.constant 0.000000e+00 : f32
    %9 = vector.broadcast %cst_7 : f32 to vector<256x32xf32>
    %10 = arith.maximumf %8, %9 : vector<256x32xf32>
    %cst_8 = arith.constant 0.000000e+00 : f32
    %11 = vector.broadcast %cst_8 : f32 to vector<256x32xf32>
    %c17_i32 = arith.constant 17 : i32
    %12 = tpu.dynamic_rotate %10 by %c17_i32 dim 0 : vector<256x32xf32>, i32 -> vector<256x32xf32>
    %c0_9 = arith.constant 0 : index
    %c0_10 = arith.constant 0 : index
    %13 = vector.load %arg2[%c0_9, %c0_10] : memref<256x9xf32, #tpu.memory_space<vmem>>, vector<256x1xf32>
    %14 = vector.broadcast %13 : vector<256x1xf32> to vector<256x32xf32>
    %15 = arith.mulf %12, %14 : vector<256x32xf32>
    %16 = arith.truncf %15 : vector<256x32xf32> to vector<256x32xbf16>
    %c0_11 = arith.constant 0 : index
    %c0_12 = arith.constant 0 : index
    %17 = vector.load %arg5[%c0_11, %c0_12] : memref<288x32xbf16, #tpu.memory_space<vmem>>, vector<32x32xbf16>
    %cst_13 = arith.constant dense<0.000000e+00> : vector<256x32xf32>
    %18 = tpu.matmul %16, %17, %cst_13 {dimension_numbers = #tpu.dot_dimension_numbers<[1], [0], [0], [1], [0, 0, 1, 1], [], []>} : vector<256x32xbf16>, vector<32x32xbf16>, vector<256x32xf32> -> vector<256x32xf32>
    %19 = arith.addf %11, %18 : vector<256x32xf32>
    %c16_i32 = arith.constant 16 : i32
    %20 = tpu.dynamic_rotate %10 by %c16_i32 dim 0 : vector<256x32xf32>, i32 -> vector<256x32xf32>
    %c0_14 = arith.constant 0 : index
    %c1 = arith.constant 1 : index
    %21 = vector.load %arg2[%c0_14, %c1] : memref<256x9xf32, #tpu.memory_space<vmem>>, vector<256x1xf32>
    %22 = vector.broadcast %21 : vector<256x1xf32> to vector<256x32xf32>
    %23 = arith.mulf %20, %22 : vector<256x32xf32>
    %24 = arith.truncf %23 : vector<256x32xf32> to vector<256x32xbf16>
    %c32 = arith.constant 32 : index
    %c0_15 = arith.constant 0 : index
    %25 = vector.load %arg5[%c32, %c0_15] : memref<288x32xbf16, #tpu.memory_space<vmem>>, vector<32x32xbf16>
    %cst_16 = arith.constant dense<0.000000e+00> : vector<256x32xf32>
    %26 = tpu.matmul %24, %25, %cst_16 {dimension_numbers = #tpu.dot_dimension_numbers<[1], [0], [0], [1], [0, 0, 1, 1], [], []>} : vector<256x32xbf16>, vector<32x32xbf16>, vector<256x32xf32> -> vector<256x32xf32>
    %27 = arith.addf %19, %26 : vector<256x32xf32>
    %c15_i32 = arith.constant 15 : i32
    %28 = tpu.dynamic_rotate %10 by %c15_i32 dim 0 : vector<256x32xf32>, i32 -> vector<256x32xf32>
    %c0_17 = arith.constant 0 : index
    %c2 = arith.constant 2 : index
    %29 = vector.load %arg2[%c0_17, %c2] : memref<256x9xf32, #tpu.memory_space<vmem>>, vector<256x1xf32>
    %30 = vector.broadcast %29 : vector<256x1xf32> to vector<256x32xf32>
    %31 = arith.mulf %28, %30 : vector<256x32xf32>
    %32 = arith.truncf %31 : vector<256x32xf32> to vector<256x32xbf16>
    %c64 = arith.constant 64 : index
    %c0_18 = arith.constant 0 : index
    %33 = vector.load %arg5[%c64, %c0_18] : memref<288x32xbf16, #tpu.memory_space<vmem>>, vector<32x32xbf16>
    %cst_19 = arith.constant dense<0.000000e+00> : vector<256x32xf32>
    %34 = tpu.matmul %32, %33, %cst_19 {dimension_numbers = #tpu.dot_dimension_numbers<[1], [0], [0], [1], [0, 0, 1, 1], [], []>} : vector<256x32xbf16>, vector<32x32xbf16>, vector<256x32xf32> -> vector<256x32xf32>
    %35 = arith.addf %27, %34 : vector<256x32xf32>
    %c1_i32 = arith.constant 1 : i32
    %36 = tpu.dynamic_rotate %10 by %c1_i32 dim 0 : vector<256x32xf32>, i32 -> vector<256x32xf32>
    %c0_20 = arith.constant 0 : index
    %c3 = arith.constant 3 : index
    %37 = vector.load %arg2[%c0_20, %c3] : memref<256x9xf32, #tpu.memory_space<vmem>>, vector<256x1xf32>
    %38 = vector.broadcast %37 : vector<256x1xf32> to vector<256x32xf32>
    %39 = arith.mulf %36, %38 : vector<256x32xf32>
    %40 = arith.truncf %39 : vector<256x32xf32> to vector<256x32xbf16>
    %c96 = arith.constant 96 : index
    %c0_21 = arith.constant 0 : index
    %41 = vector.load %arg5[%c96, %c0_21] : memref<288x32xbf16, #tpu.memory_space<vmem>>, vector<32x32xbf16>
    %cst_22 = arith.constant dense<0.000000e+00> : vector<256x32xf32>
    %42 = tpu.matmul %40, %41, %cst_22 {dimension_numbers = #tpu.dot_dimension_numbers<[1], [0], [0], [1], [0, 0, 1, 1], [], []>} : vector<256x32xbf16>, vector<32x32xbf16>, vector<256x32xf32> -> vector<256x32xf32>
    %43 = arith.addf %35, %42 : vector<256x32xf32>
    %44 = arith.truncf %10 : vector<256x32xf32> to vector<256x32xbf16>
    %c128 = arith.constant 128 : index
    %c0_23 = arith.constant 0 : index
    %45 = vector.load %arg5[%c128, %c0_23] : memref<288x32xbf16, #tpu.memory_space<vmem>>, vector<32x32xbf16>
    %cst_24 = arith.constant dense<0.000000e+00> : vector<256x32xf32>
    %46 = tpu.matmul %44, %45, %cst_24 {dimension_numbers = #tpu.dot_dimension_numbers<[1], [0], [0], [1], [0, 0, 1, 1], [], []>} : vector<256x32xbf16>, vector<32x32xbf16>, vector<256x32xf32> -> vector<256x32xf32>
    %47 = arith.addf %43, %46 : vector<256x32xf32>
    %c255_i32 = arith.constant 255 : i32
    %48 = tpu.dynamic_rotate %10 by %c255_i32 dim 0 : vector<256x32xf32>, i32 -> vector<256x32xf32>
    %c0_25 = arith.constant 0 : index
    %c5 = arith.constant 5 : index
    %49 = vector.load %arg2[%c0_25, %c5] : memref<256x9xf32, #tpu.memory_space<vmem>>, vector<256x1xf32>
    %50 = vector.broadcast %49 : vector<256x1xf32> to vector<256x32xf32>
    %51 = arith.mulf %48, %50 : vector<256x32xf32>
    %52 = arith.truncf %51 : vector<256x32xf32> to vector<256x32xbf16>
    %c160 = arith.constant 160 : index
    %c0_26 = arith.constant 0 : index
    %53 = vector.load %arg5[%c160, %c0_26] : memref<288x32xbf16, #tpu.memory_space<vmem>>, vector<32x32xbf16>
    %cst_27 = arith.constant dense<0.000000e+00> : vector<256x32xf32>
    %54 = tpu.matmul %52, %53, %cst_27 {dimension_numbers = #tpu.dot_dimension_numbers<[1], [0], [0], [1], [0, 0, 1, 1], [], []>} : vector<256x32xbf16>, vector<32x32xbf16>, vector<256x32xf32> -> vector<256x32xf32>
    %55 = arith.addf %47, %54 : vector<256x32xf32>
    %c241_i32 = arith.constant 241 : i32
    %56 = tpu.dynamic_rotate %10 by %c241_i32 dim 0 : vector<256x32xf32>, i32 -> vector<256x32xf32>
    %c0_28 = arith.constant 0 : index
    %c6 = arith.constant 6 : index
    %57 = vector.load %arg2[%c0_28, %c6] : memref<256x9xf32, #tpu.memory_space<vmem>>, vector<256x1xf32>
    %58 = vector.broadcast %57 : vector<256x1xf32> to vector<256x32xf32>
    %59 = arith.mulf %56, %58 : vector<256x32xf32>
    %60 = arith.truncf %59 : vector<256x32xf32> to vector<256x32xbf16>
    %c192 = arith.constant 192 : index
    %c0_29 = arith.constant 0 : index
    %61 = vector.load %arg5[%c192, %c0_29] : memref<288x32xbf16, #tpu.memory_space<vmem>>, vector<32x32xbf16>
    %cst_30 = arith.constant dense<0.000000e+00> : vector<256x32xf32>
    %62 = tpu.matmul %60, %61, %cst_30 {dimension_numbers = #tpu.dot_dimension_numbers<[1], [0], [0], [1], [0, 0, 1, 1], [], []>} : vector<256x32xbf16>, vector<32x32xbf16>, vector<256x32xf32> -> vector<256x32xf32>
    %63 = arith.addf %55, %62 : vector<256x32xf32>
    %c240_i32 = arith.constant 240 : i32
    %64 = tpu.dynamic_rotate %10 by %c240_i32 dim 0 : vector<256x32xf32>, i32 -> vector<256x32xf32>
    %c0_31 = arith.constant 0 : index
    %c7 = arith.constant 7 : index
    %65 = vector.load %arg2[%c0_31, %c7] : memref<256x9xf32, #tpu.memory_space<vmem>>, vector<256x1xf32>
    %66 = vector.broadcast %65 : vector<256x1xf32> to vector<256x32xf32>
    %67 = arith.mulf %64, %66 : vector<256x32xf32>
    %68 = arith.truncf %67 : vector<256x32xf32> to vector<256x32xbf16>
    %c224 = arith.constant 224 : index
    %c0_32 = arith.constant 0 : index
    %69 = vector.load %arg5[%c224, %c0_32] : memref<288x32xbf16, #tpu.memory_space<vmem>>, vector<32x32xbf16>
    %cst_33 = arith.constant dense<0.000000e+00> : vector<256x32xf32>
    %70 = tpu.matmul %68, %69, %cst_33 {dimension_numbers = #tpu.dot_dimension_numbers<[1], [0], [0], [1], [0, 0, 1, 1], [], []>} : vector<256x32xbf16>, vector<32x32xbf16>, vector<256x32xf32> -> vector<256x32xf32>
    %71 = arith.addf %63, %70 : vector<256x32xf32>
    %c239_i32 = arith.constant 239 : i32
    %72 = tpu.dynamic_rotate %10 by %c239_i32 dim 0 : vector<256x32xf32>, i32 -> vector<256x32xf32>
    %c0_34 = arith.constant 0 : index
    %c8 = arith.constant 8 : index
    %73 = vector.load %arg2[%c0_34, %c8] : memref<256x9xf32, #tpu.memory_space<vmem>>, vector<256x1xf32>
    %74 = vector.broadcast %73 : vector<256x1xf32> to vector<256x32xf32>
    %75 = arith.mulf %72, %74 : vector<256x32xf32>
    %76 = arith.truncf %75 : vector<256x32xf32> to vector<256x32xbf16>
    %c256 = arith.constant 256 : index
    %c0_35 = arith.constant 0 : index
    %77 = vector.load %arg5[%c256, %c0_35] : memref<288x32xbf16, #tpu.memory_space<vmem>>, vector<32x32xbf16>
    %cst_36 = arith.constant dense<0.000000e+00> : vector<256x32xf32>
    %78 = tpu.matmul %76, %77, %cst_36 {dimension_numbers = #tpu.dot_dimension_numbers<[1], [0], [0], [1], [0, 0, 1, 1], [], []>} : vector<256x32xbf16>, vector<32x32xbf16>, vector<256x32xf32> -> vector<256x32xf32>
    %79 = arith.addf %71, %78 : vector<256x32xf32>
    %c0_37 = arith.constant 0 : index
    %c0_38 = arith.constant 0 : index
    %80 = vector.load %arg6[%c0_37, %c0_38] : memref<1x32xf32, #tpu.memory_space<vmem>>, vector<1x32xf32>
    %81 = vector.broadcast %80 : vector<1x32xf32> to vector<256x32xf32>
    %82 = arith.addf %79, %81 : vector<256x32xf32>
    %cst_39 = arith.constant 0.000000e+00 : f32
    %83 = vector.broadcast %cst_39 : f32 to vector<256x32xf32>
    %84 = arith.maximumf %82, %83 : vector<256x32xf32>
    %85 = arith.truncf %84 : vector<256x32xf32> to vector<256x32xbf16>
    %c0_40 = arith.constant 0 : index
    %c0_41 = arith.constant 0 : index
    %86 = vector.load %arg7[%c0_40, %c0_41] : memref<32x128xbf16, #tpu.memory_space<vmem>>, vector<32x128xbf16>
    %cst_42 = arith.constant dense<0.000000e+00> : vector<256x128xf32>
    %87 = tpu.matmul %85, %86, %cst_42 {dimension_numbers = #tpu.dot_dimension_numbers<[1], [0], [0], [1], [0, 0, 1, 1], [], []>} : vector<256x32xbf16>, vector<32x128xbf16>, vector<256x128xf32> -> vector<256x128xf32>
    %c0_43 = arith.constant 0 : index
    %c0_44 = arith.constant 0 : index
    %c0_45 = arith.constant 0 : index
    %c0_46 = arith.constant 0 : index
    %88 = vector.load %arg1[%c0_43, %c0_44, %c0_45, %c0_46] : memref<1x16x16x128xf32, #tpu.memory_space<vmem>>, vector<1x16x16x128xf32>
    %89 = vector.shape_cast %88 : vector<1x16x16x128xf32> to vector<16x16x128xf32>
    %90 = vector.shape_cast %89 : vector<16x16x128xf32> to vector<256x128xf32>
    %c0_47 = arith.constant 0 : index
    %c0_48 = arith.constant 0 : index
    %91 = vector.load %arg8[%c0_47, %c0_48] : memref<1x128xf32, #tpu.memory_space<vmem>>, vector<1x128xf32>
    %92 = vector.broadcast %91 : vector<1x128xf32> to vector<256x128xf32>
    %93 = arith.addf %87, %92 : vector<256x128xf32>
    %94 = arith.addf %93, %90 : vector<256x128xf32>
    %cst_49 = arith.constant 0.000000e+00 : f32
    %95 = vector.broadcast %cst_49 : f32 to vector<256x128xf32>
    %96 = arith.maximumf %94, %95 : vector<256x128xf32>
    %97 = vector.shape_cast %96 : vector<256x128xf32> to vector<16x16x128xf32>
    %c0_50 = arith.constant 0 : index
    %c0_51 = arith.constant 0 : index
    %c0_52 = arith.constant 0 : index
    %c0_53 = arith.constant 0 : index
    %98 = vector.load %arg9[%c0_50, %c0_51, %c0_52, %c0_53] : memref<1x16x16x128xf32, #tpu.memory_space<vmem>>, vector<1x16x16x128xf32>
    %99 = vector.shape_cast %98 : vector<1x16x16x128xf32> to vector<16x16x128xf32>
    %100 = vector.shape_cast %97 : vector<16x16x128xf32> to vector<1x16x16x128xf32>
    tpu.vector_store %arg9[%c0_50, %c0_51, %c0_52, %c0_53], %100 {strides = array<i32>} : memref<1x16x16x128xf32, #tpu.memory_space<vmem>>, vector<1x16x16x128xf32>,
    return
  }
  func.func @transform_0(%arg0: i32) -> (i32, i32, i32, i32) {
    %c0_i32 = arith.constant 0 : i32
    %c0_i32_0 = arith.constant 0 : i32
    %c0_i32_1 = arith.constant 0 : i32
    %c0_i32_2 = arith.constant 0 : i32
    return %arg0, %c0_i32, %c0_i32_0, %c0_i32_1 : i32, i32, i32, i32
  }
  func.func @transform_1(%arg0: i32) -> (i32, i32) {
    %c0_i32 = arith.constant 0 : i32
    %c0_i32_0 = arith.constant 0 : i32
    %c0_i32_1 = arith.constant 0 : i32
    return %c0_i32, %c0_i32_0 : i32, i32
  }
  func.func @transform_2(%arg0: i32) -> (i32, i32) {
    %c0_i32 = arith.constant 0 : i32
    %c0_i32_0 = arith.constant 0 : i32
    %c0_i32_1 = arith.constant 0 : i32
    return %c0_i32, %c0_i32_0 : i32, i32
  }
  func.func @transform_3(%arg0: i32) -> (i32, i32) {
    %c0_i32 = arith.constant 0 : i32
    %c0_i32_0 = arith.constant 0 : i32
    %c0_i32_1 = arith.constant 0 : i32
    return %c0_i32, %c0_i32_0 : i32, i32
  }
  func.func @transform_4(%arg0: i32) -> (i32, i32) {
    %c0_i32 = arith.constant 0 : i32
    %c0_i32_0 = arith.constant 0 : i32
    %c0_i32_1 = arith.constant 0 : i32
    return %c0_i32, %c0_i32_0 : i32, i32
  }
  func.func @transform_5(%arg0: i32) -> (i32, i32) {
    %c0_i32 = arith.constant 0 : i32
    %c0_i32_0 = arith.constant 0 : i32
    %c0_i32_1 = arith.constant 0 : i32
    return %c0_i32, %c0_i32_0 : i32, i32
  }
  func.func @transform_6(%arg0: i32) -> (i32, i32) {
    %c0_i32 = arith.constant 0 : i32
    %c0_i32_0 = arith.constant 0 : i32
    %c0_i32_1 = arith.constant 0 : i32
    return %c0_i32, %c0_i32_0 : i32, i32
  }
  func.func @transform_7(%arg0: i32) -> (i32, i32) {
    %c0_i32 = arith.constant 0 : i32
    %c0_i32_0 = arith.constant 0 : i32
    %c0_i32_1 = arith.constant 0 : i32
    return %c0_i32, %c0_i32_0 : i32, i32
  }
  func.func @transform_8(%arg0: i32) -> (i32, i32, i32, i32) {
    %c0_i32 = arith.constant 0 : i32
    %c0_i32_0 = arith.constant 0 : i32
    %c0_i32_1 = arith.constant 0 : i32
    %c0_i32_2 = arith.constant 0 : i32
    return %arg0, %c0_i32, %c0_i32_0, %c0_i32_1 : i32, i32, i32, i32
  }
}

</mosaic_0001>

<bundles_post_ra>
// kernel: tpu_custom_call.1
= control target key start
LH: loop header
LB: loop body
LE: loop exit
PB: predicated region body
PF: predicated region fallthrough
CT: control target
= control target key end

     0   :  { %13 = vsyncpa [#allocation3], 0  ;;  %s8906_s0 = inlined_call_operand.vmem [shape: f32[2,16,16,128], index: 0, kind: input, shape index: {}]   ;;  %s8907_s1 = inlined_call_operand.vmem [shape: f32[256,9], index: 1, kind: input, shape index: {}]   ;;  %s8908_s2 = inlined_call_operand.vmem [shape: bf16[128,32], index: 2, kind: input, shape index: {}]   ;;  %s8909_s3 = inlined_call_operand.vmem [shape: f32[1,32], index: 3, kind: input, shape index: {}]   ;;  %s8910_s4 = inlined_call_operand.vmem [shape: bf16[288,32], index: 4, kind: input, shape index: {}]   ;;  %s8911_s5 = inlined_call_operand.vmem [shape: f32[1,32], index: 5, kind: input, shape index: {}]   ;;  %s8912_s6 = inlined_call_operand.vmem [shape: bf16[32,128], index: 6, kind: input, shape index: {}]   ;;  %s8913_s7 = inlined_call_operand.vmem [shape: f32[1,128], index: 7, kind: input, shape index: {}]   ;;  %s8914_s8 = inlined_call_operand.hbm [shape: f32[2,16,16,128], index: 8, kind: output, shape index: {}]  }
   0x1   :  { %15 = vsyncpa [#allocation3 + $0x1], 0  ;;  %s6418_s27 = smov 0   ;;  %s6420_s28 = smov 0  }
   0x2   :  { %s6422_s29 = smov 0   ;;  %s6424_s30 = smov 0  }
   0x3 LB: > { %s6439_s9 = sadd.s32 4294967295, %s6360_s30   ;;  %s4978_s10 = sadd.s32 4294967294, %s6360_s30   ;;  %s6360_s30 = sphi %s6424_s30, %s9475_s30   ;;  %s6356_s29 = sphi %s6422_s29, %s9474_s29   ;;  %s6352_s28 = sphi %s6420_s28, %s9473_s28   ;;  %s6348_s27 = sphi %s6418_s27, %s9472_s27  }
   0x4   : > { %s6443_s11 = sadd.s32 1, %s6360_s30   ;;  %s201_s12 = sadd.s32 1, %s6356_s29 }
   0x5   : > { %s198_s13 = ssub.s32 %s6360_s30, %s6443_s11  ;;  %p211_p0 = scmp.ne.s32.totalorder %s6356_s29, %s6352_s28 }
   0x6   : > { %p199_p1 = scmp.eq.s32.totalorder %s198_s13, 0  ;;  %p212_p2 = scmp.eq.s32.totalorder %s6439_s9, 1 }
   0x7   : > { %p217_p3 = scmp.ne.s32.totalorder %s6352_s28, %s6348_s27  ;;  %p218_p4 = scmp.eq.s32.totalorder %s4978_s10, 1 }
   0x8   : > { %s6454_s14 = scalar_select %p199_p1, %s6356_s29, %s201_s12  }
   0x9   : > { %p6456_p5 = por %p212_p2, %p211_p0  ;;  %p6460_p6 = por %p218_p4, %p217_p3 }
   0xa   : > { %p4981_p7 = scmp.ge.s32.totalorder %s6360_s30, 1  ;;  %p265_p8 = scmp.lt.s32.totalorder %s6360_s30, 3 }
   0xc   : > { %p266_p9 = pnand %p4981_p7, %p265_p8 }
   0xe   : > { %269 = sbr.rel (%p266_p9) target bundleno = 1267 (0x4f3), region = 52 }
  0x15   : > { %v6469_v0 = vld [vmem:[%s8907_s1 + $0x10] sm:$0xff]  ;;  %v6474_v1 = vld [vmem:[%s8907_s1] sm:$0xff]  ;;  %p299_p10 = scmp.lt.s32.totalorder %s6439_s9, 1  ;;  %v6362_v2 = vmov 0   ;;  %v6485_v4 = vld [vmem:[%s8907_s1 + $0x18] sm:$0xff]  ;;  %vm1120_vm1 = vcmask 261120  }
  0x16   : > { %6105 = vset.pattern.permute.xlu1 %v6362_v2  ;;  %6104 = vset.pattern.permute.xlu0 %v6362_v2  ;;  %v6185_v3 = vld [vmem:[%s8908_s2] sm:$0xff]   ;;  %v6490_v5 = vld [vmem:[%s8907_s1 + $0x8] sm:$0xff]  ;;  %v6187_v7 = vld [vmem:[%s8908_s2 + $0x10] sm:$0xff]   ;;  %s296_s22 = sand.u32 1, %s6352_s28   ;;  %s5182_s10 = sshll.u32 %s6439_s9, 12 }
  0x17   : > { %728 = vperm.xlu1 %6105, %v6469_v0   ;;  %718 = vperm.xlu0 %6104, %v6474_v1   ;;  %v6186_v6 = vld [vmem:[%s8908_s2 + $0x8] sm:$0xff]   ;;  %s300_s13 = scalar_select %p299_p10, %s6439_s9, 1  ;;  %v6509_v9 = vld [vmem:[%s8907_s1 + $0x20] sm:$0xff]  ;;  %v6188_v10 = vld [vmem:[%s8908_s2 + $0x18] sm:$0xff]  }
  0x18   : > { %5387 = vmatprep.subr.bf16.mxu0 %v6185_v3  ;;  %v6504_v8 = vld [vmem:[%s8907_s1 + $0x28] sm:$0xff]  ;;  %v6519_v11 = vld [vmem:[%s8907_s1 + $0x38] sm:$0xff]  ;;  %v6524_v12 = vld [vmem:[%s8907_s1 + $0x30] sm:$0xff]  ;;  %s4982_s25 = sshll.u32 %s296_s22, 8  ;;  %s8856_s18 = scalar_lea.hbm %s8914_s8, %s5182_s10 }
  0x19   : > { %5388 = vmatpush3.bf16.msra.mxu0 %v6185_v3  ;;  %s5181_s23 = sshll.u32 %s300_s13, 8  ;;  %v6189_v13 = vld [vmem:[%s8908_s2 + $0x20] sm:$0xff]   ;;  %v6541_v16 = vld [vmem:[%s8907_s1 + $0x48] sm:$0xff]  ;;  %v6556_v20 = vld [vmem:[%s8907_s1 + $0x58] sm:$0xff]  ;;  %s8764_s26 = scalar_lea.vmem [#allocation2], %s4982_s25 }
  0x1a   : > { %5389 = vmatprep.subr.bf16.mxu0 %v6186_v6  ;;  %s6529_s19 = scalar_lea.vmem %s8906_s0, %s5181_s23  ;;  %v6546_v17 = vld [vmem:[%s8907_s1 + $0x40] sm:$0xff]  ;;  %v6190_v19 = vld [vmem:[%s8908_s2 + $0x28] sm:$0xff]   ;;  %v6561_v21 = vld [vmem:[%s8907_s1 + $0x50] sm:$0xff]  ;;  %s4916_s12 = sshll.u32 %s8764_s26, 4  ;;  %s8858_s12 = int_to_ptr.vmem [resolvable:$true] %s4916_s12 }
  0x1b   : > { %733 = vperm.xlu1 %6105, %v6485_v4   ;;  %723 = vperm.xlu0 %6104, %v6490_v5   ;;  %v305_v14 = vld [vmem:[%s6529_s19] sm:$0xff]  ;;  %v306_v15 = vld [vmem:[%s6529_s19 + $0x8] sm:$0xff]  ;;  %v6191_v22 = vld [vmem:[%s8908_s2 + $0x30] sm:$0xff]   ;;  %s8865_s9 = scalar_lea.sflag [#allocation3], %s296_s22  ;;  %s6370_s20 = smov [#allocation2]  }
  0x1c   : > { %v337_v18 = vpack.c.bf16 %v306_v15, %v305_v14  ;;  %v6571_v23 = vld [vmem:[%s8907_s1 + $0x68] sm:$0xff]  ;;  %v6576_v24 = vld [vmem:[%s8907_s1 + $0x60] sm:$0xff]  ;;  %v6192_v25 = vld [vmem:[%s8908_s2 + $0x38] sm:$0xff]   ;;  %s6302_s21 = sshll.u32 %s6370_s20, 4  ;;  %s6303_s21 = int_to_ptr.vmem [resolvable:$false] %s6302_s21 }
  0x1d   : > { %5390 = vmatpush3.bf16.msra.mxu0 %v6186_v6  ;;  %v6586_v26 = vld [vmem:[%s8907_s1 + $0x78] sm:$0xff]  ;;  %v6591_v27 = vld [vmem:[%s8907_s1 + $0x70] sm:$0xff]  ;;  %v309_v30 = vld [vmem:[%s6529_s19 + $0x20] sm:$0xff]  ;;  %s6304_s24 = scalar_lea.vmem %s6303_s21, 8192  ;;  %p6305_p0 = scmp.lt.s32.totalorder %s8858_s12, %s6303_s21 }
  0x1e   : > { %5391 = vmatprep.subr.bf16.mxu0 %v6187_v7  ;;  %5403 = vmatprep.mubr.bf16.mxu0 %v337_v18  ;;  %v307_v28 = vld [vmem:[%s6529_s19 + $0x10] sm:$0xff]  ;;  %v308_v29 = vld [vmem:[%s6529_s19 + $0x18] sm:$0xff]  ;;  %v6599_v31 = vld [vmem:[%s8907_s1 + $0x88] sm:$0xff] }
  0x1f   : > { %743 = vperm.xlu1 %6105, %v6504_v8   ;;  %738 = vperm.xlu0 %6104, %v6509_v9   ;;  %v6604_v32 = vld [vmem:[%s8907_s1 + $0x80] sm:$0xff]  ;;  %v310_v33 = vld [vmem:[%s6529_s19 + $0x28] sm:$0xff]  ;;  %v338_v34 = vpack.c.bf16 %v308_v29, %v307_v28  ;;  %v6612_v36 = vld [vmem:[%s8907_s1 + $0x98] sm:$0xff] }
  0x20   : > { %v339_v35 = vpack.c.bf16 %v310_v33, %v309_v30  ;;  %v6617_v37 = vld [vmem:[%s8907_s1 + $0x90] sm:$0xff]  ;;  %v312_v39 = vld [vmem:[%s6529_s19 + $0x38] sm:$0xff]  ;;  %v313_v40 = vld [vmem:[%s6529_s19 + $0x40] sm:$0xff] }
  0x21   : > { %5392 = vmatpush3.bf16.msra.mxu0 %v6187_v7  ;;  %v311_v38 = vld [vmem:[%s6529_s19 + $0x30] sm:$0xff]  ;;  %v314_v41 = vld [vmem:[%s6529_s19 + $0x48] sm:$0xff]  ;;  %v6633_v43 = vld [vmem:[%s8907_s1 + $0xa0] sm:$0xff] }
  0x22   : > { %5393 = vmatprep.subr.bf16.mxu0 %v6188_v10  ;;  %v6628_v42 = vld [vmem:[%s8907_s1 + $0xa8] sm:$0xff]  ;;  %v340_v44 = vpack.c.bf16 %v312_v39, %v311_v38  ;;  %v341_v45 = vpack.c.bf16 %v314_v41, %v313_v40  ;;  %v6642_v46 = vld [vmem:[%s8907_s1 + $0xb8] sm:$0xff]  ;;  %v6647_v47 = vld [vmem:[%s8907_s1 + $0xb0] sm:$0xff] }
  0x23   : > { %753 = vperm.xlu1 %6105, %v6519_v11   ;;  %748 = vperm.xlu0 %6104, %v6524_v12   ;;  %v315_v48 = vld [vmem:[%s6529_s19 + $0x50] sm:$0xff]  ;;  %v316_v49 = vld [vmem:[%s6529_s19 + $0x58] sm:$0xff]  ;;  %v317_v50 = vld [vmem:[%s6529_s19 + $0x60] sm:$0xff] }
  0x24   : > { %v318_v51 = vld [vmem:[%s6529_s19 + $0x68] sm:$0xff]  ;;  %v6663_v53 = vld [vmem:[%s8907_s1 + $0xc0] sm:$0xff]  ;;  %v342_v54 = vpack.c.bf16 %v316_v49, %v315_v48  ;;  %v6670_v56 = vld [vmem:[%s8907_s1 + $0xd8] sm:$0xff] }
  0x25   : > { %5394 = vmatpush3.bf16.msra.mxu0 %v6188_v10  ;;  %v6658_v52 = vld [vmem:[%s8907_s1 + $0xc8] sm:$0xff]  ;;  %v343_v55 = vpack.c.bf16 %v318_v51, %v317_v50  ;;  %v6675_v57 = vld [vmem:[%s8907_s1 + $0xd0] sm:$0xff]  ;;  %v320_v59 = vld [vmem:[%s6529_s19 + $0x78] sm:$0xff] }
  0x26   : > { %5395 = vmatprep.subr.bf16.mxu0 %v6189_v13  ;;  %v319_v58 = vld [vmem:[%s6529_s19 + $0x70] sm:$0xff]  ;;  %v321_v60 = vld [vmem:[%s6529_s19 + $0x80] sm:$0xff]  ;;  %v322_v61 = vld [vmem:[%s6529_s19 + $0x88] sm:$0xff] }
  0x27   : > { %763 = vperm.xlu1 %6105, %v6541_v16   ;;  %758 = vperm.xlu0 %6104, %v6546_v17   ;;  %v6686_v62 = vld [vmem:[%s8907_s1 + $0xe8] sm:$0xff]  ;;  %v6691_v63 = vld [vmem:[%s8907_s1 + $0xe0] sm:$0xff]  ;;  %v344_v2 = vpack.c.bf16 %v320_v59, %v319_v58  ;;  %v345_v3 = vpack.c.bf16 %v322_v61, %v321_v60  ;;  %v6698_v6 = vld [vmem:[%s8907_s1 + $0xf8] sm:$0xff] }
  0x28   : > { %v6703_v7 = vld [vmem:[%s8907_s1 + $0xf0] sm:$0xff]  ;;  %v325_v14 = vld [vmem:[%s6529_s19 + $0xa0] sm:$0xff]  ;;  %v326_v15 = vld [vmem:[%s6529_s19 + $0xa8] sm:$0xff] }
  0x29   : > { %5396 = vmatpush3.bf16.msra.mxu0 %v6189_v13  ;;  %v323_v10 = vld [vmem:[%s6529_s19 + $0x90] sm:$0xff]  ;;  %v324_v13 = vld [vmem:[%s6529_s19 + $0x98] sm:$0xff]  ;;  %v329_v30 = vld [vmem:[%s6529_s19 + $0xc0] sm:$0xff] }
  0x2a   : > { %5397 = vmatprep.subr.bf16.mxu0 %v6190_v19  ;;  %v346_v18 = vpack.c.bf16 %v324_v13, %v323_v10  ;;  %v327_v28 = vld [vmem:[%s6529_s19 + $0xb0] sm:$0xff]  ;;  %v328_v29 = vld [vmem:[%s6529_s19 + $0xb8] sm:$0xff]  ;;  %v330_v33 = vld [vmem:[%s6529_s19 + $0xc8] sm:$0xff] }
  0x2b   : > { %773 = vperm.xlu1 %6105, %v6556_v20   ;;  %768 = vperm.xlu0 %6104, %v6561_v21   ;;  %v331_v38 = vld [vmem:[%s6529_s19 + $0xd0] sm:$0xff]  ;;  %v332_v39 = vld [vmem:[%s6529_s19 + $0xd8] sm:$0xff]  ;;  %v333_v40 = vld [vmem:[%s6529_s19 + $0xe0] sm:$0xff] }
  0x2c   : > { %v334_v41 = vld [vmem:[%s6529_s19 + $0xe8] sm:$0xff]  ;;  %v335_v48 = vld [vmem:[%s6529_s19 + $0xf0] sm:$0xff]  ;;  %v336_v49 = vld [vmem:[%s6529_s19 + $0xf8] sm:$0xff] }
  0x2d   : > { %5398 = vmatpush3.bf16.msra.mxu0 %v6190_v19  ;;  %v347_v19 = vpack.c.bf16 %v326_v15, %v325_v14  ;;  %v352_v50 = vpack.c.bf16 %v336_v49, %v335_v48  ;;  %v6193_v10 = vld [vmem:[%s8910_s4 + $0x30] sm:$0xff]   ;;  %v6194_v15 = vld [vmem:[%s8910_s4 + $0x38] sm:$0xff]  }
  0x2e   : > { %5399 = vmatprep.subr.bf16.mxu0 %v6191_v22  ;;  %5795 = vmatprep.subr.bf16.mxu1 %v6193_v10 }
  0x2f   : > { %783 = vperm.xlu1 %6105, %v6571_v23   ;;  %778 = vperm.xlu0 %6104, %v6576_v24  }
  0x30   : > { %5797 = vmatpush3.bf16.msra.mxu1 %v6193_v10  ;;  %v6876_v10 = vld [vmem:[%s8910_s4 + $0x40] sm:$0xff]  }
  0x31   : > { %5400 = vmatpush3.bf16.msra.mxu0 %v6191_v22  ;;  %v8919_v22 = vmov 1   ;;  %5796 = vmatprep.subr.bf16.mxu1 %v6194_v15 }
  0x32   : > { %5401 = vmatprep.subr.bf16.mxu0 %v6192_v25 }
  0x33   : > { %793 = vperm.xlu1 %6105, %v6586_v26   ;;  %788 = vperm.xlu0 %6104, %v6591_v27  }
  0x34   : > { %5798 = vmatpush3.bf16.msra.mxu1 %v6194_v15 }
  0x35   : > { %5402 = vmatpush3.bf16.msra.mxu0 %v6192_v25  ;;  %v8915_v25 = vmov 3   ;;  %5579 = vmatprep.subr.bf16.mxu1 %v6876_v10 }
  0x37   : > { %803 = vperm.xlu1 %6105, %v6599_v31   ;;  %798 = vperm.xlu0 %6104, %v6604_v32  }
  0x38   : > { %5404 = vmatmul.mubr.bf16.vlgmr.msra.gmra.mrb[0].mxu0 %v338_v34  ;;  %v348_v34 = vpack.c.bf16 %v328_v29, %v327_v28 }
  0x39   : > { %5407 = vmatprep.mubr.bf16.mxu0 %v339_v35  ;;  %v349_v35 = vpack.c.bf16 %v330_v33, %v329_v30 }
  0x3b   : > { %813 = vperm.xlu1 %6105, %v6612_v36   ;;  %808 = vperm.xlu0 %6104, %v6617_v37  }
  0x3f   : > { %823 = vperm.xlu1 %6105, %v6628_v42   ;;  %818 = vperm.xlu0 %6104, %v6633_v43  }
  0x40   : > { %5408 = vmatmul.mubr.bf16.gmra.mrb[4].mxu0 %v340_v44  ;;  %v350_v44 = vpack.c.bf16 %v332_v39, %v331_v38 }
  0x41   : > { %5411 = vmatprep.mubr.bf16.mxu0 %v341_v45  ;;  %v351_v45 = vpack.c.bf16 %v334_v41, %v333_v40 }
  0x43   : > { %833 = vperm.xlu1 %6105, %v6642_v46   ;;  %828 = vperm.xlu0 %6104, %v6647_v47  }
  0x47   : > { %843 = vperm.xlu1 %6105, %v6658_v52   ;;  %838 = vperm.xlu0 %6104, %v6663_v53  }
  0x48   : > { %5412 = vmatmul.mubr.bf16.gmra.mrb[8].mxu0 %v342_v54 }
  0x49   : > { %5415 = vmatprep.mubr.bf16.mxu0 %v343_v55 }
  0x4b   : > { %853 = vperm.xlu1 %6105, %v6670_v56   ;;  %848 = vperm.xlu0 %6104, %v6675_v57  }
  0x4f   : > { %863 = vperm.xlu1 %6105, %v6686_v62   ;;  %858 = vperm.xlu0 %6104, %v6691_v63  }
  0x50   : > { %5416 = vmatmul.mubr.bf16.gmra.mrb[12].mxu0 %v344_v2  ;;  %v8917_v2 = vmov 5  }
  0x51   : > { %5419 = vmatprep.mubr.bf16.mxu0 %v345_v3 }
  0x53   : > { %873 = vperm.xlu1 %6105, %v6698_v6   ;;  %868 = vperm.xlu0 %6104, %v6703_v7  }
  0x57   : > { %6106 = vset.pattern.permute.xlu1 %v8919_v22  ;;  %6107 = vset.pattern.permute.xlu0 %v8915_v25 }
  0x58   : > { %933 = vperm.xlu1 %6106, %v6490_v5   ;;  %2082 = vperm.xlu0 %6107, %v6546_v17  }
  0x59   : > { %5420 = vmatmul.mubr.bf16.gmra.mrb[16].mxu0 %v346_v18 }
  0x5a   : > { %5423 = vmatprep.mubr.bf16.mxu0 %v347_v19 }
  0x5c   : > { %937 = vperm.xlu1 %6106, %v6469_v0   ;;  %2094 = vperm.xlu0 %6107, %v6556_v20  }
  0x60   : > { %945 = vperm.xlu1 %6106, %v6509_v9   ;;  %2102 = vperm.xlu0 %6107, %v6571_v23  }
  0x61   : > { %5424 = vmatmul.mubr.bf16.gmra.mrb[20].mxu0 %v348_v34 }
  0x62   : > { %5427 = vmatprep.mubr.bf16.mxu0 %v349_v35 }
  0x64   : > { %6108 = vset.pattern.permute.xlu1 %v8915_v25  ;;  %2110 = vperm.xlu0 %6107, %v6586_v26  }
  0x65   : > { %2086 = vperm.xlu1 %6108, %v6541_v16  }
  0x68   : > { %2118 = vperm.xlu0 %6107, %v6599_v31  }
  0x69   : > { %5428 = vmatmul.mubr.bf16.gmra.mrb[24].mxu0 %v350_v44  ;;  %2090 = vperm.xlu1 %6108, %v6561_v21  }
  0x6a   : > { %5431 = vmatprep.mubr.bf16.mxu0 %v351_v45 }
  0x6c   : > { %2126 = vperm.xlu0 %6107, %v6612_v36  }
  0x6d   : > { %2098 = vperm.xlu1 %6108, %v6576_v24  }
  0x70   : > { %2134 = vperm.xlu0 %6107, %v6628_v42  }
  0x71   : > { %5432 = vmatmul.mubr.bf16.gmra.mrb[28].mxu0 %v352_v50  ;;  %2106 = vperm.xlu1 %6108, %v6591_v27  }
  0x74   : > { %2142 = vperm.xlu0 %6107, %v6642_v46  }
  0x75   : > { %2114 = vperm.xlu1 %6108, %v6604_v32  }
  0x78   : > { %2150 = vperm.xlu0 %6107, %v6658_v52  }
  0x79   : > { %2122 = vperm.xlu1 %6108, %v6617_v37  }
  0x7c   : > { %2158 = vperm.xlu0 %6107, %v6670_v56  }
  0x7d   : > { %2130 = vperm.xlu1 %6108, %v6633_v43  }
  0x80   : > { %2166 = vperm.xlu0 %6107, %v6686_v62  }
  0x81   : > { %2138 = vperm.xlu1 %6108, %v6647_v47  }
  0x84   : > { %2174 = vperm.xlu0 %6107, %v6698_v6  }
  0x85   : > { %2146 = vperm.xlu1 %6108, %v6663_v53  }
  0x88   : > { %6109 = vset.pattern.permute.xlu0 %v8919_v22 }
  0x89   : > { %2154 = vperm.xlu1 %6108, %v6675_v57   ;;  %929 = vperm.xlu0 %6109, %v6474_v1  }
  0x8d   : > { %2162 = vperm.xlu1 %6108, %v6691_v63   ;;  %941 = vperm.xlu0 %6109, %v6485_v4  }
  0x91   : > { %2170 = vperm.xlu1 %6108, %v6703_v7   ;;  %953 = vperm.xlu0 %6109, %v6524_v12  }
  0x95   : > { %6110 = vset.pattern.permute.xlu1 %v8919_v22  ;;  %969 = vperm.xlu0 %6109, %v6561_v21  }
  0x96   : > { %v6757_v51 = vpop.permute.xlu1 %728  ;;  %949 = vperm.xlu1 %6110, %v6504_v8   ;;  %v6760_v54 = vpop.permute.xlu0 %718 }
  0x97   : > { %9112 = vst [vmem:[#allocation5_spill] sm:$0xff] %v6757_v51  ;;  %9113 = vst [vmem:[#allocation6_spill] sm:$0xff] %v6760_v54 }
  0x99   : > { %985 = vperm.xlu0 %6109, %v6591_v27  }
  0x9a   : > { %v6763_v55 = vpop.permute.xlu1 %733  ;;  %957 = vperm.xlu1 %6110, %v6519_v11   ;;  %v6766_v58 = vpop.permute.xlu0 %723 }
  0x9b   : > { %9114 = vst [vmem:[#allocation7_spill] sm:$0xff] %v6763_v55  ;;  %9115 = vst [vmem:[#allocation8_spill] sm:$0xff] %v6766_v58 }
  0x9d   : > { %1001 = vperm.xlu0 %6109, %v6617_v37  }
  0x9e   : > { %v6769_v59 = vpop.permute.xlu1 %743  ;;  %961 = vperm.xlu1 %6110, %v6546_v17   ;;  %v6772_v60 = vpop.permute.xlu0 %738 }
  0x9f   : > { %9116 = vst [vmem:[#allocation9_spill] sm:$0xff] %v6769_v59  ;;  %9117 = vst [vmem:[#allocation10_spill] sm:$0xff] %v6772_v60 }
  0xa1   : > { %1017 = vperm.xlu0 %6109, %v6647_v47  }
  0xa2   : > { %v6775_v61 = vpop.permute.xlu1 %753  ;;  %6111 = vset.pattern.permute.xlu1 %v8917_v2  ;;  %v6778_v3 = vpop.permute.xlu0 %748 }
  0xa3   : > { %9118 = vst [vmem:[#allocation11_spill] sm:$0xff] %v6775_v61  ;;  %9119 = vst [vmem:[#allocation12_spill] sm:$0xff] %v6778_v3  ;;  %2760 = vperm.xlu1 %6111, %v6490_v5   ;;  %v649_v3 = vlaneseq }
  0xa5   : > { %1033 = vperm.xlu0 %6109, %v6675_v57  }
  0xa6   : > { %v6785_v13 = vpop.permute.xlu1 %763  ;;  %v6787_v14 = vpop.permute.xlu0 %758 }
  0xa7   : > { %9120 = vst [vmem:[#allocation13_spill] sm:$0xff] %v6785_v13  ;;  %9121 = vst [vmem:[#allocation14_spill] sm:$0xff] %v6787_v14  ;;  %2764 = vperm.xlu1 %6111, %v6469_v0  }
  0xa9   : > { %1049 = vperm.xlu0 %6109, %v6703_v7  }
  0xaa   : > { %v6794_v18 = vpop.permute.xlu1 %773  ;;  %v6796_v5 = vpop.permute.xlu0 %768 }
  0xab   : > { %9122 = vst [vmem:[#allocation15_spill] sm:$0xff] %v6794_v18  ;;  %9123 = vst [vmem:[#allocation16_spill] sm:$0xff] %v6796_v5  ;;  %2772 = vperm.xlu1 %6111, %v6509_v9  }
  0xad   : > { %6134 = vset.pattern.permute.xlu0 %v8917_v2 }
  0xae   : > { %v6800_v19 = vpop.permute.xlu1 %783  ;;  %2756 = vperm.xlu0 %6134, %v6474_v1   ;;  %v6803_v28 = vpop.permute.xlu0 %778 }
  0xaf   : > { %9124 = vst [vmem:[#allocation17_spill] sm:$0xff] %v6800_v19  ;;  %9125 = vst [vmem:[#allocation18_spill] sm:$0xff] %v6803_v28  ;;  %2780 = vperm.xlu1 %6111, %v6524_v12  }
  0xb2   : > { %v6806_v29 = vpop.permute.xlu1 %793  ;;  %2768 = vperm.xlu0 %6134, %v6485_v4   ;;  %v6809_v30 = vpop.permute.xlu0 %788 }
  0xb3   : > { %9126 = vst [vmem:[#allocation19_spill] sm:$0xff] %v6806_v29  ;;  %9127 = vst [vmem:[#allocation20_spill] sm:$0xff] %v6809_v30  ;;  %6112 = vset.pattern.permute.xlu1 %v8919_v22 }
  0xb4   : > { %965 = vperm.xlu1 %6112, %v6541_v16  }
  0xb6   : > { %v6813_v9 = vpop.permute.xlu1 %803  ;;  %2776 = vperm.xlu0 %6134, %v6504_v8   ;;  %v6816_v33 = vpop.permute.xlu0 %798 }
  0xb7   : > { %9128 = vst [vmem:[#allocation21_spill] sm:$0xff] %v6813_v9  ;;  %9129 = vst [vmem:[#allocation22_spill] sm:$0xff] %v6816_v33 }
  0xb8   : > { %6113 = vset.pattern.permute.xlu1 %v8917_v2 }
  0xb9   : > { %2792 = vperm.xlu1 %6113, %v6541_v16  }
  0xba   : > { %v6820_v1 = vpop.permute.xlu1 %813  ;;  %2784 = vperm.xlu0 %6134, %v6519_v11   ;;  %v6823_v4 = vpop.permute.xlu0 %808 }
  0xbb   : > { %9130 = vst [vmem:[#allocation23_spill] sm:$0xff] %v6820_v1  ;;  %9131 = vst [vmem:[#allocation24_spill] sm:$0xff] %v6823_v4 }
  0xbd   : > { %6114 = vset.pattern.permute.xlu1 %v8919_v22 }
  0xbe   : > { %v6826_v34 = vpop.permute.xlu1 %823  ;;  %973 = vperm.xlu1 %6114, %v6556_v20   ;;  %2788 = vperm.xlu0 %6134, %v6546_v17   ;;  %v6830_v35 = vpop.permute.xlu0 %818 }
  0xbf   : > { %9132 = vst [vmem:[#allocation25_spill] sm:$0xff] %v6826_v34  ;;  %9133 = vst [vmem:[#allocation26_spill] sm:$0xff] %v6830_v35 }
  0xc2   : > { %v6832_v38 = vpop.permute.xlu1 %833  ;;  %6115 = vset.pattern.permute.xlu1 %v8917_v2  ;;  %2800 = vperm.xlu0 %6134, %v6556_v20   ;;  %v6836_v39 = vpop.permute.xlu0 %828 }
  0xc3   : > { %9134 = vst [vmem:[#allocation27_spill] sm:$0xff] %v6832_v38  ;;  %9135 = vst [vmem:[#allocation28_spill] sm:$0xff] %v6836_v39  ;;  %2796 = vperm.xlu1 %6115, %v6561_v21   ;;  %v6195_v21 = vld [vmem:[%s8910_s4 + $0x10] sm:$0xff]  }
  0xc4   : > { %5435 = vmatprep.subr.bf16.mxu0 %v6195_v21 }
  0xc5   : > { %5436 = vmatpush3.bf16.msra.mxu0 %v6195_v21 }
  0xc6   : > { %v6839_v40 = vpop.permute.xlu1 %843  ;;  %2804 = vperm.xlu0 %6134, %v6576_v24   ;;  %v6842_v41 = vpop.permute.xlu0 %838 }
  0xc7   : > { %9136 = vst [vmem:[#allocation29_spill] sm:$0xff] %v6839_v40  ;;  %9137 = vst [vmem:[#allocation30_spill] sm:$0xff] %v6842_v41  ;;  %6116 = vset.pattern.permute.xlu1 %v8919_v22  ;;  %v8921_v40 = vmov 6  }
  0xc8   : > { %977 = vperm.xlu1 %6116, %v6576_v24   ;;  %v6196_v24 = vld [vmem:[%s8910_s4 + $0x18] sm:$0xff]  }
  0xc9   : > { %5437 = vmatprep.subr.bf16.mxu0 %v6196_v24 }
  0xca   : > { %v6846_v17 = vpop.permute.xlu1 %853  ;;  %2816 = vperm.xlu0 %6134, %v6586_v26   ;;  %v6849_v44 = vpop.permute.xlu0 %848  ;;  %5438 = vmatpush3.bf16.msra.mxu0 %v6196_v24 }
  0xcb   : > { %9138 = vst [vmem:[#allocation31_spill] sm:$0xff] %v6846_v17  ;;  %9139 = vst [vmem:[#allocation32_spill] sm:$0xff] %v6849_v44  ;;  %v9145_v44 = vmov 1  }
  0xcc   : > { %981 = vperm.xlu1 %6116, %v6571_v23  }
  0xce   : > { %v6855_v45 = vpop.permute.xlu1 %863  ;;  %2820 = vperm.xlu0 %6134, %v6604_v32   ;;  %v6858_v48 = vpop.permute.xlu0 %858 }
  0xcf   : > { %9140 = vst [vmem:[#allocation33_spill] sm:$0xff] %v6855_v45  ;;  %9141 = vst [vmem:[#allocation34_spill] sm:$0xff] %v6858_v48  ;;  %v9144_v48 = vmov 5  }
  0xd0   : > { %6117 = vset.pattern.permute.xlu1 %v8917_v2 }
  0xd1   : > { %2808 = vperm.xlu1 %6117, %v6571_v23  }
  0xd2   : > { %v6865_v49 = vpop.permute.xlu1 %873  ;;  %2832 = vperm.xlu0 %6134, %v6612_v36   ;;  %v6868_v50 = vpop.permute.xlu0 %868 }
  0xd3   : > { %9142 = vst [vmem:[#allocation35_spill] sm:$0xff] %v6865_v49  ;;  %9143 = vst [vmem:[#allocation36_spill] sm:$0xff] %v6868_v50 }
  0xd5   : > { %6118 = vset.pattern.permute.xlu1 %v8919_v22 }
  0xd6   : > { %989 = vperm.xlu1 %6118, %v6586_v26   ;;  %2836 = vperm.xlu0 %6134, %v6633_v43  }
  0xd7   : > { %v6878_v15 = vpop.permute.xlu1 %933  ;;  %v6880_v21 = vpop.permute.xlu0 %2082 }
  0xda   : > { %6119 = vset.pattern.permute.xlu1 %v8917_v2  ;;  %2848 = vperm.xlu0 %6134, %v6642_v46  }
  0xdb   : > { %2812 = vperm.xlu1 %6119, %v6591_v27   ;;  %v6886_v24 = vpop.permute.xlu1 %937  ;;  %v6888_v25 = vpop.permute.xlu0 %2094 }
  0xde   : > { %2852 = vperm.xlu0 %6134, %v6663_v53  }
  0xdf   : > { %6120 = vset.pattern.permute.xlu1 %v8919_v22  ;;  %v6892_v49 = vpop.permute.xlu1 %945  ;;  %v6894_v50 = vpop.permute.xlu0 %2102 }
  0xe0   : > { %993 = vperm.xlu1 %6120, %v6604_v32  }
  0xe2   : > { %2864 = vperm.xlu0 %6134, %v6670_v56  }
  0xe3   : > { %v6898_v2 = vpop.permute.xlu0 %2110 }
  0xe4   : > { %997 = vperm.xlu1 %6120, %v6599_v31   ;;  %v6901_v27 = vpop.permute.xlu1 %2086 }
  0xe6   : > { %2868 = vperm.xlu0 %6134, %v6691_v63  }
  0xe7   : > { %v6904_v45 = vpop.permute.xlu0 %2118 }
  0xe8   : > { %6121 = vset.pattern.permute.xlu1 %v9144_v48  ;;  %v6907_v22 = vpop.permute.xlu1 %2090 }
  0xe9   : > { %2824 = vperm.xlu1 %6121, %v6599_v31  }
  0xea   : > { %2880 = vperm.xlu0 %6134, %v6698_v6  }
  0xeb   : > { %v6911_v32 = vpop.permute.xlu0 %2126 }
  0xec   : > { %v6913_v17 = vpop.permute.xlu1 %2098 }
  0xed   : > { %6122 = vset.pattern.permute.xlu1 %v9145_v44 }
  0xee   : > { %1005 = vperm.xlu1 %6122, %v6612_v36   ;;  %6138 = vset.pattern.permute.xlu0 %v8921_v40 }
  0xef   : > { %3197 = vperm.xlu0 %6138, %v6469_v0   ;;  %v6919_v41 = vpop.permute.xlu0 %2134 }
  0xf0   : > { %v6921_v38 = vpop.permute.xlu1 %2106 }
  0xf2   : > { %6123 = vset.pattern.permute.xlu1 %v9144_v48 }
  0xf3   : > { %2828 = vperm.xlu1 %6123, %v6617_v37   ;;  %3209 = vperm.xlu0 %6138, %v6504_v8   ;;  %v6926_v39 = vpop.permute.xlu0 %2142 }
  0xf4   : > { %v6928_v34 = vpop.permute.xlu1 %2114 }
  0xf7   : > { %6124 = vset.pattern.permute.xlu1 %v9145_v44  ;;  %3217 = vperm.xlu0 %6138, %v6519_v11   ;;  %v6932_v40 = vpop.permute.xlu0 %2150 }
  0xf8   : > { %1009 = vperm.xlu1 %6124, %v6633_v43   ;;  %v6935_v35 = vpop.permute.xlu1 %2122 }
  0xfb   : > { %3225 = vperm.xlu0 %6138, %v6541_v16   ;;  %v6938_v1 = vpop.permute.xlu0 %2158 }
  0xfc   : > { %1013 = vperm.xlu1 %6124, %v6628_v42   ;;  %v6941_v8 = vpop.permute.xlu1 %2130 }
  0xff   : > { %3233 = vperm.xlu0 %6138, %v6556_v20   ;;  %v6944_v37 = vpop.permute.xlu0 %2166 }
 0x100   : > { %6125 = vset.pattern.permute.xlu1 %v9144_v48  ;;  %v6947_v11 = vpop.permute.xlu1 %2138 }
 0x101   : > { %2840 = vperm.xlu1 %6125, %v6628_v42  }
 0x103   : > { %3241 = vperm.xlu0 %6138, %v6571_v23   ;;  %v6951_v43 = vpop.permute.xlu0 %2174 }
 0x104   : > { %9146 = vst [vmem:[#allocation37_spill] sm:$0xff] %v6951_v43  ;;  %v6953_v16 = vpop.permute.xlu1 %2146 }
 0x105   : > { %6126 = vset.pattern.permute.xlu1 %v9145_v44 }
 0x106   : > { %1021 = vperm.xlu1 %6126, %v6642_v46  }
 0x107   : > { %3249 = vperm.xlu0 %6138, %v6586_v26  }
 0x108   : > { %v6958_v20 = vpop.permute.xlu1 %2154  ;;  %v6960_v4 = vpop.permute.xlu0 %929 }
 0x10a   : > { %6127 = vset.pattern.permute.xlu1 %v9144_v48 }
 0x10b   : > { %2844 = vperm.xlu1 %6127, %v6647_v47   ;;  %3257 = vperm.xlu0 %6138, %v6599_v31   ;;  %v6965_v23 = vpop.f32.mrb[0].mxu0 }
 0x10c   : > { %v6967_v9 = vpop.permute.xlu1 %2162  ;;  %v6969_v33 = vpop.f32.mrb[1].mxu0 }
 0x10d   : > { %v6971_v29 = vpop.permute.xlu0 %941  ;;  %v6973_v30 = vpop.f32.mrb[2].mxu0 }
 0x10e   : > { %v6975_v26 = vpop.f32.mrb[3].mxu0 }
 0x10f   : > { %6128 = vset.pattern.permute.xlu1 %v9145_v44  ;;  %3265 = vperm.xlu0 %6138, %v6612_v36  }
 0x110   : > { %1025 = vperm.xlu1 %6128, %v6663_v53   ;;  %v6980_v47 = vpop.permute.xlu1 %2170  ;;  %v7000_v53 = vld [vmem:[%s8909_s3] ss:$0 sm:$0xff] }
 0x111   : > { %v6982_v31 = vpop.permute.xlu0 %953 }
 0x112   : > { %9147 = vst [vmem:[#allocation38_spill] sm:$0xff] %v6982_v31 }
 0x113   : > { %3273 = vperm.xlu0 %6138, %v6628_v42   ;;  %v6985_v19 = vpop.f32.mrb[4].mxu0 }
 0x114   : > { %1029 = vperm.xlu1 %6128, %v6658_v52   ;;  %v6988_v28 = vpop.f32.mrb[5].mxu0 }
 0x115   : > { %v6990_v18 = vpop.permute.xlu1 %949  ;;  %v6992_v5 = vpop.permute.xlu0 %969 }
 0x116   : > { %9148 = vst [vmem:[#allocation39_spill] sm:$0xff] %v6992_v5  ;;  %v5410_v14 = vpop.f32.mrb[6].mxu0 }
 0x117   : > { %v6994_v36 = vpop.f32.mrb[7].mxu0  ;;  %3281 = vperm.xlu0 %6138, %v6642_v46   ;;  %v486_v42 = vadd.f32 %v5410_v14, %v7000_v53 }
 0x118   : > { %6129 = vset.pattern.permute.xlu1 %v9144_v48 }
 0x119   : > { %2856 = vperm.xlu1 %6129, %v6658_v52   ;;  %v7005_v61 = vpop.permute.xlu1 %957  ;;  %v7007_v13 = vpop.permute.xlu0 %985  ;;  %v7011_v60 = vmax.f32 %v486_v42, 0.0 }
 0x11a   : > { %9149 = vst [vmem:[#allocation40_spill] sm:$0xff] %v7005_v61  ;;  %9150 = vst [vmem:[#allocation41_spill] sm:$0xff] %v7007_v13 }
 0x11b   : > { %3289 = vperm.xlu0 %6138, %v6658_v52   ;;  %v5413_v55 = vpop.f32.mrb[8].mxu0  ;;  %9151 = vst [vmem:[#allocation42_spill] sm:$0xff] %v7011_v60  ;;  %v7022_v52 = vshrl.u32 %v649_v3, 7 }
 0x11c   : > { %v499_v46 = vadd.f32 %v5413_v55, %v7000_v53  ;;  %v490_v59 = vpop.f32.mrb[9].mxu0 }
 0x11d   : > { %v491_v51 = vadd.f32 %v7000_v53, %v490_v59  ;;  %6130 = vset.pattern.permute.xlu1 %v9145_v44  ;;  %v7015_v14 = vpop.permute.xlu1 %961  ;;  %v7017_v58 = vpop.permute.xlu0 %1001  ;;  %vm651_vm0 = vcmp.lt.s32.totalorder %v7022_v52, 1  ;;  %vm1583_vm2 = vcmp.lt.s32.totalorder %v7022_v52, 7 }
 0x11e   : > { %9152 = vst [vmem:[#allocation43_spill] sm:$0xff] %v7015_v14  ;;  %9153 = vst [vmem:[#allocation44_spill] sm:$0xff] %v7017_v58  ;;  %v7019_v54 = vmax.f32 %v499_v46, 0.0  ;;  %v5414_v13 = vpop.f32.mrb[10].mxu0  ;;  %1037 = vperm.xlu1 %6130, %v6670_v56   ;;  %v8930_v58 = vrot.slane %v7011_v60, 7 }
 0x11f   : > { %v7024_v5 = vmax.f32 %v491_v51, 0.0  ;;  %v502_v55 = vadd.f32 %v5414_v13, %v7000_v53  ;;  %v493_v42 = vpop.f32.mrb[11].mxu0  ;;  %3297 = vperm.xlu0 %6138, %v6670_v56  }
 0x120   : > { %9154 = vst [vmem:[#allocation45_spill] sm:$0xff] %v7019_v54  ;;  %v494_v59 = vadd.f32 %v7000_v53, %v493_v42  ;;  %v627_v14 = vrot.slane %v7019_v54, 7 }
 0x121   : > { %9155 = vst [vmem:[#allocation46_spill] sm:$0xff] %v7024_v5  ;;  %v7030_v61 = vmax.f32 %v502_v55, 0.0  ;;  %v7032_v46 = vpop.permute.xlu0 %1017  ;;  %v625_v3 = vrot.slane %v7024_v5, 7 }
 0x122   : > { %9157 = vst [vmem:[#allocation48_spill] sm:$0xff] %v7032_v46  ;;  %v7036_v31 = vmax.f32 %v494_v59, 0.0  ;;  %6131 = vset.pattern.permute.xlu1 %v9144_v48  ;;  %v7039_v51 = vpop.permute.xlu1 %2760 }
 0x123   : > { %9156 = vst [vmem:[#allocation47_spill] sm:$0xff] %v7030_v61  ;;  %9159 = vst [vmem:[#allocation50_spill] sm:$0xff] %v7039_v51  ;;  %v628_v56 = vrot.slane %v7030_v61, 7  ;;  %2860 = vperm.xlu1 %6131, %v6675_v57   ;;  %3305 = vperm.xlu0 %6138, %v6686_v62   ;;  %v5417_v13 = vpop.f32.mrb[12].mxu0  ;;  %v7049_v55 = vsel %vm651_vm0, %v8930_v58, %v625_v3 }
 0x124   : > { %9158 = vst [vmem:[#allocation49_spill] sm:$0xff] %v7036_v31  ;;  %9160 = vst [vmem:[#allocation51_spill] sm:$0xff] %v7049_v55  ;;  %v515_v42 = vadd.f32 %v5417_v13, %v7000_v53  ;;  %v506_v59 = vpop.f32.mrb[13].mxu0  ;;  %v626_v51 = vrot.slane %v7036_v31, 7  ;;  %v2185_v57 = vmul.f32 %v6880_v21, %v7049_v55 }
 0x125   : > { %v507_v46 = vadd.f32 %v7000_v53, %v506_v59  ;;  %v7054_v54 = vpop.permute.xlu0 %1033  ;;  %v5418_v61 = vpop.f32.mrb[14].mxu0  ;;  %v7060_v5 = vsel %vm651_vm0, %v627_v14, %v628_v56 }
 0x126   : > { %9161 = vst [vmem:[#allocation52_spill] sm:$0xff] %v7054_v54  ;;  %9162 = vst [vmem:[#allocation53_spill] sm:$0xff] %v7060_v5  ;;  %v7062_v60 = vmax.f32 %v515_v42, 0.0  ;;  %v518_v58 = vadd.f32 %v5418_v61, %v7000_v53  ;;  %v7065_v13 = vpop.permute.xlu1 %2764  ;;  %v509_v43 = vpop.f32.mrb[15].mxu0  ;;  %v7069_v59 = vsel %vm651_vm0, %v625_v3, %v626_v51  ;;  %v7073_v54 = vsel %vm651_vm0, %v626_v51, %v627_v14 }
 0x127   : > { %9164 = vst [vmem:[#allocation55_spill] sm:$0xff] %v7065_v13  ;;  %9165 = vst [vmem:[#allocation56_spill] sm:$0xff] %v7069_v59  ;;  %v7075_v21 = vmax.f32 %v507_v46, 0.0  ;;  %v510_v55 = vadd.f32 %v7000_v53, %v509_v43  ;;  %6132 = vset.pattern.permute.xlu1 %v9145_v44  ;;  %3313 = vperm.xlu0 %6138, %v6698_v6   ;;  %v2186_v3 = vmul.f32 %v6901_v27, %v7069_v59  ;;  %v8939_v59 = vmov 7  }
 0x128   : > { %9163 = vst [vmem:[#allocation54_spill] sm:$0xff] %v7062_v60  ;;  %9166 = vst [vmem:[#allocation57_spill] sm:$0xff] %v7073_v54  ;;  %v631_v61 = vrot.slane %v7062_v60, 7  ;;  %v7081_v42 = vmax.f32 %v518_v58, 0.0  ;;  %1041 = vperm.xlu1 %6132, %v6691_v63   ;;  %v2187_v14 = vmul.f32 %v6907_v22, %v7073_v54  ;;  %v2188_v13 = vmul.f32 %v6888_v25, %v7060_v5  ;;  %v6198_v54 = vld [vmem:[%s8910_s4 + $0x48] sm:$0xff]  }
 0x129   : > { %9167 = vst [vmem:[#allocation58_spill] sm:$0xff] %v7075_v21  ;;  %v629_v46 = vrot.slane %v7075_v21, 7  ;;  %v7089_v51 = vmax.f32 %v510_v55, 0.0  ;;  %v7091_v43 = vpop.permute.xlu0 %1049  ;;  %v2213_v63 = vpack.c.bf16 %v2186_v3, %v2185_v57 }
 0x12a   : > { %9168 = vst [vmem:[#allocation59_spill] sm:$0xff] %v7081_v42  ;;  %9170 = vst [vmem:[#allocation61_spill] sm:$0xff] %v7091_v43  ;;  %v632_v58 = vrot.slane %v7081_v42, 7  ;;  %v7096_v60 = vpop.permute.xlu1 %2772  ;;  %v2214_v22 = vpack.c.bf16 %v2188_v13, %v2187_v14 }
 0x12b   : > { %9169 = vst [vmem:[#allocation60_spill] sm:$0xff] %v7089_v51  ;;  %9171 = vst [vmem:[#allocation62_spill] sm:$0xff] %v7096_v60  ;;  %v630_v27 = vrot.slane %v7089_v51, 7  ;;  %6142 = vset.pattern.permute.xlu0 %v8939_v59  ;;  %v7102_v55 = vsel %vm651_vm0, %v628_v56, %v629_v46  ;;  %5555 = vmatprep.mubr.msk.bf16.mxu1 %vm1120_vm1, %v2213_v63 }
 0x12c   : > { %9172 = vst [vmem:[#allocation63_spill] sm:$0xff] %v7102_v55  ;;  %v5421_v25 = vpop.f32.mrb[16].mxu0  ;;  %1045 = vperm.xlu1 %6132, %v6686_v62   ;;  %v7111_v57 = vsel %vm651_vm0, %v631_v61, %v632_v58  ;;  %5556 = vmatmul.mubr.msk.bf16.vlgmr.msra.gmra.mrb[0].mxu1 %vm1120_vm1, %v2214_v22  ;;  %v2189_v22 = vmul.f32 %v6913_v17, %v7102_v55  ;;  %v7144_v17 = vld [vmem:[%s8910_s4 + $0x50] sm:$0xff]  }
 0x12d   : > { %9173 = vst [vmem:[#allocation64_spill] sm:$0xff] %v7111_v57  ;;  %v531_v3 = vadd.f32 %v5421_v25, %v7000_v53  ;;  %3630 = vperm.xlu0 %6142, %v6469_v0   ;;  %v522_v56 = vpop.f32.mrb[17].mxu0  ;;  %v7116_v13 = vpop.permute.xlu0 %2756  ;;  %v7120_v14 = vsel %vm651_vm0, %v629_v46, %v630_v27  ;;  %v7124_v63 = vsel %vm651_vm0, %v630_v27, %v631_v61 }
 0x12e   : > { %9174 = vst [vmem:[#allocation65_spill] sm:$0xff] %v7116_v13  ;;  %9175 = vst [vmem:[#allocation66_spill] sm:$0xff] %v7120_v14  ;;  %v523_v59 = vadd.f32 %v7000_v53, %v522_v56  ;;  %v5422_v5 = vpop.f32.mrb[18].mxu0  ;;  %v7127_v43 = vpop.permute.xlu1 %2780  ;;  %v2190_v0 = vmul.f32 %v6894_v50, %v7120_v14  ;;  %v2191_v25 = vmul.f32 %v6921_v38, %v7124_v63  ;;  %5580 = vmatpush3.bf16.msra.mxu1 %v6876_v10 }
 0x12f   : > { %9176 = vst [vmem:[#allocation67_spill] sm:$0xff] %v7124_v63  ;;  %9177 = vst [vmem:[#allocation68_spill] sm:$0xff] %v7127_v43  ;;  %v7136_v46 = vmax.f32 %v531_v3, 0.0  ;;  %v534_v61 = vadd.f32 %v5422_v5, %v7000_v53  ;;  %v525_v27 = vpop.f32.mrb[19].mxu0  ;;  %v2192_v56 = vmul.f32 %v6898_v2, %v7111_v57  ;;  %5581 = vmatprep.subr.bf16.mxu1 %v6198_v54 }
 0x130   : > { %v7146_v50 = vmax.f32 %v523_v59, 0.0  ;;  %v526_v38 = vadd.f32 %v7000_v53, %v525_v27  ;;  %6133 = vset.pattern.permute.xlu1 %v9144_v48  ;;  %v2215_v10 = vpack.c.bf16 %v2190_v0, %v2189_v22 }
 0x131   : > { %9178 = vst [vmem:[#allocation69_spill] sm:$0xff] %v7136_v46  ;;  %v7150_v3 = vmax.f32 %v534_v61, 0.0  ;;  %3646 = vperm.xlu0 %6142, %v6524_v12   ;;  %2872 = vperm.xlu1 %6133, %v6686_v62   ;;  %v7154_v2 = vpop.permute.xlu0 %2768  ;;  %v2216_v5 = vpack.c.bf16 %v2192_v56, %v2191_v25  ;;  %v635_v59 = vrot.slane %v7136_v46, 7 }
 0x132   : > { %9179 = vst [vmem:[#allocation70_spill] sm:$0xff] %v7146_v50  ;;  %9181 = vst [vmem:[#allocation72_spill] sm:$0xff] %v7154_v2  ;;  %v633_v57 = vrot.slane %v7146_v50, 7  ;;  %v7157_v63 = vmax.f32 %v526_v38, 0.0  ;;  %5559 = vmatprep.mubr.msk.bf16.mxu1 %vm1120_vm1, %v2215_v10  ;;  %5582 = vmatpush3.bf16.msra.mxu1 %v6198_v54  ;;  %v8947_v54 = vmov 2   ;;  %v7180_v10 = vld [vmem:[%s8907_s1 + $0x8] sm:$0xff] }
 0x133   : > { %9180 = vst [vmem:[#allocation71_spill] sm:$0xff] %v7150_v3  ;;  %v7161_v27 = vpop.permute.xlu1 %965  ;;  %5615 = vmatprep.subr.bf16.mxu1 %v7144_v17  ;;  %v636_v12 = vrot.slane %v7150_v3, 7 }
 0x134   : > { %9182 = vst [vmem:[#allocation73_spill] sm:$0xff] %v7157_v63  ;;  %v634_v62 = vrot.slane %v7157_v63, 7  ;;  %v5425_v22 = vpop.f32.mrb[20].mxu0  ;;  %v7168_v0 = vsel %vm651_vm0, %v632_v58, %v633_v57  ;;  %5560 = vmatmul.mubr.msk.bf16.gmra.mrb[4].mxu1 %vm1120_vm1, %v2216_v5 }
 0x135   : > { %9183 = vst [vmem:[#allocation74_spill] sm:$0xff] %v7168_v0  ;;  %v547_v25 = vadd.f32 %v5425_v22, %v7000_v53  ;;  %6147 = vset.pattern.permute.xlu0 %v8947_v54  ;;  %v538_v61 = vpop.f32.mrb[21].mxu0  ;;  %v7173_v56 = vpop.permute.xlu0 %2776  ;;  %6135 = vset.pattern.permute.xlu1 %v9145_v44  ;;  %v2193_v5 = vmul.f32 %v6928_v34, %v7168_v0 }
 0x136   : > { %9184 = vst [vmem:[#allocation75_spill] sm:$0xff] %v7173_v56  ;;  %v539_v38 = vadd.f32 %v7000_v53, %v538_v61  ;;  %1621 = vperm.xlu0 %6147, %v7180_v10   ;;  %v5426_v58 = vpop.f32.mrb[22].mxu0  ;;  %1053 = vperm.xlu1 %6135, %v6698_v6   ;;  %v7191_v44 = vsel %vm651_vm0, %v633_v57, %v634_v62 }
 0x137   : > { %v7185_v22 = vmax.f32 %v547_v25, 0.0  ;;  %v550_v54 = vadd.f32 %v5426_v58, %v7000_v53  ;;  %v541_v61 = vpop.f32.mrb[23].mxu0  ;;  %9186 = vst [vmem:[#allocation77_spill] sm:$0xff] %v7191_v44  ;;  %v7195_v14 = vsel %vm651_vm0, %v634_v62, %v635_v59  ;;  %v2194_v25 = vmul.f32 %v6904_v45, %v7191_v44  ;;  %v7221_v45 = vld [vmem:[%s8907_s1 + $0x10] sm:$0xff] }
 0x138   : > { %9187 = vst [vmem:[#allocation78_spill] sm:$0xff] %v7195_v14  ;;  %v7197_v55 = vmax.f32 %v539_v38, 0.0  ;;  %v542_v43 = vadd.f32 %v7000_v53, %v541_v61  ;;  %v7200_v34 = vpop.permute.xlu1 %2792  ;;  %v7206_v6 = vsel %vm651_vm0, %v635_v59, %v636_v12  ;;  %v2195_v62 = vmul.f32 %v6935_v35, %v7195_v14 }
 0x139   : > { %9185 = vst [vmem:[#allocation76_spill] sm:$0xff] %v7185_v22  ;;  %9189 = vst [vmem:[#allocation80_spill] sm:$0xff] %v7200_v34  ;;  %v7208_v58 = vmax.f32 %v550_v54, 0.0  ;;  %v7210_v57 = vpop.permute.xlu0 %2784  ;;  %v639_v38 = vrot.slane %v7185_v22, 7  ;;  %v2217_v59 = vpack.c.bf16 %v2194_v25, %v2193_v5  ;;  %v2196_v35 = vmul.f32 %v6911_v32, %v7206_v6 }
 0x13a   : > { %9188 = vst [vmem:[#allocation79_spill] sm:$0xff] %v7197_v55  ;;  %9190 = vst [vmem:[#allocation81_spill] sm:$0xff] %v7206_v6  ;;  %v637_v61 = vrot.slane %v7197_v55, 7  ;;  %v7216_v0 = vmax.f32 %v542_v43, 0.0  ;;  %1625 = vperm.xlu0 %6147, %v7221_v45   ;;  %6136 = vset.pattern.permute.xlu1 %v9144_v48  ;;  %v467_v14 = vadd.f32 %v6965_v23, %v7000_v53 }
 0x13b   : > { %9191 = vst [vmem:[#allocation82_spill] sm:$0xff] %v7208_v58  ;;  %9192 = vst [vmem:[#allocation83_spill] sm:$0xff] %v7210_v57  ;;  %v640_v54 = vrot.slane %v7208_v58, 7  ;;  %5563 = vmatprep.mubr.msk.bf16.mxu1 %vm1120_vm1, %v2217_v59  ;;  %2876 = vperm.xlu1 %6136, %v6703_v7   ;;  %v459_v48 = vadd.f32 %v7000_v53, %v6969_v33  ;;  %v462_v32 = vadd.f32 %v7000_v53, %v6975_v26  ;;  %v7248_v7 = vld [vmem:[%s8907_s1 + $0x28] sm:$0xff] }
 0x13c   : > { %9193 = vst [vmem:[#allocation84_spill] sm:$0xff] %v7216_v0  ;;  %v638_v43 = vrot.slane %v7216_v0, 7  ;;  %v5429_v44 = vpop.f32.mrb[24].mxu0  ;;  %v7235_v5 = vsel %vm651_vm0, %v636_v12, %v637_v61  ;;  %v2218_v23 = vpack.c.bf16 %v2196_v35, %v2195_v62  ;;  %9195 = vst [vmem:[#allocation86_spill] sm:$0xff] %v7248_v7  ;;  %v7266_v62 = vld [vmem:[%s8910_s4] sm:$0xff]  }
 0x13d   : > { %9194 = vst [vmem:[#allocation85_spill] sm:$0xff] %v7235_v5  ;;  %v563_v25 = vadd.f32 %v5429_v44, %v7000_v53  ;;  %v554_v6 = vpop.f32.mrb[25].mxu0  ;;  %v7242_v34 = vpop.permute.xlu1 %973  ;;  %v2197_v44 = vmul.f32 %v6941_v8, %v7235_v5  ;;  %v7276_v8 = vsel %vm651_vm0, %v639_v38, %v640_v54  ;;  %5471 = vmatprep.subr.bf16.mxu0 %v7266_v62 }
 0x13e   : > { %v555_v59 = vadd.f32 %v7000_v53, %v554_v6  ;;  %1637 = vperm.xlu0 %6147, %v7248_v7   ;;  %v7251_v12 = vpop.permute.xlu0 %2788  ;;  %v5430_v33 = vpop.f32.mrb[26].mxu0  ;;  %v7255_v26 = vsel %vm651_vm0, %v637_v61, %v638_v43  ;;  %v7261_v6 = vsel %vm651_vm0, %v638_v43, %v639_v38  ;;  %5564 = vmatmul.mubr.msk.bf16.gmra.mrb[8].mxu1 %vm1120_vm1, %v2218_v23  ;;  %v9202_v7 = vmov 6  }
 0x13f   : > { %9196 = vst [vmem:[#allocation87_spill] sm:$0xff] %v7251_v12  ;;  %9197 = vst [vmem:[#allocation88_spill] sm:$0xff] %v7255_v26  ;;  %v7268_v35 = vmax.f32 %v563_v25, 0.0  ;;  %v566_v12 = vadd.f32 %v5430_v33, %v7000_v53  ;;  %v557_v61 = vpop.f32.mrb[27].mxu0  ;;  %v2198_v57 = vmul.f32 %v6919_v41, %v7255_v26  ;;  %v470_v43 = vadd.f32 %v6973_v30, %v7000_v53  ;;  %v7295_v30 = vld [vmem:[%s8907_s1] sm:$0xff] }
 0x140   : > { %9198 = vst [vmem:[#allocation89_spill] sm:$0xff] %v7261_v6  ;;  %9200 = vst [vmem:[#allocation91_spill] sm:$0xff] %v7276_v8  ;;  %v7280_v5 = vmax.f32 %v555_v59, 0.0  ;;  %v558_v25 = vadd.f32 %v7000_v53, %v557_v61  ;;  %6137 = vset.pattern.permute.xlu1 %v9202_v7  ;;  %v2199_v23 = vmul.f32 %v6947_v11, %v7261_v6  ;;  %v7287_v33 = vmax.f32 %v462_v32, 0.0  ;;  %v7304_v11 = vld [vmem:[%s8907_s1 + $0x30] sm:$0xff] }
 0x141   : > { %9199 = vst [vmem:[#allocation90_spill] sm:$0xff] %v7268_v35  ;;  %v643_v41 = vrot.slane %v7268_v35, 7  ;;  %v7290_v38 = vmax.f32 %v566_v12, 0.0  ;;  %3189 = vperm.xlu1 %6137, %v7295_v30   ;;  %v2219_v59 = vpack.c.bf16 %v2198_v57, %v2197_v44  ;;  %v2200_v6 = vmul.f32 %v6926_v39, %v7276_v8 }
 0x142   : > { %9201 = vst [vmem:[#allocation92_spill] sm:$0xff] %v7280_v5  ;;  %9203 = vst [vmem:[#allocation93_spill] sm:$0xff] %v7287_v33  ;;  %v641_v7 = vrot.slane %v7280_v5, 7  ;;  %v7299_v61 = vmax.f32 %v558_v25, 0.0  ;;  %1641 = vperm.xlu0 %6147, %v7304_v11   ;;  %v7307_v32 = vpop.permute.xlu1 %2796  ;;  %v7309_v12 = vpop.permute.xlu0 %2800  ;;  %v7313_v26 = vmax.f32 %v467_v14, 0.0  ;;  %v7315_v57 = vmax.f32 %v459_v48, 0.0 }
 0x143   : > { %9204 = vst [vmem:[#allocation94_spill] sm:$0xff] %v7290_v38  ;;  %9206 = vst [vmem:[#allocation96_spill] sm:$0xff] %v7307_v32  ;;  %v644_v44 = vrot.slane %v7290_v38, 7  ;;  %5567 = vmatprep.mubr.msk.bf16.mxu1 %vm1120_vm1, %v2219_v59  ;;  %v7319_v25 = vmax.f32 %v470_v43, 0.0  ;;  %v2220_v2 = vpack.c.bf16 %v2200_v6, %v2199_v23  ;;  %v7328_v39 = vmul.f32 %v6971_v29, %v7287_v33 }
 0x144   : > { %9205 = vst [vmem:[#allocation95_spill] sm:$0xff] %v7299_v61  ;;  %9207 = vst [vmem:[#allocation97_spill] sm:$0xff] %v7309_v12  ;;  %v642_v60 = vrot.slane %v7299_v61, 7  ;;  %v5433_v56 = vpop.f32.mrb[28].mxu0  ;;  %v7324_v12 = vsel %vm651_vm0, %v640_v54, %v641_v7  ;;  %v475_v14 = vadd.f32 %v7000_v53, %v6988_v28  ;;  %v7342_v54 = vld [vmem:[%s8907_s1 + $0x48] sm:$0xff] }
 0x145   : > { %9208 = vst [vmem:[#allocation98_spill] sm:$0xff] %v7315_v57  ;;  %9209 = vst [vmem:[#allocation99_spill] sm:$0xff] %v7324_v12  ;;  %v579_v48 = vadd.f32 %v5433_v56, %v7000_v53  ;;  %3193 = vperm.xlu1 %6137, %v7180_v10   ;;  %v570_v43 = vpop.f32.mrb[29].mxu0  ;;  %v7336_v59 = vsel %vm651_vm0, %v643_v41, %v644_v44  ;;  %v2201_v23 = vmul.f32 %v6953_v16, %v7324_v12 }
 0x146   : > { %9210 = vst [vmem:[#allocation100_spill] sm:$0xff] %v7336_v59  ;;  %v571_v6 = vadd.f32 %v7000_v53, %v570_v43  ;;  %9211 = vst [vmem:[#allocation101_spill] sm:$0xff] %v7342_v54  ;;  %1653 = vperm.xlu0 %6147, %v7342_v54   ;;  %v5434_v29 = vpop.f32.mrb[30].mxu0  ;;  %v7345_v28 = vpop.permute.xlu0 %2804  ;;  %v7349_v56 = vsel %vm651_vm0, %v641_v7, %v642_v60  ;;  %v7355_v43 = vsel %vm651_vm0, %v642_v60, %v643_v41 }
 0x147   : > { %9212 = vst [vmem:[#allocation102_spill] sm:$0xff] %v7345_v28  ;;  %9213 = vst [vmem:[#allocation103_spill] sm:$0xff] %v7349_v56  ;;  %v7357_v8 = vmax.f32 %v579_v48, 0.0  ;;  %5568 = vmatmul.mubr.msk.bf16.gmra.mrb[12].mxu1 %vm1120_vm1, %v2220_v2  ;;  %v582_v54 = vadd.f32 %v5434_v29, %v7000_v53  ;;  %v573_v32 = vpop.f32.mrb[31].mxu0  ;;  %v7361_v13 = vpop.permute.xlu1 %977  ;;  %v2202_v7 = vmul.f32 %v6932_v40, %v7349_v56  ;;  %v7380_v40 = vld [vmem:[%s8907_s1 + $0x18] sm:$0xff] }
 0x148   : > { %9214 = vst [vmem:[#allocation104_spill] sm:$0xff] %v7355_v43  ;;  %v2204_v28 = vmul.f32 %v6938_v1, %v7336_v59  ;;  %v1061_v16 = vmul.f32 %v6990_v18, %v7319_v25  ;;  %v7369_v60 = vmax.f32 %v571_v6, 0.0  ;;  %v574_v41 = vadd.f32 %v7000_v53, %v573_v32  ;;  %v7395_v59 = vld [vmem:[%s8907_s1 + $0x50] sm:$0xff] }
 0x149   : > { %9215 = vst [vmem:[#allocation105_spill] sm:$0xff] %v7357_v8  ;;  %v2203_v2 = vmul.f32 %v6958_v20, %v7355_v43  ;;  %v647_v48 = vrot.slane %v7357_v8, 7  ;;  %v7375_v29 = vmax.f32 %v582_v54, 0.0  ;;  %3201 = vperm.xlu1 %6137, %v7380_v40   ;;  %v2221_v1 = vpack.c.bf16 %v2202_v7, %v2201_v23 }
 0x14a   : > { %9216 = vst [vmem:[#allocation106_spill] sm:$0xff] %v7369_v60  ;;  %v1056_v18 = vmul.f32 %v6960_v4, %v7357_v8  ;;  %v1058_v32 = vmul.f32 %v6886_v24, %v7315_v57  ;;  %v478_v20 = vadd.f32 %v7000_v53, %v6994_v36  ;;  %v645_v6 = vrot.slane %v7369_v60, 7  ;;  %1657 = vperm.xlu0 %6147, %v7395_v59   ;;  %v7410_v12 = vpop.permute.xlu0 %2816 }
 0x14b   : > { %9217 = vst [vmem:[#allocation107_spill] sm:$0xff] %v7375_v29  ;;  %v7390_v54 = vmax.f32 %v574_v41, 0.0  ;;  %v1060_v4 = vmul.f32 %v6892_v49, %v7313_v26  ;;  %5571 = vmatprep.mubr.msk.bf16.mxu1 %vm1120_vm1, %v2221_v1  ;;  %v7402_v24 = vpop.permute.xlu1 %981  ;;  %v2222_v36 = vpack.c.bf16 %v2204_v28, %v2203_v2  ;;  %v1057_v7 = vmul.f32 %v6878_v15, %v7375_v29  ;;  %v7421_v15 = vld [vmem:[%s8907_s1 + $0x20] sm:$0xff] }
 0x14c   : > { %v1089_v41 = vpack.c.bf16 %v7328_v39, %v1058_v32  ;;  %v483_v43 = vadd.f32 %v6985_v19, %v7000_v53  ;;  %v7414_v49 = vsel %vm651_vm0, %v644_v44, %v645_v6  ;;  %v7416_v1 = vmax.f32 %v475_v14, 0.0  ;;  %v7435_v44 = vld [vmem:[%s8907_s1 + $0x68] sm:$0xff] }
 0x14d   : > { %9218 = vst [vmem:[#allocation108_spill] sm:$0xff] %v7390_v54  ;;  %v646_v56 = vrot.slane %v7390_v54, 7  ;;  %9219 = vst [vmem:[#allocation109_spill] sm:$0xff] %v7414_v49  ;;  %v1090_v23 = vpack.c.bf16 %v1061_v16, %v1060_v4  ;;  %3205 = vperm.xlu1 %6137, %v7421_v15   ;;  %v1088_v39 = vpack.c.bf16 %v1057_v7, %v1056_v18  ;;  %v9220_v19 = vrot.slane %v7375_v29, 7 }
 0x14e   : > { %v7430_v28 = vmax.f32 %v478_v20, 0.0  ;;  %1669 = vperm.xlu0 %6147, %v7435_v44   ;;  %v2205_v16 = vmul.f32 %v6967_v9, %v7414_v49  ;;  %v9223_v20 = vld [vmem:[#allocation37_spill] sm:$0xff]  ;;  %v8983_v4 = vrot.slane %v7375_v29, 1 }
 0x14f   : > { %v7428_v53 = vsel %vm651_vm0, %v647_v48, %v9220_v19  ;;  %v7440_v14 = vsel %vm651_vm0, %v645_v6, %v646_v56  ;;  %v7446_v2 = vsel %vm651_vm0, %v646_v56, %v647_v48  ;;  %5572 = vmatmul.mubr.msk.bf16.gmra.mrb[16].mxu1 %vm1120_vm1, %v2222_v36  ;;  %5439 = vmatprep.mubr.msk.bf16.mxu0 %vm1120_vm1, %v1088_v39  ;;  %v8984_v56 = vrot.slane %v7315_v57, 1  ;;  %v7473_v39 = vld [vmem:[%s8907_s1 + $0x70] sm:$0xff]  ;;  %v7539_v49 = vld [vmem:[%s8907_s1 + $0x60] sm:$0xff] }
 0x150   : > { %9221 = vst [vmem:[#allocation110_spill] sm:$0xff] %v7428_v53  ;;  %9222 = vst [vmem:[#allocation111_spill] sm:$0xff] %v7440_v14  ;;  %v2206_v18 = vmul.f32 %v6944_v37, %v7440_v14  ;;  %v2207_v32 = vmul.f32 %v6980_v47, %v7446_v2  ;;  %v2208_v6 = vmul.f32 %v9223_v20, %v7428_v53  ;;  %5440 = vmatmul.mubr.msk.bf16.vlgmr.msra.gmra.mrb[32].mxu0 %vm1120_vm1, %v1089_v41  ;;  %v7457_v9 = vpop.permute.xlu1 %2808  ;;  %v9224_v37 = vld [vmem:[#allocation38_spill] sm:$0xff]  ;;  %v9225_v47 = vld [vmem:[#allocation40_spill] sm:$0xff]  ;;  %v7468_v41 = vpop.permute.xlu0 %2820 }
 0x151   : > { %3213 = vperm.xlu1 %6137, %v7304_v11   ;;  %5443 = vmatprep.mubr.msk.bf16.mxu0 %vm1120_vm1, %v1090_v23  ;;  %v1062_v36 = vmul.f32 %v9224_v37, %v7416_v1  ;;  %v1063_v7 = vmul.f32 %v9225_v47, %v7430_v28  ;;  %v6202_v23 = vld [vmem:[%s8910_s4 + $0x8] sm:$0xff]   ;;  %v7479_v19 = vmax.f32 %v483_v43, 0.0  ;;  %v7490_v37 = vsel %vm1583_vm2, %v8983_v4, %v8984_v56  ;;  %v9229_v43 = vld [vmem:[#allocation43_spill] sm:$0xff] }
 0x152   : > { %v2223_v48 = vpack.c.bf16 %v2206_v18, %v2205_v16  ;;  %1673 = vperm.xlu0 %6147, %v7473_v39   ;;  %v9227_v16 = vld [vmem:[#allocation42_spill] sm:$0xff]  ;;  %v2224_v20 = vpack.c.bf16 %v2208_v6, %v2207_v32  ;;  %9228 = vst [vmem:[#allocation38_spill] sm:$0xff] %v7490_v37  ;;  %v2482_v47 = vpack.c.bf16 %v7287_v33, %v7315_v57 }
 0x153   : > { %9226 = vst [vmem:[#allocation37_spill] sm:$0xff] %v7479_v19  ;;  %v1065_v18 = vmul.f32 %v7161_v27, %v9227_v16  ;;  %5472 = vmatpush3.bf16.msra.mxu0 %v7266_v62  ;;  %v1064_v14 = vmul.f32 %v9229_v43, %v7479_v19  ;;  %v7500_v27 = vld [vmem:[%s8907_s1 + $0x40] sm:$0xff]  ;;  %v1091_v6 = vpack.c.bf16 %v1063_v7, %v1062_v36  ;;  %v9232_v36 = vld [vmem:[#allocation46_spill] sm:$0xff]  ;;  %v9233_v7 = vld [vmem:[#allocation39_spill] sm:$0xff] }
 0x154   : > { %5575 = vmatprep.mubr.msk.bf16.mxu1 %vm1120_vm1, %v2223_v48  ;;  %v7506_v48 = vld [vmem:[%s8907_s1 + $0x88] sm:$0xff]  ;;  %5473 = vmatprep.subr.bf16.mxu0 %v6202_v23  ;;  %v7510_v43 = vpop.permute.xlu0 %2832  ;;  %v1066_v4 = vmul.f32 %v9233_v7, %v9232_v36  ;;  %v1067_v56 = vmul.f32 %v7242_v34, %v7036_v31  ;;  %v9235_v34 = vld [vmem:[#allocation45_spill] sm:$0xff]  ;;  %9236 = vst [vmem:[#allocation39_spill] sm:$0xff] %v7539_v49 }
 0x155   : > { %3221 = vperm.xlu1 %6137, %v7500_v27   ;;  %v990_v32 = vpop.permute.xlu1 %989  ;;  %9230 = vst [vmem:[#allocation40_spill] sm:$0xff] %v7506_v48  ;;  %v1092_v62 = vpack.c.bf16 %v1065_v18, %v1064_v14  ;;  %9231 = vst [vmem:[#allocation43_spill] sm:$0xff] %v7510_v43  ;;  %v7523_v14 = vld [vmem:[%s8907_s1 + $0x90] sm:$0xff]  ;;  %v1068_v7 = vmul.f32 %v7361_v13, %v9235_v34  ;;  %v6200_v43 = vld [vmem:[%s8910_s4 + $0x58] sm:$0xff]  }
 0x156   : > { %1685 = vperm.xlu0 %6147, %v7506_v48   ;;  %v1093_v37 = vpack.c.bf16 %v1067_v56, %v1066_v4  ;;  %v9239_v56 = vld [vmem:[#allocation41_spill] sm:$0xff] }
 0x157   : > { %5576 = vmatmul.mubr.msk.bf16.gmra.mrb[20].mxu1 %vm1120_vm1, %v2224_v20  ;;  %v2483_v20 = vpack.c.bf16 %v7319_v25, %v7313_v26  ;;  %5474 = vmatpush3.bf16.msra.mxu0 %v6202_v23  ;;  %v1070_v4 = vmul.f32 %v9239_v56, %v7075_v21 }
 0x158   : > { %5444 = vmatmul.mubr.msk.bf16.gmra.mrb[36].mxu0 %vm1120_vm1, %v1091_v6  ;;  %5583 = vmatprep.mubr.msk.bf16.mxu1 %vm1120_vm1, %v2482_v47  ;;  %v9234_v47 = vld [vmem:[#allocation47_spill] sm:$0xff]  ;;  %v7542_v48 = vpop.permute.xlu0 %2836 }
 0x159   : > { %3229 = vperm.xlu1 %6137, %v7395_v59   ;;  %5447 = vmatprep.mubr.msk.bf16.mxu0 %vm1120_vm1, %v1092_v62  ;;  %v1069_v6 = vmul.f32 %v7402_v24, %v9234_v47  ;;  %v2484_v62 = vpack.c.bf16 %v7430_v28, %v7416_v1  ;;  %9237 = vst [vmem:[#allocation112_spill] sm:$0xff] %v7542_v48  ;;  %v7547_v24 = vld [vmem:[%s8907_s1 + $0xa8] sm:$0xff] }
 0x15a   : > { %1689 = vperm.xlu0 %6147, %v7523_v14   ;;  %v7526_v18 = vpop.permute.xlu1 %2812  ;;  %9238 = vst [vmem:[#allocation113_spill] sm:$0xff] %v7547_v24 }
 0x15b   : > { %v1094_v23 = vpack.c.bf16 %v1069_v6, %v1068_v7  ;;  %v1071_v6 = vmul.f32 %v990_v32, %v7089_v51  ;;  %v7573_v7 = vld [vmem:[%s8910_s4 + $0x60] sm:$0xff]  }
 0x15c   : > { %v7575_v32 = vpop.permute.xlu0 %2848 }
 0x15d   : > { %3237 = vperm.xlu1 %6137, %v7539_v49   ;;  %9240 = vst [vmem:[#allocation41_spill] sm:$0xff] %v7575_v32  ;;  %v1095_v48 = vpack.c.bf16 %v1071_v6, %v1070_v4  ;;  %v7590_v32 = vld [vmem:[%s8907_s1 + $0xc8] sm:$0xff]  ;;  %v2487_v4 = vpack.c.bf16 %v9234_v47, %v9235_v34 }
 0x15e   : > { %1701 = vperm.xlu0 %6147, %v7547_v24   ;;  %v2486_v24 = vpack.c.bf16 %v7036_v31, %v9232_v36  ;;  %9243 = vst [vmem:[#allocation115_spill] sm:$0xff] %v7590_v32 }
 0x15f   : > { %5584 = vmatmul.mubr.msk.bf16.vlgmr.msra.gmra.mrb[24].mxu1 %vm1120_vm1, %v2483_v20  ;;  %v994_v13 = vpop.permute.xlu1 %993  ;;  %v7564_v20 = vld [vmem:[%s8907_s1 + $0xb0] sm:$0xff] }
 0x160   : > { %5448 = vmatmul.mubr.msk.bf16.gmra.mrb[40].mxu0 %vm1120_vm1, %v1093_v37  ;;  %5587 = vmatprep.mubr.msk.bf16.mxu1 %vm1120_vm1, %v2484_v62  ;;  %v2485_v62 = vpack.c.bf16 %v9227_v16, %v7479_v19 }
 0x161   : > { %3245 = vperm.xlu1 %6137, %v7473_v39   ;;  %5451 = vmatprep.mubr.msk.bf16.mxu0 %vm1120_vm1, %v1094_v23  ;;  %v9241_v23 = vld [vmem:[#allocation54_spill] sm:$0xff] }
 0x162   : > { %1705 = vperm.xlu0 %6147, %v7564_v20   ;;  %5616 = vmatpush3.bf16.msra.mxu1 %v7144_v17  ;;  %v1072_v56 = vmul.f32 %v994_v13, %v9241_v23  ;;  %v7584_v17 = vld [vmem:[%s8907_s1 + $0x80] sm:$0xff] }
 0x163   : > { %v998_v37 = vpop.permute.xlu1 %997  ;;  %5617 = vmatprep.subr.bf16.mxu1 %v6200_v43  ;;  %9242 = vst [vmem:[#allocation114_spill] sm:$0xff] %v7584_v17 }
 0x164   : > { %v1073_v49 = vmul.f32 %v998_v37, %v7081_v42 }
 0x165   : > { %3253 = vperm.xlu1 %6137, %v7584_v17  }
 0x166   : > { %v1096_v53 = vpack.c.bf16 %v1073_v49, %v1072_v56  ;;  %1717 = vperm.xlu0 %6147, %v7590_v32   ;;  %5618 = vmatpush3.bf16.msra.mxu1 %v6200_v43  ;;  %v7601_v49 = vpop.permute.xlu0 %2852  ;;  %v6232_v43 = vld [vmem:[%s8907_s1 + $0xd0] sm:$0xff]  ;;  %v7622_v56 = vld [vmem:[%s8907_s1 + $0xe8] sm:$0xff] }
 0x167   : > { %5588 = vmatmul.mubr.msk.bf16.gmra.mrb[28].mxu1 %vm1120_vm1, %v2485_v62  ;;  %5651 = vmatprep.subr.bf16.mxu1 %v7573_v7  ;;  %9244 = vst [vmem:[#allocation116_spill] sm:$0xff] %v7601_v49  ;;  %9247 = vst [vmem:[#allocation117_spill] sm:$0xff] %v7622_v56 }
 0x168   : > { %5452 = vmatmul.mubr.msk.bf16.gmra.mrb[44].mxu0 %vm1120_vm1, %v1095_v48  ;;  %v7596_v13 = vpop.permute.xlu1 %2824  ;;  %5591 = vmatprep.mubr.msk.bf16.mxu1 %vm1120_vm1, %v2486_v24  ;;  %v9245_v48 = vld [vmem:[#allocation44_spill] sm:$0xff]  ;;  %v2488_v24 = vpack.c.bf16 %v7089_v51, %v7075_v21 }
 0x169   : > { %3261 = vperm.xlu1 %6137, %v7523_v14   ;;  %5455 = vmatprep.mubr.msk.bf16.mxu0 %vm1120_vm1, %v1096_v53  ;;  %v1074_v6 = vmul.f32 %v9245_v48, %v7146_v50  ;;  %v7615_v53 = vld [vmem:[%s8907_s1 + $0xa0] sm:$0xff] }
 0x16a   : > { %1721 = vperm.xlu0 %6147, %v6232_v43   ;;  %9246 = vst [vmem:[#allocation44_spill] sm:$0xff] %v7615_v53  ;;  %v7626_v48 = vpop.permute.xlu0 %2864 }
 0x16b   : > { %9248 = vst [vmem:[#allocation118_spill] sm:$0xff] %v7626_v48  ;;  %v2491_v48 = vpack.c.bf16 %v7150_v3, %v7136_v46 }
 0x16d   : > { %3269 = vperm.xlu1 %6137, %v7615_v53   ;;  %v1006_v37 = vpop.permute.xlu1 %1005 }
 0x16e   : > { %v1075_v62 = vmul.f32 %v1006_v37, %v7157_v63  ;;  %1733 = vperm.xlu0 %6147, %v7622_v56   ;;  %v6235_v37 = vld [vmem:[%s8907_s1 + $0xf0] sm:$0xff]  ;;  %v2489_v56 = vpack.c.bf16 %v7081_v42, %v9241_v23 }
 0x16f   : > { %5592 = vmatmul.mubr.msk.bf16.gmra.mrb[0].mxu1 %vm1120_vm1, %v2487_v4  ;;  %v2490_v4 = vpack.c.bf16 %v7157_v63, %v7146_v50 }
 0x170   : > { %v1097_v17 = vpack.c.bf16 %v1075_v62, %v1074_v6  ;;  %5595 = vmatprep.mubr.msk.bf16.mxu1 %vm1120_vm1, %v2488_v24  ;;  %v7643_v6 = vld [vmem:[%s8907_s1 + $0xc0] sm:$0xff]  ;;  %v7646_v24 = vpop.permute.xlu0 %2868  ;;  %v9252_v62 = vmov 7  }
 0x171   : > { %3277 = vperm.xlu1 %6137, %v7564_v20   ;;  %9250 = vst [vmem:[#allocation120_spill] sm:$0xff] %v7643_v6  ;;  %9251 = vst [vmem:[#allocation121_spill] sm:$0xff] %v7646_v24 }
 0x172   : > { %1737 = vperm.xlu0 %6147, %v6235_v37   ;;  %v7633_v53 = vpop.permute.xlu1 %2828  ;;  %5456 = vmatmul.mubr.msk.bf16.gmra.mrb[48].mxu0 %vm1120_vm1, %v1097_v17 }
 0x173   : > { %9249 = vst [vmem:[#allocation119_spill] sm:$0xff] %v7633_v53  ;;  %v1556_v53 = vrot.slane %v7430_v28, 1 }
 0x174   : > { %v7655_v49 = vpop.permute.xlu0 %2880 }
 0x175   : > { %3285 = vperm.xlu1 %6137, %v7643_v6   ;;  %9253 = vst [vmem:[#allocation122_spill] sm:$0xff] %v7655_v49 }
 0x176   : > { %6171 = vset.pattern.permute.xlu0 %v9252_v62 }
 0x177   : > { %5596 = vmatmul.mubr.msk.bf16.gmra.mrb[4].mxu1 %vm1120_vm1, %v2489_v56  ;;  %3662 = vperm.xlu0 %6171, %v7395_v59   ;;  %v1010_v17 = vpop.permute.xlu1 %1009  ;;  %v2492_v56 = vpack.c.bf16 %v7216_v0, %v7197_v55  ;;  %v6237_v59 = vld [vmem:[%s8907_s1 + $0xe0] sm:$0xff] }
 0x178   : > { %5599 = vmatprep.mubr.msk.bf16.mxu1 %vm1120_vm1, %v2490_v4  ;;  %v1076_v6 = vmul.f32 %v1010_v17, %v7136_v46  ;;  %v2493_v17 = vpack.c.bf16 %v7208_v58, %v7185_v22 }
 0x179   : > { %3293 = vperm.xlu1 %6137, %v6232_v43  }
 0x17b   : > { %3678 = vperm.xlu0 %6171, %v7473_v39   ;;  %v1014_v32 = vpop.permute.xlu1 %1013 }
 0x17c   : > { %v1077_v24 = vmul.f32 %v1014_v32, %v7150_v3  ;;  %v7670_v32 = vpop.permute.xlu0 %3197 }
 0x17d   : > { %3301 = vperm.xlu1 %6137, %v6237_v59   ;;  %9255 = vst [vmem:[#allocation124_spill] sm:$0xff] %v7670_v32  ;;  %v1554_v32 = vrot.slane %v7319_v25, 1 }
 0x17e   : > { %v1098_v4 = vpack.c.bf16 %v1077_v24, %v1076_v6  ;;  %v9256_v6 = vld [vmem:[#allocation48_spill] sm:$0xff] }
 0x17f   : > { %5600 = vmatmul.mubr.msk.bf16.gmra.mrb[8].mxu1 %vm1120_vm1, %v2491_v48  ;;  %3694 = vperm.xlu0 %6171, %v7523_v14   ;;  %v1078_v24 = vmul.f32 %v9256_v6, %v7197_v55  ;;  %v2494_v14 = vpack.c.bf16 %v7299_v61, %v7280_v5  ;;  %v9257_v48 = vmov 2  }
 0x180   : > { %v7666_v39 = vpop.permute.xlu1 %2840  ;;  %5459 = vmatprep.mubr.msk.bf16.mxu0 %vm1120_vm1, %v1098_v4  ;;  %5603 = vmatprep.mubr.msk.bf16.mxu1 %vm1120_vm1, %v2492_v56 }
 0x181   : > { %9254 = vst [vmem:[#allocation123_spill] sm:$0xff] %v7666_v39  ;;  %3309 = vperm.xlu1 %6137, %v6235_v37  }
 0x183   : > { %3710 = vperm.xlu0 %6171, %v7564_v20   ;;  %v7683_v20 = vpop.permute.xlu0 %3209 }
 0x184   : > { %9258 = vst [vmem:[#allocation48_spill] sm:$0xff] %v7683_v20 }
 0x185   : > { %6139 = vset.pattern.permute.xlu1 %v9257_v48  ;;  %v1022_v59 = vpop.permute.xlu1 %1021 }
 0x186   : > { %v1079_v4 = vmul.f32 %v1022_v59, %v7216_v0  ;;  %1617 = vperm.xlu1 %6139, %v7295_v30   ;;  %v2495_v59 = vpack.c.bf16 %v7290_v38, %v7268_v35 }
 0x187   : > { %5604 = vmatmul.mubr.msk.bf16.gmra.mrb[12].mxu1 %vm1120_vm1, %v2493_v17  ;;  %3726 = vperm.xlu0 %6171, %v6232_v43   ;;  %v2496_v43 = vpack.c.bf16 %v7390_v54, %v7369_v60  ;;  %v1552_v17 = vrot.slane %v7287_v33, 1 }
 0x188   : > { %v1099_v56 = vpack.c.bf16 %v1079_v4, %v1078_v24  ;;  %5607 = vmatprep.mubr.msk.bf16.mxu1 %vm1120_vm1, %v2494_v14  ;;  %v1553_v24 = vrot.slane %v7313_v26, 1  ;;  %v7697_v14 = vpop.permute.xlu0 %3217  ;;  %v9261_v4 = vrot.slane %v7315_v57, 1  ;;  %v1557_v57 = vrot.slane %v7479_v19, 1 }
 0x189   : > { %9260 = vst [vmem:[#allocation126_spill] sm:$0xff] %v7697_v14  ;;  %v9264_v14 = vld [vmem:[#allocation65_spill] sm:$0xff] }
 0x18a   : > { %6140 = vset.pattern.permute.xlu1 %v9252_v62  ;;  %v7687_v6 = vpop.permute.xlu1 %2844  ;;  %5460 = vmatmul.mubr.msk.bf16.gmra.mrb[52].mxu0 %vm1120_vm1, %v1099_v56  ;;  %v7703_v56 = vsel %vm1583_vm2, %v9261_v4, %v1552_v17  ;;  %v7711_v20 = vsel %vm1583_vm2, %v1552_v17, %v1553_v24  ;;  %v9265_v17 = vld [vmem:[#allocation50_spill] sm:$0xff] }
 0x18b   : > { %9259 = vst [vmem:[#allocation125_spill] sm:$0xff] %v7687_v6  ;;  %3622 = vperm.xlu1 %6140, %v7295_v30   ;;  %3742 = vperm.xlu0 %6171, %v6235_v37   ;;  %9262 = vst [vmem:[#allocation127_spill] sm:$0xff] %v7703_v56  ;;  %v9004_v37 = vmov 8   ;;  %v2883_v4 = vmul.f32 %v9264_v14, %v7703_v56  ;;  %v2884_v49 = vmul.f32 %v9265_v17, %v7711_v20  ;;  %v1555_v6 = vrot.slane %v7416_v1, 1 }
 0x18c   : > { %9263 = vst [vmem:[#allocation128_spill] sm:$0xff] %v7711_v20  ;;  %v7728_v39 = vpop.permute.xlu0 %3225 }
 0x18d   : > { %v7739_v17 = vsel %vm1583_vm2, %v1554_v32, %v1555_v6 }
 0x18e   : > { %9267 = vst [vmem:[#allocation65_spill] sm:$0xff] %v7739_v17 }
 0x18f   : > { %5608 = vmatmul.mubr.msk.bf16.gmra.mrb[16].mxu1 %vm1120_vm1, %v2495_v59  ;;  %3626 = vperm.xlu1 %6140, %v7180_v10   ;;  %v1026_v30 = vpop.permute.xlu1 %1025  ;;  %v7719_v59 = vld [vmem:[%s8910_s4 + $0x20] sm:$0xff]  }
 0x190   : > { %6177 = vset.pattern.permute.xlu0 %v9004_v37  ;;  %5611 = vmatprep.mubr.msk.bf16.mxu1 %vm1120_vm1, %v2496_v43  ;;  %v2497_v43 = vpack.c.bf16 %v7375_v29, %v7357_v8  ;;  %v1080_v14 = vmul.f32 %v1026_v30, %v7185_v22  ;;  %v9266_v8 = vmov 3   ;;  %v2915_v29 = vpack.c.bf16 %v2884_v49, %v2883_v4 }
 0x191   : > { %4063 = vperm.xlu0 %6177, %v7221_v45   ;;  %5507 = vmatprep.subr.bf16.mxu0 %v7719_v59  ;;  %v7744_v30 = vsel %vm1583_vm2, %v1556_v53, %v1557_v57 }
 0x192   : > { %9268 = vst [vmem:[#allocation50_spill] sm:$0xff] %v7744_v30 }
 0x193   : > { %6141 = vset.pattern.permute.xlu1 %v9257_v48  ;;  %v1030_v37 = vpop.permute.xlu1 %1029 }
 0x194   : > { %v1081_v56 = vmul.f32 %v1030_v37, %v7208_v58  ;;  %1629 = vperm.xlu1 %6141, %v7380_v40   ;;  %v7749_v37 = vsel %vm1583_vm2, %v1553_v24, %v1554_v32  ;;  %v9272_v32 = vld [vmem:[#allocation75_spill] sm:$0xff] }
 0x195   : > { %6178 = vset.pattern.permute.xlu0 %v9266_v8  ;;  %9269 = vst [vmem:[#allocation129_spill] sm:$0xff] %v7749_v37  ;;  %v2888_v24 = vmul.f32 %v9272_v32, %v7744_v30  ;;  %v1560_v32 = vrot.slane %v7036_v31, 1 }
 0x196   : > { %v1100_v20 = vpack.c.bf16 %v1081_v56, %v1080_v14  ;;  %2054 = vperm.xlu0 %6178, %v7180_v10   ;;  %v7757_v56 = vsel %vm1583_vm2, %v1555_v6, %v1556_v53  ;;  %v9271_v10 = vld [vmem:[#allocation72_spill] sm:$0xff]  ;;  %v9273_v14 = vld [vmem:[#allocation55_spill] sm:$0xff]  ;;  %v9274_v6 = vld [vmem:[#allocation62_spill] sm:$0xff] }
 0x197   : > { %5612 = vmatmul.mubr.msk.bf16.gmra.mrb[20].mxu1 %vm1120_vm1, %v2497_v43  ;;  %9270 = vst [vmem:[#allocation130_spill] sm:$0xff] %v7757_v56  ;;  %v2886_v4 = vmul.f32 %v9271_v10, %v7739_v17  ;;  %v7766_v43 = vpop.permute.xlu0 %3233  ;;  %v2885_v53 = vmul.f32 %v9273_v14, %v7749_v37  ;;  %v2887_v8 = vmul.f32 %v9274_v6, %v7757_v56  ;;  %v1558_v10 = vrot.slane %v9227_v16, 1  ;;  %v9277_v56 = vld [vmem:[#allocation86_spill] sm:$0xff]  ;;  %v9367_v37 = vld [vmem:[#allocation21_spill] sm:$0xff] }
 0x198   : > { %5619 = vmatprep.mubr.msk.bf16.mxu1 %vm1120_vm1, %v2915_v29  ;;  %6143 = vset.pattern.permute.xlu1 %v9252_v62  ;;  %v7753_v49 = vpop.permute.xlu1 %2856  ;;  %v1559_v29 = vrot.slane %v9232_v36, 1  ;;  %v1561_v36 = vrot.slane %v9235_v34, 1 }
 0x199   : > { %3634 = vperm.xlu1 %6143, %v7380_v40   ;;  %5463 = vmatprep.mubr.msk.bf16.mxu0 %vm1120_vm1, %v1100_v20  ;;  %v9275_v40 = vld [vmem:[#allocation52_spill] sm:$0xff]  ;;  %v2916_v17 = vpack.c.bf16 %v2886_v4, %v2885_v53  ;;  %v2917_v14 = vpack.c.bf16 %v2888_v24, %v2887_v8 }
 0x19a   : > { %2058 = vperm.xlu0 %6178, %v7221_v45   ;;  %v1082_v20 = vmul.f32 %v9275_v40, %v7280_v5  ;;  %v6204_v45 = vld [vmem:[%s8910_s4 + $0x68] sm:$0xff]   ;;  %v7784_v6 = vsel %vm1583_vm2, %v1558_v10, %v1559_v29  ;;  %v7791_v53 = vsel %vm1583_vm2, %v1559_v29, %v1560_v32  ;;  %v7796_v40 = vsel %vm1583_vm2, %v1557_v57, %v1558_v10  ;;  %v9281_v29 = vld [vmem:[#allocation83_spill] sm:$0xff] }
 0x19b   : > { %9276 = vst [vmem:[#allocation72_spill] sm:$0xff] %v7784_v6  ;;  %9278 = vst [vmem:[#allocation75_spill] sm:$0xff] %v7791_v53  ;;  %v7798_v8 = vpop.permute.xlu0 %3241  ;;  %v2890_v34 = vmul.f32 %v9281_v29, %v7784_v6  ;;  %v7811_v57 = vld [vmem:[%s8910_s4 + $0x70] sm:$0xff]   ;;  %v1564_v29 = vrot.slane %v7089_v51, 1  ;;  %v1565_v6 = vrot.slane %v9241_v23, 1 }
 0x19c   : > { %9279 = vst [vmem:[#allocation55_spill] sm:$0xff] %v7796_v40 }
 0x19d   : > { %6144 = vset.pattern.permute.xlu1 %v9257_v48  ;;  %v1038_v30 = vpop.permute.xlu1 %1037 }
 0x19e   : > { %2070 = vperm.xlu0 %6178, %v9277_v56   ;;  %v1083_v4 = vmul.f32 %v1038_v30, %v7299_v61  ;;  %1633 = vperm.xlu1 %6144, %v7421_v15   ;;  %v7804_v30 = vsel %vm1583_vm2, %v1560_v32, %v1561_v36 }
 0x19f   : > { %5620 = vmatmul.mubr.msk.bf16.vlgmr.msra.gmra.mrb[24].mxu1 %vm1120_vm1, %v2916_v17  ;;  %9280 = vst [vmem:[#allocation62_spill] sm:$0xff] %v7804_v30  ;;  %v9282_v17 = vld [vmem:[#allocation87_spill] sm:$0xff]  ;;  %v7838_v23 = vpop.permute.xlu0 %3249 }
 0x1a0   : > { %5623 = vmatprep.mubr.msk.bf16.mxu1 %vm1120_vm1, %v2917_v14  ;;  %v1101_v24 = vpack.c.bf16 %v1083_v4, %v1082_v20  ;;  %5652 = vmatpush3.bf16.msra.mxu1 %v7573_v7  ;;  %v2891_v10 = vmul.f32 %v9282_v17, %v7791_v53  ;;  %v1562_v20 = vrot.slane %v9234_v47, 1  ;;  %v1563_v7 = vrot.slane %v7075_v21, 1  ;;  %v9283_v14 = vld [vmem:[#allocation68_spill] sm:$0xff] }
 0x1a1   : > { %5653 = vmatprep.subr.bf16.mxu1 %v6204_v45  ;;  %v2889_v4 = vmul.f32 %v9283_v14, %v7796_v40  ;;  %v9284_v17 = vld [vmem:[#allocation80_spill] sm:$0xff] }
 0x1a2   : > { %2074 = vperm.xlu0 %6178, %v7304_v11   ;;  %6145 = vset.pattern.permute.xlu1 %v9252_v62  ;;  %v7819_v32 = vpop.permute.xlu1 %2860  ;;  %v2892_v21 = vmul.f32 %v9284_v17, %v7804_v30  ;;  %v7832_v31 = vsel %vm1583_vm2, %v1561_v36, %v1562_v20  ;;  %v7836_v14 = vsel %vm1583_vm2, %v1562_v20, %v1563_v7  ;;  %v9290_v36 = vld [vmem:[#allocation96_spill] sm:$0xff]  ;;  %v9293_v17 = vld [vmem:[#allocation101_spill] sm:$0xff]  ;;  %v9314_v30 = vld [vmem:[#allocation107_spill] sm:$0xff] }
 0x1a3   : > { %3638 = vperm.xlu1 %6145, %v7421_v15   ;;  %5464 = vmatmul.mubr.msk.bf16.gmra.mrb[56].mxu0 %vm1120_vm1, %v1101_v24  ;;  %v2918_v53 = vpack.c.bf16 %v2890_v34, %v2889_v4  ;;  %9285 = vst [vmem:[#allocation52_spill] sm:$0xff] %v7832_v31  ;;  %9286 = vst [vmem:[#allocation86_spill] sm:$0xff] %v7836_v14  ;;  %v9287_v15 = vmov 8   ;;  %v7843_v24 = vsel %vm1583_vm2, %v1563_v7, %v1564_v29  ;;  %v9292_v7 = vld [vmem:[#allocation102_spill] sm:$0xff] }
 0x1a4   : > { %5654 = vmatpush3.bf16.msra.mxu1 %v6204_v45  ;;  %v2919_v47 = vpack.c.bf16 %v2892_v21, %v2891_v10  ;;  %9288 = vst [vmem:[#allocation83_spill] sm:$0xff] %v7843_v24  ;;  %v7847_v34 = vsel %vm1583_vm2, %v1564_v29, %v1565_v6  ;;  %v2893_v45 = vmul.f32 %v9290_v36, %v7832_v31  ;;  %v9291_v10 = vld [vmem:[#allocation97_spill] sm:$0xff]  ;;  %v1566_v29 = vrot.slane %v7081_v42, 1  ;;  %v7866_v31 = vpop.permute.xlu0 %3257 }
 0x1a5   : > { %5687 = vmatprep.subr.bf16.mxu1 %v7811_v57  ;;  %9289 = vst [vmem:[#allocation87_spill] sm:$0xff] %v7847_v34  ;;  %v2894_v20 = vmul.f32 %v9291_v10, %v7836_v14  ;;  %v2895_v4 = vmul.f32 %v9292_v7, %v7843_v24  ;;  %v1575_v14 = vrot.slane %v7280_v5, 1 }
 0x1a6   : > { %6183 = vset.pattern.permute.xlu0 %v9287_v15  ;;  %v9313_v15 = vld [vmem:[#allocation123_spill] sm:$0xff] }
 0x1a7   : > { %5624 = vmatmul.mubr.msk.bf16.gmra.mrb[28].mxu1 %vm1120_vm1, %v2918_v53  ;;  %4079 = vperm.xlu0 %6183, %v7304_v11   ;;  %v1042_v21 = vpop.permute.xlu1 %1041  ;;  %v1567_v53 = vrot.slane %v7146_v50, 1  ;;  %v2896_v11 = vmul.f32 %v7457_v9, %v7847_v34  ;;  %v2920_v24 = vpack.c.bf16 %v2894_v20, %v2893_v45  ;;  %v7874_v9 = vld [vmem:[%s8907_s1 + $0x38] sm:$0xff] }
 0x1a8   : > { %5627 = vmatprep.mubr.msk.bf16.mxu1 %vm1120_vm1, %v2919_v47  ;;  %3642 = vperm.xlu1 %6145, %v9277_v56   ;;  %v1568_v47 = vrot.slane %v7157_v63, 1  ;;  %v1569_v56 = vrot.slane %v7136_v46, 1  ;;  %v1084_v10 = vmul.f32 %v1042_v21, %v7268_v35  ;;  %9294 = vst [vmem:[#allocation68_spill] sm:$0xff] %v7874_v9  ;;  %v7883_v21 = vsel %vm1583_vm2, %v1565_v6, %v1566_v29  ;;  %v9312_v34 = vld [vmem:[#allocation112_spill] sm:$0xff] }
 0x1a9   : > { %v7879_v46 = vsel %vm1583_vm2, %v1566_v29, %v1567_v53  ;;  %v2921_v63 = vpack.c.bf16 %v2896_v11, %v2895_v4  ;;  %9296 = vst [vmem:[#allocation96_spill] sm:$0xff] %v7883_v21  ;;  %v1570_v29 = vrot.slane %v7150_v3, 1 }
 0x1aa   : > { %9295 = vst [vmem:[#allocation80_spill] sm:$0xff] %v7879_v46  ;;  %v7887_v45 = vsel %vm1583_vm2, %v1567_v53, %v1568_v47  ;;  %v7891_v20 = vsel %vm1583_vm2, %v1568_v47, %v1569_v56  ;;  %v2898_v4 = vmul.f32 %v7410_v12, %v7879_v46  ;;  %v2897_v53 = vmul.f32 %v7526_v18, %v7883_v21  ;;  %v7917_v12 = vpop.permute.xlu0 %3265 }
 0x1ab   : > { %4091 = vperm.xlu0 %6183, %v9293_v17   ;;  %v1046_v36 = vpop.permute.xlu1 %1045  ;;  %9297 = vst [vmem:[#allocation97_spill] sm:$0xff] %v7887_v45  ;;  %9298 = vst [vmem:[#allocation102_spill] sm:$0xff] %v7891_v20  ;;  %v2899_v11 = vmul.f32 %v7468_v41, %v7887_v45  ;;  %v1573_v47 = vrot.slane %v7185_v22, 1  ;;  %v620_v18 = vrot.slane %v7319_v25, 7  ;;  %v7936_v45 = vsel %vm1583_vm2, %v1569_v56, %v1570_v29 }
 0x1ac   : > { %6146 = vset.pattern.permute.xlu1 %v9257_v48  ;;  %v1085_v7 = vmul.f32 %v1046_v36, %v7290_v38  ;;  %v7897_v36 = vld [vmem:[%s8907_s1 + $0x58] sm:$0xff]  ;;  %9302 = vst [vmem:[#allocation131_spill] sm:$0xff] %v7936_v45 }
 0x1ad   : > { %1645 = vperm.xlu1 %6146, %v7874_v9  }
 0x1ae   : > { %v1102_v50 = vpack.c.bf16 %v1085_v7, %v1084_v10  ;;  %v618_v10 = vrot.slane %v7287_v33, 7  ;;  %v619_v7 = vrot.slane %v7313_v26, 7 }
 0x1af   : > { %5628 = vmatmul.mubr.msk.bf16.gmra.mrb[0].mxu1 %vm1120_vm1, %v2920_v24  ;;  %4099 = vperm.xlu0 %6183, %v7897_v36   ;;  %v1571_v24 = vrot.slane %v7197_v55, 1 }
 0x1b0   : > { %5631 = vmatprep.mubr.msk.bf16.mxu1 %vm1120_vm1, %v2921_v63  ;;  %v7901_v6 = vpop.permute.xlu1 %2872  ;;  %5467 = vmatprep.mubr.msk.bf16.mxu0 %vm1120_vm1, %v1102_v50  ;;  %v1572_v63 = vrot.slane %v7216_v0, 1  ;;  %v2900_v50 = vmul.f32 %v7596_v13, %v7891_v20  ;;  %v2922_v0 = vpack.c.bf16 %v2898_v4, %v2897_v53  ;;  %v9300_v13 = vld [vmem:[#allocation61_spill] sm:$0xff] }
 0x1b1   : > { %6148 = vset.pattern.permute.xlu1 %v9252_v62  ;;  %v7926_v41 = vsel %vm1583_vm2, %v1570_v29, %v1571_v24  ;;  %v1086_v22 = vmul.f32 %v9300_v13, %v7369_v60  ;;  %v7950_v29 = vpop.permute.xlu0 %3273  ;;  %v9307_v13 = vld [vmem:[#allocation98_spill] sm:$0xff] }
 0x1b2   : > { %3650 = vperm.xlu1 %6148, %v7874_v9   ;;  %9299 = vst [vmem:[#allocation101_spill] sm:$0xff] %v7926_v41  ;;  %v7932_v55 = vsel %vm1583_vm2, %v1571_v24, %v1572_v63  ;;  %v2923_v20 = vpack.c.bf16 %v2900_v50, %v2899_v11  ;;  %v7940_v33 = vsel %vm1583_vm2, %v1572_v63, %v1573_v47  ;;  %v9304_v24 = vld [vmem:[#allocation6_spill] sm:$0xff]  ;;  %v9306_v50 = vld [vmem:[#allocation8_spill] sm:$0xff]  ;;  %v617_v63 = vrot.slane %v9307_v13, 7  ;;  %v9311_v9 = vld [vmem:[#allocation119_spill] sm:$0xff] }
 0x1b3   : > { %4107 = vperm.xlu0 %6183, %v7435_v44   ;;  %9301 = vst [vmem:[#allocation61_spill] sm:$0xff] %v7932_v55  ;;  %9303 = vst [vmem:[#allocation132_spill] sm:$0xff] %v7940_v33  ;;  %v876_v53 = vmul.f32 %v9304_v24, %v7446_v2  ;;  %v9305_v11 = vld [vmem:[#allocation110_spill] sm:$0xff]  ;;  %v7966_v24 = vsel %vm651_vm0, %v619_v7, %v620_v18  ;;  %v2901_v21 = vmul.f32 %v9311_v9, %v7936_v45 }
 0x1b4   : > { %v877_v56 = vmul.f32 %v9306_v50, %v9305_v11  ;;  %9309 = vst [vmem:[#allocation110_spill] sm:$0xff] %v7966_v24  ;;  %v9310_v50 = vld [vmem:[#allocation43_spill] sm:$0xff]  ;;  %v2903_v42 = vmul.f32 %v9312_v34, %v7932_v55  ;;  %v2904_v51 = vmul.f32 %v9313_v15, %v7940_v33  ;;  %v621_v9 = vrot.slane %v7416_v1, 7 }
 0x1b5   : > { %v1054_v3 = vpop.permute.xlu1 %1053  ;;  %v2902_v13 = vmul.f32 %v9310_v50, %v7926_v41  ;;  %v1576_v50 = vrot.slane %v7299_v61, 1  ;;  %v623_v15 = vrot.slane %v7479_v19, 7  ;;  %v9317_v61 = vld [vmem:[#allocation5_spill] sm:$0xff] }
 0x1b6   : > { %6149 = vset.pattern.permute.xlu1 %v9257_v48  ;;  %v1087_v4 = vmul.f32 %v1054_v3, %v7390_v54  ;;  %v7962_v3 = vsel %vm651_vm0, %v618_v10, %v619_v7  ;;  %v9315_v7 = vrot.slane %v9314_v30, 7  ;;  %v908_v34 = vpack.c.bf16 %v877_v56, %v876_v53  ;;  %v9319_v56 = vld [vmem:[#allocation9_spill] sm:$0xff] }
 0x1b7   : > { %5632 = vmatmul.mubr.msk.bf16.gmra.mrb[4].mxu1 %vm1120_vm1, %v2922_v0  ;;  %1649 = vperm.xlu1 %6149, %v7500_v27   ;;  %v7957_v0 = vld [vmem:[%s8907_s1 + $0x78] sm:$0xff]  ;;  %9308 = vst [vmem:[#allocation6_spill] sm:$0xff] %v7962_v3  ;;  %v881_v33 = vmul.f32 %v9319_v56, %v7966_v24 }
 0x1b8   : > { %5635 = vmatprep.mubr.msk.bf16.mxu1 %vm1120_vm1, %v2923_v20  ;;  %4115 = vperm.xlu0 %6183, %v7957_v0   ;;  %v1574_v20 = vrot.slane %v7208_v58, 1  ;;  %v1103_v46 = vpack.c.bf16 %v1087_v4, %v1086_v22  ;;  %v7982_v40 = vsel %vm651_vm0, %v9315_v7, %v617_v63  ;;  %v1577_v58 = vrot.slane %v7268_v35, 1  ;;  %v9316_v7 = vld [vmem:[#allocation40_spill] sm:$0xff] }
 0x1b9   : > { %v7994_v4 = vsel %vm651_vm0, %v617_v63, %v618_v10  ;;  %v2924_v35 = vpack.c.bf16 %v2902_v13, %v2901_v21  ;;  %v878_v5 = vmul.f32 %v9317_v61, %v7982_v40  ;;  %v2925_v63 = vpack.c.bf16 %v2904_v51, %v2903_v42  ;;  %v8013_v21 = vpop.permute.xlu0 %3281 }
 0x1ba   : > { %v7987_v22 = vpop.permute.xlu1 %2876  ;;  %5468 = vmatmul.mubr.msk.bf16.gmra.mrb[60].mxu0 %vm1120_vm1, %v1103_v46  ;;  %v9318_v46 = vld [vmem:[#allocation10_spill] sm:$0xff]  ;;  %v8007_v10 = vsel %vm1583_vm2, %v1574_v20, %v1575_v14  ;;  %v622_v61 = vrot.slane %v7430_v28, 7  ;;  %v8018_v13 = vsel %vm1583_vm2, %v1575_v14, %v1576_v50  ;;  %v1578_v42 = vrot.slane %v7290_v38, 1  ;;  %v9329_v38 = vld [vmem:[#allocation125_spill] sm:$0xff] }
 0x1bb   : > { %6150 = vset.pattern.permute.xlu1 %v9252_v62  ;;  %5475 = vmatprep.mubr.msk.bf16.mxu0 %vm1120_vm1, %v908_v34  ;;  %v880_v53 = vmul.f32 %v9318_v46, %v7962_v3  ;;  %9320 = vst [vmem:[#allocation8_spill] sm:$0xff] %v8007_v10  ;;  %9322 = vst [vmem:[#allocation119_spill] sm:$0xff] %v8018_v13  ;;  %v8022_v34 = vsel %vm1583_vm2, %v1576_v50, %v1577_v58  ;;  %v9324_v46 = vld [vmem:[#allocation7_spill] sm:$0xff] }
 0x1bc   : > { %4123 = vperm.xlu0 %6183, %v9316_v7   ;;  %3654 = vperm.xlu1 %6150, %v7500_v27   ;;  %v8011_v27 = vsel %vm1583_vm2, %v1573_v47, %v1574_v20  ;;  %9323 = vst [vmem:[#allocation112_spill] sm:$0xff] %v8022_v34  ;;  %v879_v56 = vmul.f32 %v9324_v46, %v7994_v4  ;;  %v9326_v47 = vrot.slane %v9227_v16, 7  ;;  %v8042_v20 = vld [vmem:[%s8907_s1 + $0x98] sm:$0xff]  ;;  %v1579_v46 = vrot.slane %v7369_v60, 1  ;;  %v9336_v60 = vld [vmem:[#allocation113_spill] sm:$0xff] }
 0x1bd   : > { %9321 = vst [vmem:[#allocation43_spill] sm:$0xff] %v8011_v27  ;;  %v8030_v51 = vsel %vm651_vm0, %v620_v18, %v621_v9  ;;  %v9328_v18 = vld [vmem:[#allocation41_spill] sm:$0xff]  ;;  %v2908_v41 = vmul.f32 %v7753_v49, %v8022_v34  ;;  %v910_v16 = vpack.c.bf16 %v881_v33, %v880_v53  ;;  %v8059_v19 = vsel %vm651_vm0, %v621_v9, %v622_v61  ;;  %v9334_v33 = vld [vmem:[#allocation12_spill] sm:$0xff] }
 0x1be   : > { %9325 = vst [vmem:[#allocation123_spill] sm:$0xff] %v8030_v51  ;;  %v8036_v14 = vsel %vm651_vm0, %v623_v15, %v9326_v47  ;;  %v2906_v50 = vmul.f32 %v9328_v18, %v8007_v10  ;;  %v2905_v47 = vmul.f32 %v9329_v38, %v8011_v27  ;;  %v909_v55 = vpack.c.bf16 %v879_v56, %v878_v5  ;;  %v6206_v18 = vld [vmem:[%s8910_s4 + $0x28] sm:$0xff]   ;;  %v9332_v5 = vld [vmem:[#allocation105_spill] sm:$0xff] }
 0x1bf   : > { %5636 = vmatmul.mubr.msk.bf16.gmra.mrb[8].mxu1 %vm1120_vm1, %v2924_v35  ;;  %9327 = vst [vmem:[#allocation40_spill] sm:$0xff] %v8036_v14  ;;  %9331 = vst [vmem:[#allocation5_spill] sm:$0xff] %v8059_v19  ;;  %v1580_v38 = vrot.slane %v7390_v54, 1  ;;  %v1581_v56 = vrot.slane %v9332_v5, 1  ;;  %v882_v49 = vmul.f32 %v9334_v33, %v8030_v51  ;;  %v9335_v9 = vld [vmem:[#allocation13_spill] sm:$0xff] }
 0x1c0   : > { %5639 = vmatprep.mubr.msk.bf16.mxu1 %vm1120_vm1, %v2925_v63  ;;  %4131 = vperm.xlu0 %6183, %v8042_v20   ;;  %v8045_v35 = vpop.permute.xlu1 %3189  ;;  %v9330_v63 = vld [vmem:[#allocation116_spill] sm:$0xff]  ;;  %v885_v53 = vmul.f32 %v9335_v9, %v8036_v14  ;;  %v2926_v5 = vpack.c.bf16 %v2906_v50, %v2905_v47  ;;  %v8089_v9 = vsel %vm1583_vm2, %v1577_v58, %v1578_v42  ;;  %v9354_v27 = vld [vmem:[#allocation17_spill] sm:$0xff] }
 0x1c1   : > { %3658 = vperm.xlu1 %6150, %v9293_v17   ;;  %v2907_v45 = vmul.f32 %v9330_v63, %v8018_v13  ;;  %v8069_v17 = vsel %vm651_vm0, %v622_v61, %v623_v15  ;;  %v8075_v63 = vpop.permute.xlu0 %3289  ;;  %v9338_v15 = vld [vmem:[#allocation11_spill] sm:$0xff]  ;;  %9339 = vst [vmem:[#allocation7_spill] sm:$0xff] %v8089_v9  ;;  %v8096_v50 = vsel %vm1583_vm2, %v1579_v46, %v1580_v38  ;;  %v8107_v58 = vld [vmem:[%s8907_s1 + $0xb8] sm:$0xff]  ;;  %v9353_v13 = vld [vmem:[#allocation53_spill] sm:$0xff] }
 0x1c2   : > { %5476 = vmatmul.mubr.msk.bf16.vlgmr.msra.gmra.mrb[32].mxu0 %vm1120_vm1, %v909_v55  ;;  %9333 = vst [vmem:[#allocation10_spill] sm:$0xff] %v8069_v17  ;;  %v8081_v55 = vsel %vm1583_vm2, %v1578_v42, %v1579_v46  ;;  %v883_v61 = vmul.f32 %v9338_v15, %v8059_v19  ;;  %9341 = vst [vmem:[#allocation41_spill] sm:$0xff] %v8096_v50  ;;  %v8100_v47 = vsel %vm1583_vm2, %v1580_v38, %v1581_v56  ;;  %v9344_v38 = vld [vmem:[#allocation121_spill] sm:$0xff] }
 0x1c3   : > { %5479 = vmatprep.mubr.msk.bf16.mxu0 %vm1120_vm1, %v910_v16  ;;  %9337 = vst [vmem:[#allocation9_spill] sm:$0xff] %v8081_v55  ;;  %5508 = vmatpush3.bf16.msra.mxu0 %v7719_v59  ;;  %v2927_v33 = vpack.c.bf16 %v2908_v41, %v2907_v45  ;;  %v9340_v16 = vld [vmem:[#allocation14_spill] sm:$0xff]  ;;  %9342 = vst [vmem:[#allocation125_spill] sm:$0xff] %v8100_v47  ;;  %v2909_v42 = vmul.f32 %v7819_v32, %v8089_v9  ;;  %v9345_v32 = vld [vmem:[#allocation115_spill] sm:$0xff]  ;;  %v9350_v9 = vrot.slane %v9314_v30, 1 }
 0x1c4   : > { %4139 = vperm.xlu0 %6183, %v9336_v60   ;;  %v3194_v34 = vpop.permute.xlu1 %3193  ;;  %v884_v54 = vmul.f32 %v9340_v16, %v8069_v17  ;;  %5509 = vmatprep.subr.bf16.mxu0 %v6206_v18  ;;  %v9343_v45 = vld [vmem:[#allocation118_spill] sm:$0xff]  ;;  %v911_v46 = vpack.c.bf16 %v883_v61, %v882_v49  ;;  %v9347_v49 = vld [vmem:[#allocation16_spill] sm:$0xff]  ;;  %v9359_v30 = vld [vmem:[#allocation117_spill] sm:$0xff] }
 0x1c5   : > { %6151 = vset.pattern.permute.xlu1 %v9257_v48  ;;  %v2910_v41 = vmul.f32 %v9343_v45, %v8081_v55  ;;  %v8116_v15 = vpop.permute.xlu0 %3297  ;;  %v8124_v45 = vld [vmem:[%s8910_s4 + $0x30] sm:$0xff]   ;;  %v9352_v55 = vld [vmem:[#allocation18_spill] sm:$0xff] }
 0x1c6   : > { %1661 = vperm.xlu1 %6151, %v7897_v36   ;;  %v912_v16 = vpack.c.bf16 %v885_v53, %v884_v54  ;;  %v9348_v54 = vld [vmem:[#allocation56_spill] sm:$0xff]  ;;  %v9349_v53 = vld [vmem:[#allocation15_spill] sm:$0xff] }
 0x1c7   : > { %5640 = vmatmul.mubr.msk.bf16.gmra.mrb[12].mxu1 %vm1120_vm1, %v2926_v5  ;;  %5510 = vmatpush3.bf16.msra.mxu0 %v6206_v18  ;;  %v2911_v5 = vmul.f32 %v9344_v38, %v8096_v50  ;;  %v887_v38 = vmul.f32 %v9349_v53, %v9348_v54 }
 0x1c8   : > { %5643 = vmatprep.mubr.msk.bf16.mxu1 %vm1120_vm1, %v2927_v33  ;;  %4147 = vperm.xlu0 %6183, %v8107_v58   ;;  %v3202_v59 = vpop.permute.xlu1 %3201  ;;  %v2912_v33 = vmul.f32 %v7901_v6, %v8100_v47  ;;  %v9346_v6 = vld [vmem:[#allocation51_spill] sm:$0xff]  ;;  %v2928_v47 = vpack.c.bf16 %v2910_v41, %v2909_v42 }
 0x1c9   : > { %5543 = vmatprep.subr.bf16.mxu0 %v8124_v45  ;;  %v886_v61 = vmul.f32 %v9347_v49, %v9346_v6  ;;  %v8147_v49 = vpop.permute.xlu0 %3305  ;;  %v9355_v41 = vld [vmem:[#allocation39_spill] sm:$0xff] }
 0x1ca   : > { %6152 = vset.pattern.permute.xlu1 %v9252_v62  ;;  %5480 = vmatmul.mubr.msk.bf16.gmra.mrb[36].mxu0 %vm1120_vm1, %v911_v46  ;;  %v2929_v50 = vpack.c.bf16 %v2912_v33, %v2911_v5  ;;  %v9351_v46 = vld [vmem:[#allocation57_spill] sm:$0xff]  ;;  %v9358_v5 = vld [vmem:[#allocation122_spill] sm:$0xff]  ;;  %v3316_v33 = vmul.f32 %v8045_v35, %v7962_v3  ;;  %v9364_v35 = vld [vmem:[#allocation67_spill] sm:$0xff] }
 0x1cb   : > { %3666 = vperm.xlu1 %6152, %v7897_v36   ;;  %5483 = vmatprep.mubr.msk.bf16.mxu0 %vm1120_vm1, %v912_v16  ;;  %v8139_v36 = vsel %vm1583_vm2, %v1581_v56, %v9350_v9  ;;  %v889_v16 = vmul.f32 %v9354_v27, %v9353_v13  ;;  %v8156_v56 = vld [vmem:[%s8907_s1 + $0xd8] sm:$0xff]  ;;  %v913_v27 = vpack.c.bf16 %v887_v38, %v886_v61  ;;  %v9365_v3 = vld [vmem:[#allocation22_spill] sm:$0xff] }
 0x1cc   : > { %4155 = vperm.xlu0 %6183, %v9345_v32   ;;  %v3206_v18 = vpop.permute.xlu1 %3205  ;;  %v888_v32 = vmul.f32 %v9352_v55, %v9351_v46  ;;  %v2913_v52 = vmul.f32 %v7987_v22, %v8139_v36  ;;  %9356 = vst [vmem:[#allocation116_spill] sm:$0xff] %v8156_v56  ;;  %v3317_v55 = vmul.f32 %v3194_v34, %v7966_v24  ;;  %v9360_v34 = vld [vmem:[#allocation63_spill] sm:$0xff]  ;;  %v9361_v61 = vld [vmem:[#allocation20_spill] sm:$0xff] }
 0x1cd   : > { %v890_v38 = vmul.f32 %v9361_v61, %v9360_v34  ;;  %v892_v10 = vmul.f32 %v9365_v3, %v9364_v35 }
 0x1ce   : > { %v914_v9 = vpack.c.bf16 %v889_v16, %v888_v32  ;;  %v9362_v32 = vld [vmem:[#allocation66_spill] sm:$0xff]  ;;  %v9363_v16 = vld [vmem:[#allocation19_spill] sm:$0xff]  ;;  %v3348_v24 = vpack.c.bf16 %v3317_v55, %v3316_v33  ;;  %v3320_v55 = vmul.f32 %v3206_v18, %v8069_v17 }
 0x1cf   : > { %5644 = vmatmul.mubr.msk.bf16.gmra.mrb[16].mxu1 %vm1120_vm1, %v2928_v47  ;;  %6153 = vset.pattern.permute.xlu1 %v9257_v48  ;;  %v9357_v47 = vld [vmem:[#allocation38_spill] sm:$0xff] }
 0x1d0   : > { %5647 = vmatprep.mubr.msk.bf16.mxu1 %vm1120_vm1, %v2929_v50  ;;  %1665 = vperm.xlu1 %6153, %v9355_v41   ;;  %v3214_v42 = vpop.permute.xlu1 %3213  ;;  %v2914_v50 = vmul.f32 %v9358_v5, %v9357_v47  ;;  %v891_v5 = vmul.f32 %v9363_v16, %v9362_v32 }
 0x1d1   : > { %4163 = vperm.xlu0 %6183, %v8156_v56   ;;  %v9366_v56 = vld [vmem:[#allocation64_spill] sm:$0xff] }
 0x1d2   : > { %5484 = vmatmul.mubr.msk.bf16.gmra.mrb[40].mxu0 %vm1120_vm1, %v913_v27  ;;  %v2930_v53 = vpack.c.bf16 %v2914_v50, %v2913_v52  ;;  %v8173_v27 = vpop.permute.xlu0 %3313  ;;  %v8185_v52 = vld [vmem:[%s8907_s1 + $0xf8] sm:$0xff]  ;;  %v915_v3 = vpack.c.bf16 %v891_v5, %v890_v38  ;;  %v9374_v5 = vld [vmem:[#allocation23_spill] sm:$0xff] }
 0x1d3   : > { %5487 = vmatprep.mubr.msk.bf16.mxu0 %vm1120_vm1, %v914_v9  ;;  %v893_v9 = vmul.f32 %v9367_v37, %v9366_v56  ;;  %9368 = vst [vmem:[#allocation12_spill] sm:$0xff] %v8185_v52  ;;  %v9369_v50 = vld [vmem:[#allocation124_spill] sm:$0xff] }
 0x1d4   : > { %6154 = vset.pattern.permute.xlu1 %v9252_v62  ;;  %v3222_v22 = vpop.permute.xlu1 %3221  ;;  %v3318_v33 = vmul.f32 %v9369_v50, %v8030_v51  ;;  %v9372_v38 = vld [vmem:[#allocation24_spill] sm:$0xff] }
 0x1d5   : > { %4171 = vperm.xlu0 %6183, %v9359_v30   ;;  %3670 = vperm.xlu1 %6154, %v9355_v41   ;;  %v3319_v41 = vmul.f32 %v3202_v59, %v8059_v19  ;;  %v916_v37 = vpack.c.bf16 %v893_v9, %v892_v10  ;;  %v9373_v10 = vld [vmem:[#allocation77_spill] sm:$0xff] }
 0x1d6   : > { %v895_v9 = vmul.f32 %v9374_v5, %v9373_v10  ;;  %v3322_v5 = vmul.f32 %v3214_v42, %v9346_v6 }
 0x1d7   : > { %5648 = vmatmul.mubr.msk.bf16.gmra.mrb[20].mxu1 %vm1120_vm1, %v2930_v53  ;;  %v8195_v53 = vpop.permute.xlu0 %3630  ;;  %v3349_v16 = vpack.c.bf16 %v3319_v41, %v3318_v33  ;;  %v9378_v41 = vld [vmem:[#allocation25_spill] sm:$0xff] }
 0x1d8   : > { %5655 = vmatprep.mubr.msk.bf16.mxu1 %vm1120_vm1, %v3348_v24  ;;  %v3230_v30 = vpop.permute.xlu1 %3229  ;;  %v9370_v24 = vld [vmem:[#allocation48_spill] sm:$0xff] }
 0x1d9   : > { %4179 = vperm.xlu0 %6183, %v8185_v52   ;;  %3674 = vperm.xlu1 %6154, %v7435_v44   ;;  %v3321_v59 = vmul.f32 %v9370_v24, %v8036_v14  ;;  %v9371_v44 = vld [vmem:[#allocation74_spill] sm:$0xff] }
 0x1da   : > { %5488 = vmatmul.mubr.msk.bf16.gmra.mrb[44].mxu0 %vm1120_vm1, %v915_v3  ;;  %v894_v18 = vmul.f32 %v9372_v38, %v9371_v44  ;;  %v6208_v3 = vld [vmem:[%s8910_s4 + $0x78] sm:$0xff]   ;;  %v9375_v24 = vld [vmem:[#allocation78_spill] sm:$0xff] }
 0x1db   : > { %5491 = vmatprep.mubr.msk.bf16.mxu0 %vm1120_vm1, %v916_v37  ;;  %v3350_v50 = vpack.c.bf16 %v3321_v59, %v3320_v55  ;;  %v9376_v14 = vld [vmem:[#allocation26_spill] sm:$0xff]  ;;  %v9377_v37 = vld [vmem:[#allocation81_spill] sm:$0xff]  ;;  %v8215_v55 = vpop.permute.xlu0 %3646  ;;  %v3324_v59 = vmul.f32 %v3222_v22, %v9351_v46  ;;  %v9381_v46 = vld [vmem:[#allocation28_spill] sm:$0xff] }
 0x1dc   : > { %v3238_v61 = vpop.permute.xlu1 %3237  ;;  %v896_v17 = vmul.f32 %v9376_v14, %v9375_v24  ;;  %v897_v33 = vmul.f32 %v9378_v41, %v9377_v37  ;;  %v917_v51 = vpack.c.bf16 %v895_v9, %v894_v18  ;;  %v9379_v41 = vld [vmem:[#allocation126_spill] sm:$0xff]  ;;  %v9382_v18 = vld [vmem:[#allocation88_spill] sm:$0xff] }
 0x1dd   : > { %6155 = vset.pattern.permute.xlu1 %v9257_v48  ;;  %v3323_v19 = vmul.f32 %v9379_v41, %v9348_v54  ;;  %v9384_v54 = vld [vmem:[#allocation89_spill] sm:$0xff]  ;;  %v9386_v41 = vld [vmem:[#allocation91_spill] sm:$0xff] }
 0x1de   : > { %1677 = vperm.xlu1 %6155, %v7957_v0   ;;  %v918_v14 = vpack.c.bf16 %v897_v33, %v896_v17  ;;  %v9383_v17 = vld [vmem:[#allocation27_spill] sm:$0xff]  ;;  %v9385_v33 = vld [vmem:[#allocation30_spill] sm:$0xff] }
 0x1df   : > { %5656 = vmatmul.mubr.msk.bf16.vlgmr.msra.gmra.mrb[24].mxu1 %vm1120_vm1, %v3349_v16  ;;  %v3351_v42 = vpack.c.bf16 %v3323_v19, %v3322_v5  ;;  %v9380_v16 = vld [vmem:[#allocation85_spill] sm:$0xff]  ;;  %v899_v9 = vmul.f32 %v9383_v17, %v9382_v18  ;;  %v9388_v19 = vld [vmem:[#allocation114_spill] sm:$0xff] }
 0x1e0   : > { %5659 = vmatprep.mubr.msk.bf16.mxu1 %vm1120_vm1, %v3350_v50  ;;  %v3246_v38 = vpop.permute.xlu1 %3245  ;;  %5688 = vmatpush3.bf16.msra.mxu1 %v7811_v57  ;;  %v3325_v57 = vmul.f32 %v7728_v39, %v9353_v13  ;;  %v898_v22 = vmul.f32 %v9381_v46, %v9380_v16  ;;  %v8236_v39 = vpop.permute.xlu0 %1621 }
 0x1e1   : > { %5689 = vmatprep.subr.bf16.mxu1 %v6208_v3 }
 0x1e2   : > { %6156 = vset.pattern.permute.xlu1 %v9252_v62  ;;  %5492 = vmatmul.mubr.msk.bf16.gmra.mrb[48].mxu0 %vm1120_vm1, %v917_v51  ;;  %v3352_v50 = vpack.c.bf16 %v3325_v57, %v3324_v59  ;;  %v9387_v51 = vld [vmem:[#allocation29_spill] sm:$0xff]  ;;  %v919_v5 = vpack.c.bf16 %v899_v9, %v898_v22  ;;  %v3328_v59 = vmul.f32 %v3238_v61, %v9364_v35  ;;  %v9392_v61 = vld [vmem:[#allocation31_spill] sm:$0xff]  ;;  %v9393_v9 = vld [vmem:[#allocation104_spill] sm:$0xff] }
 0x1e3   : > { %3682 = vperm.xlu1 %6156, %v7957_v0   ;;  %5495 = vmatprep.mubr.msk.bf16.mxu0 %vm1120_vm1, %v918_v14  ;;  %v900_v0 = vmul.f32 %v9385_v33, %v9384_v54  ;;  %v901_v52 = vmul.f32 %v9387_v51, %v9386_v41  ;;  %v3327_v57 = vmul.f32 %v7766_v43, %v9362_v32  ;;  %v9396_v33 = vld [vmem:[#allocation33_spill] sm:$0xff] }
 0x1e4   : > { %v3254_v6 = vpop.permute.xlu1 %3253  ;;  %5690 = vmatpush3.bf16.msra.mxu1 %v6208_v3  ;;  %v3326_v3 = vmul.f32 %v3230_v30, %v9360_v34  ;;  %v9389_v34 = vld [vmem:[#allocation99_spill] sm:$0xff]  ;;  %v9390_v30 = vld [vmem:[#allocation32_spill] sm:$0xff]  ;;  %v8254_v43 = vpop.permute.xlu0 %1625 }
 0x1e5   : > { %v920_v14 = vpack.c.bf16 %v901_v52, %v900_v0  ;;  %v902_v35 = vmul.f32 %v9390_v30, %v9389_v34  ;;  %v9391_v52 = vld [vmem:[#allocation103_spill] sm:$0xff] }
 0x1e6   : > { %v3353_v17 = vpack.c.bf16 %v3327_v57, %v3326_v3  ;;  %v903_v22 = vmul.f32 %v9392_v61, %v9391_v52  ;;  %v3333_v57 = vmul.f32 %v7866_v31, %v9377_v37  ;;  %v9400_v30 = vld [vmem:[#allocation35_spill] sm:$0xff] }
 0x1e7   : > { %5660 = vmatmul.mubr.msk.bf16.gmra.mrb[28].mxu1 %vm1120_vm1, %v3351_v42  ;;  %6157 = vset.pattern.permute.xlu1 %v9257_v48  ;;  %v3329_v42 = vmul.f32 %v7798_v8, %v9366_v56  ;;  %v9395_v56 = vld [vmem:[#allocation100_spill] sm:$0xff] }
 0x1e8   : > { %5663 = vmatprep.mubr.msk.bf16.mxu1 %vm1120_vm1, %v3352_v50  ;;  %1681 = vperm.xlu1 %6157, %v9388_v19   ;;  %v3262_v13 = vpop.permute.xlu1 %3261  ;;  %v9394_v50 = vld [vmem:[#allocation34_spill] sm:$0xff]  ;;  %v905_v0 = vmul.f32 %v9396_v33, %v9395_v56  ;;  %v921_v3 = vpack.c.bf16 %v903_v22, %v902_v35 }
 0x1e9   : > { %v3354_v32 = vpack.c.bf16 %v3329_v42, %v3328_v59  ;;  %v904_v8 = vmul.f32 %v9394_v50, %v9393_v9  ;;  %v3331_v59 = vmul.f32 %v7838_v23, %v9373_v10  ;;  %v8270_v42 = vpop.permute.xlu0 %1637  ;;  %v3334_v10 = vmul.f32 %v3262_v13, %v9380_v16  ;;  %v9401_v13 = vld [vmem:[#allocation44_spill] sm:$0xff] }
 0x1ea   : > { %5496 = vmatmul.mubr.msk.bf16.gmra.mrb[52].mxu0 %vm1120_vm1, %v919_v5  ;;  %v3332_v5 = vmul.f32 %v3254_v6, %v9375_v24  ;;  %v9399_v6 = vld [vmem:[#allocation111_spill] sm:$0xff]  ;;  %v3337_v50 = vmul.f32 %v7950_v29, %v9386_v41  ;;  %v3339_v29 = vmul.f32 %v8013_v21, %v9391_v52  ;;  %v3341_v41 = vmul.f32 %v8075_v63, %v9395_v56 }
 0x1eb   : > { %5499 = vmatprep.mubr.msk.bf16.mxu0 %vm1120_vm1, %v920_v14  ;;  %v922_v14 = vpack.c.bf16 %v905_v0, %v904_v8  ;;  %v907_v35 = vmul.f32 %v9400_v30, %v9399_v6 }
 0x1ec   : > { %6158 = vset.pattern.permute.xlu1 %v9252_v62  ;;  %v3270_v46 = vpop.permute.xlu1 %3269  ;;  %v3356_v23 = vpack.c.bf16 %v3333_v57, %v3332_v5 }
 0x1ed   : > { %3686 = vperm.xlu1 %6158, %v9388_v19   ;;  %v3330_v19 = vmul.f32 %v3246_v38, %v9371_v44  ;;  %v9398_v38 = vld [vmem:[#allocation36_spill] sm:$0xff]  ;;  %v8282_v61 = vpop.permute.xlu0 %1641  ;;  %v3336_v22 = vmul.f32 %v3270_v46, %v9384_v54 }
 0x1ef   : > { %5664 = vmatmul.mubr.msk.bf16.gmra.mrb[0].mxu1 %vm1120_vm1, %v3353_v17  ;;  %v3355_v44 = vpack.c.bf16 %v3331_v59, %v3330_v19  ;;  %v3358_v16 = vpack.c.bf16 %v3337_v50, %v3336_v22  ;;  %v1745_v19 = vmul.f32 %v8236_v39, %v9357_v47  ;;  %v3343_v39 = vmul.f32 %v8116_v15, %v9399_v6 }
 0x1f0   : > { %5667 = vmatprep.mubr.msk.bf16.mxu1 %vm1120_vm1, %v3354_v32  ;;  %v3278_v51 = vpop.permute.xlu1 %3277  ;;  %v3335_v32 = vmul.f32 %v7917_v12, %v9382_v18 }
 0x1f1   : > { %3690 = vperm.xlu1 %6158, %v9316_v7   ;;  %v9397_v7 = vld [vmem:[#allocation109_spill] sm:$0xff]  ;;  %v8294_v54 = vpop.permute.xlu0 %1653 }
 0x1f2   : > { %5500 = vmatmul.mubr.msk.bf16.gmra.mrb[56].mxu0 %vm1120_vm1, %v921_v3  ;;  %v906_v24 = vmul.f32 %v9398_v38, %v9397_v7  ;;  %v3357_v33 = vpack.c.bf16 %v3335_v32, %v3334_v10  ;;  %v6247_v32 = vld [vmem:[%s8907_s1 + $0xc8] sm:$0xff] }
 0x1f3   : > { %5503 = vmatprep.mubr.msk.bf16.mxu0 %vm1120_vm1, %v922_v14 }
 0x1f4   : > { %v3286_v17 = vpop.permute.xlu1 %3285  ;;  %v923_v37 = vpack.c.bf16 %v907_v35, %v906_v24  ;;  %v9403_v24 = vld [vmem:[#allocation128_spill] sm:$0xff]  ;;  %v3751_v35 = vmul.f32 %v8195_v53, %v7416_v1 }
 0x1f5   : > { %6159 = vset.pattern.permute.xlu1 %v9257_v48  ;;  %v3340_v18 = vmul.f32 %v3286_v17, %v9393_v9  ;;  %v8308_v3 = vpop.permute.xlu0 %1657 }
 0x1f6   : > { %1693 = vperm.xlu1 %6159, %v8042_v20  }
 0x1f7   : > { %5668 = vmatmul.mubr.msk.bf16.gmra.mrb[4].mxu1 %vm1120_vm1, %v3355_v44  ;;  %v9402_v44 = vld [vmem:[#allocation127_spill] sm:$0xff] }
 0x1f8   : > { %5671 = vmatprep.mubr.msk.bf16.mxu1 %vm1120_vm1, %v3356_v23  ;;  %v3294_v31 = vpop.permute.xlu1 %3293 }
 0x1f9   : > { %v3342_v63 = vmul.f32 %v3294_v31, %v9397_v7  ;;  %v8321_v5 = vpop.permute.xlu0 %1669  ;;  %v1746_v7 = vmul.f32 %v8254_v43, %v9402_v44  ;;  %v6246_v31 = vld [vmem:[%s8910_s4 + $0x38] sm:$0xff]  }
 0x1fa   : > { %6160 = vset.pattern.permute.xlu1 %v9252_v62  ;;  %5504 = vmatmul.mubr.msk.bf16.gmra.mrb[60].mxu0 %vm1120_vm1, %v923_v37  ;;  %v9405_v37 = vld [vmem:[#allocation65_spill] sm:$0xff] }
 0x1fb   : > { %3698 = vperm.xlu1 %6160, %v8042_v20   ;;  %v3338_v20 = vmul.f32 %v3278_v51, %v9389_v34  ;;  %v3360_v34 = vpack.c.bf16 %v3341_v41, %v3340_v18  ;;  %v3345_v51 = vmul.f32 %v8147_v49, %v9305_v11  ;;  %v3361_v14 = vpack.c.bf16 %v3343_v39, %v3342_v63 }
 0x1fc   : > { %v3302_v8 = vpop.permute.xlu1 %3301  ;;  %v3347_v49 = vmul.f32 %v8173_v27, %v7994_v4  ;;  %v9404_v27 = vld [vmem:[#allocation120_spill] sm:$0xff]  ;;  %v1749_v1 = vmul.f32 %v8270_v42, %v9405_v37 }
 0x1fd   : > { %v3359_v46 = vpack.c.bf16 %v3339_v29, %v3338_v20  ;;  %v3344_v52 = vmul.f32 %v3302_v8, %v7446_v2  ;;  %v8329_v57 = vpop.permute.xlu0 %1673  ;;  %v9407_v42 = vld [vmem:[#allocation116_spill] sm:$0xff] }
 0x1ff   : > { %5672 = vmatmul.mubr.msk.bf16.gmra.mrb[8].mxu1 %vm1120_vm1, %v3357_v33  ;;  %6161 = vset.pattern.permute.xlu1 %v9257_v48  ;;  %v3362_v59 = vpack.c.bf16 %v3345_v51, %v3344_v52  ;;  %v8388_v52 = vld [vmem:[%s8907_s1 + $0xe0] sm:$0xff] }
 0x200   : > { %5675 = vmatprep.mubr.msk.bf16.mxu1 %vm1120_vm1, %v3358_v16  ;;  %1697 = vperm.xlu1 %6161, %v9401_v13   ;;  %v3310_v12 = vpop.permute.xlu1 %3309  ;;  %v9408_v16 = vld [vmem:[#allocation37_spill] sm:$0xff] }
 0x201   : > { %v3346_v15 = vmul.f32 %v3310_v12, %v7982_v40  ;;  %v9409_v12 = vld [vmem:[#allocation42_spill] sm:$0xff]  ;;  %v9413_v51 = vld [vmem:[#allocation49_spill] sm:$0xff] }
 0x203   : > { %v3363_v6 = vpack.c.bf16 %v3347_v49, %v3346_v15  ;;  %v9414_v15 = vld [vmem:[#allocation72_spill] sm:$0xff]  ;;  %v9415_v49 = vld [vmem:[#allocation55_spill] sm:$0xff] }
 0x204   : > { %6162 = vset.pattern.permute.xlu1 %v9252_v62 }
 0x205   : > { %3702 = vperm.xlu1 %6162, %v9401_v13   ;;  %v1618_v0 = vpop.permute.xlu1 %1617 }
 0x206   : > { %v1744_v9 = vmul.f32 %v1618_v0, %v8139_v36 }
 0x207   : > { %5676 = vmatmul.mubr.msk.bf16.gmra.mrb[12].mxu1 %vm1120_vm1, %v3359_v46  ;;  %v9410_v46 = vld [vmem:[#allocation130_spill] sm:$0xff] }
 0x208   : > { %v1776_v21 = vpack.c.bf16 %v1745_v19, %v1744_v9  ;;  %5679 = vmatprep.mubr.msk.bf16.mxu1 %vm1120_vm1, %v3360_v34  ;;  %v1750_v0 = vmul.f32 %v8282_v61, %v9410_v46  ;;  %v9411_v19 = vld [vmem:[#allocation50_spill] sm:$0xff]  ;;  %v6209_v9 = vld [vmem:[%s8910_s4 + $0x80] sm:$0xff]  }
 0x209   : > { %3706 = vperm.xlu1 %6162, %v9336_v60   ;;  %5723 = vmatprep.subr.bf16.mxu1 %v6209_v9 }
 0x20a   : > { %v3623_v56 = vpop.permute.xlu1 %3622  ;;  %5511 = vmatprep.mubr.msk.bf16.mxu0 %vm1120_vm1, %v1776_v21 }
 0x20b   : > { %v3749_v11 = vmul.f32 %v3623_v56, %v7313_v26  ;;  %v8341_v26 = vpop.permute.xlu0 %1685  ;;  %v9412_v56 = vld [vmem:[#allocation46_spill] sm:$0xff] }
 0x20c   : > { %v3755_v39 = vmul.f32 %v8215_v55, %v9412_v56  ;;  %v6249_v55 = vld [vmem:[%s8907_s1 + $0xe8] sm:$0xff] }
 0x20d   : > { %6163 = vset.pattern.permute.xlu1 %v9257_v48 }
 0x20e   : > { %1709 = vperm.xlu1 %6163, %v8107_v58   ;;  %v3627_v60 = vpop.permute.xlu1 %3626 }
 0x20f   : > { %5680 = vmatmul.mubr.msk.bf16.gmra.mrb[16].mxu1 %vm1120_vm1, %v3361_v14  ;;  %v3750_v2 = vmul.f32 %v3627_v60, %v7319_v25  ;;  %v8357_v53 = vpop.permute.xlu0 %1689 }
 0x210   : > { %5683 = vmatprep.mubr.msk.bf16.mxu1 %vm1120_vm1, %v3362_v59 }
 0x211   : > { %v3781_v38 = vpack.c.bf16 %v3750_v2, %v3749_v11  ;;  %v1753_v11 = vmul.f32 %v8294_v54, %v9414_v15 }
 0x212   : > { %6164 = vset.pattern.permute.xlu1 %v9252_v62 }
 0x213   : > { %3714 = vperm.xlu1 %6164, %v8107_v58   ;;  %v1630_v17 = vpop.permute.xlu1 %1629  ;;  %v8365_v8 = vpop.permute.xlu0 %1701 }
 0x214   : > { %v1747_v25 = vmul.f32 %v1630_v17, %v9403_v24 }
 0x216   : > { %v1777_v30 = vpack.c.bf16 %v1747_v25, %v1746_v7 }
 0x217   : > { %5684 = vmatmul.mubr.msk.bf16.gmra.mrb[20].mxu1 %vm1120_vm1, %v3363_v6  ;;  %6165 = vset.pattern.permute.xlu1 %v9257_v48  ;;  %v8371_v18 = vpop.permute.xlu0 %1705  ;;  %v9416_v6 = vld [vmem:[#allocation12_spill] sm:$0xff] }
 0x218   : > { %5691 = vmatprep.mubr.msk.bf16.mxu1 %vm1120_vm1, %v3781_v38  ;;  %1713 = vperm.xlu1 %6165, %v9404_v27   ;;  %v3635_v58 = vpop.permute.xlu1 %3634 }
 0x219   : > { %v3752_v43 = vmul.f32 %v3635_v58, %v7430_v28  ;;  %5512 = vmatmul.mubr.msk.bf16.vlgmr.msra.gmra.mrb[32].mxu0 %vm1120_vm1, %v1777_v30  ;;  %v9406_v28 = vld [vmem:[#allocation129_spill] sm:$0xff]  ;;  %v9418_v58 = vld [vmem:[#allocation47_spill] sm:$0xff] }
 0x21a   : > { %5544 = vmatpush3.bf16.msra.mxu0 %v8124_v45 }
 0x21b   : > { %v3782_v23 = vpack.c.bf16 %v3752_v43, %v3751_v35  ;;  %5545 = vmatprep.subr.bf16.mxu0 %v6246_v31  ;;  %v8383_v63 = vpop.permute.xlu0 %1717 }
 0x21c   : > { %6166 = vset.pattern.permute.xlu1 %v9252_v62 }
 0x21d   : > { %3718 = vperm.xlu1 %6166, %v9404_v27   ;;  %v1634_v10 = vpop.permute.xlu1 %1633  ;;  %v9417_v27 = vld [vmem:[#allocation45_spill] sm:$0xff] }
 0x21e   : > { %v1748_v22 = vmul.f32 %v1634_v10, %v9406_v28  ;;  %5546 = vmatpush3.bf16.msra.mxu0 %v6246_v31  ;;  %v9419_v10 = vld [vmem:[#allocation75_spill] sm:$0xff] }
 0x21f   : > { %5692 = vmatmul.mubr.msk.bf16.vlgmr.msra.gmra.mrb[24].mxu1 %vm1120_vm1, %v3782_v23  ;;  %v8397_v60 = vpop.permute.xlu0 %1721 }
 0x220   : > { %v1778_v45 = vpack.c.bf16 %v1749_v1, %v1748_v22  ;;  %5724 = vmatpush3.bf16.msra.mxu1 %v6209_v9  ;;  %v9420_v1 = vld [vmem:[#allocation62_spill] sm:$0xff]  ;;  %v9426_v9 = vld [vmem:[#allocation52_spill] sm:$0xff] }
 0x221   : > { %3722 = vperm.xlu1 %6166, %v6247_v32  }
 0x222   : > { %v3639_v50 = vpop.permute.xlu1 %3638  ;;  %5515 = vmatprep.mubr.msk.bf16.mxu0 %vm1120_vm1, %v1778_v45  ;;  %v9421_v45 = vmov 3  }
 0x223   : > { %v3753_v13 = vmul.f32 %v3639_v50, %v9408_v16  ;;  %v8407_v25 = vpop.permute.xlu0 %1733 }
 0x225   : > { %6167 = vset.pattern.permute.xlu1 %v9257_v48 }
 0x226   : > { %1725 = vperm.xlu1 %6167, %v9407_v42  }
 0x227   : > { %v3643_v33 = vpop.permute.xlu1 %3642  ;;  %v8413_v43 = vpop.permute.xlu0 %1737 }
 0x228   : > { %v3754_v20 = vmul.f32 %v3643_v33, %v9409_v12  ;;  %v9422_v33 = vld [vmem:[#allocation58_spill] sm:$0xff] }
 0x22a   : > { %v3783_v29 = vpack.c.bf16 %v3754_v20, %v3753_v13  ;;  %6168 = vset.pattern.permute.xlu1 %v9252_v62  ;;  %v9423_v13 = vld [vmem:[#allocation60_spill] sm:$0xff]  ;;  %v9424_v20 = vmov 8  }
 0x22b   : > { %3730 = vperm.xlu1 %6168, %v9407_v42   ;;  %v3663_v32 = vpop.permute.xlu0 %3662  ;;  %v6250_v42 = vld [vmem:[%s8907_s1] sm:$0xff] }
 0x22c   : > { %v1646_v41 = vpop.permute.xlu1 %1645  ;;  %5695 = vmatprep.mubr.msk.bf16.mxu1 %vm1120_vm1, %v3783_v29  ;;  %v3759_v16 = vmul.f32 %v3663_v32, %v9422_v33  ;;  %v6210_v29 = vld [vmem:[%s8910_s4 + $0x88] sm:$0xff]  }
 0x22d   : > { %v1751_v34 = vmul.f32 %v1646_v41, %v9411_v19  ;;  %5725 = vmatprep.subr.bf16.mxu1 %v6210_v29 }
 0x22e   : > { %5726 = vmatpush3.bf16.msra.mxu1 %v6210_v29 }
 0x22f   : > { %v1779_v21 = vpack.c.bf16 %v1751_v34, %v1750_v0  ;;  %6169 = vset.pattern.permute.xlu1 %v9257_v48  ;;  %v9425_v0 = vld [vmem:[#allocation86_spill] sm:$0xff] }
 0x230   : > { %1729 = vperm.xlu1 %6169, %v8388_v52   ;;  %v1757_v34 = vmul.f32 %v8321_v5, %v9425_v0 }
 0x231   : > { %v3651_v61 = vpop.permute.xlu1 %3650  ;;  %5516 = vmatmul.mubr.msk.bf16.gmra.mrb[36].mxu0 %vm1120_vm1, %v1779_v21 }
 0x232   : > { %v3756_v14 = vmul.f32 %v3651_v61, %v9413_v51  ;;  %v6251_v61 = vld [vmem:[%s8907_s1 + $0x8] sm:$0xff]  ;;  %v6252_v51 = vld [vmem:[%s8907_s1 + $0x18] sm:$0xff] }
 0x234   : > { %v3784_v59 = vpack.c.bf16 %v3756_v14, %v3755_v39  ;;  %6170 = vset.pattern.permute.xlu1 %v9252_v62  ;;  %v9427_v14 = vld [vmem:[#allocation54_spill] sm:$0xff] }
 0x235   : > { %3734 = vperm.xlu1 %6170, %v8388_v52  }
 0x236   : > { %v1650_v2 = vpop.permute.xlu1 %1649  ;;  %5696 = vmatmul.mubr.msk.bf16.gmra.mrb[28].mxu1 %vm1120_vm1, %v3784_v59 }
 0x237   : > { %v1752_v17 = vmul.f32 %v1650_v2, %v9415_v49  ;;  %v9428_v2 = vld [vmem:[#allocation59_spill] sm:$0xff] }
 0x239   : > { %v1780_v7 = vpack.c.bf16 %v1753_v11, %v1752_v17  ;;  %3738 = vperm.xlu1 %6170, %v6249_v55   ;;  %v9429_v55 = vld [vmem:[#allocation83_spill] sm:$0xff] }
 0x23b   : > { %v3655_v38 = vpop.permute.xlu1 %3654  ;;  %5519 = vmatprep.mubr.msk.bf16.mxu0 %vm1120_vm1, %v1780_v7 }
 0x23c   : > { %v3757_v54 = vmul.f32 %v3655_v38, %v9417_v27  ;;  %v1758_v38 = vmul.f32 %v8329_v57, %v9429_v55  ;;  %v3679_v27 = vpop.permute.xlu0 %3678 }
 0x23d   : > { %6172 = vset.pattern.permute.xlu1 %v9257_v48  ;;  %v1754_v48 = vmul.f32 %v8308_v3, %v9419_v10 }
 0x23e   : > { %1741 = vperm.xlu1 %6172, %v9416_v6  }
 0x240   : > { %v3659_v30 = vpop.permute.xlu1 %3658 }
 0x241   : > { %v3758_v35 = vmul.f32 %v3659_v30, %v9418_v58  ;;  %v6253_v58 = vld [vmem:[%s8907_s1 + $0x20] sm:$0xff] }
 0x242   : > { %6173 = vset.pattern.permute.xlu1 %v9252_v62 }
 0x243   : > { %v3785_v23 = vpack.c.bf16 %v3758_v35, %v3757_v54  ;;  %3746 = vperm.xlu1 %6173, %v9416_v6   ;;  %v9430_v6 = vld [vmem:[#allocation87_spill] sm:$0xff] }
 0x245   : > { %v1662_v31 = vpop.permute.xlu1 %1661  ;;  %5699 = vmatprep.mubr.msk.bf16.mxu1 %vm1120_vm1, %v3785_v23  ;;  %v9431_v23 = vld [vmem:[#allocation70_spill] sm:$0xff] }
 0x246   : > { %v1755_v22 = vmul.f32 %v1662_v31, %v9420_v1  ;;  %v3763_v31 = vmul.f32 %v3679_v27, %v9431_v23  ;;  %v6257_v27 = vld [vmem:[%s8907_s1 + $0x60] sm:$0xff]  ;;  %v9443_v23 = vld [vmem:[#allocation131_spill] sm:$0xff] }
 0x247   : > { %6174 = vset.pattern.permute.xlu1 %v9421_v45 }
 0x248   : > { %v1781_v50 = vpack.c.bf16 %v1755_v22, %v1754_v48  ;;  %2050 = vperm.xlu1 %6174, %v6250_v42   ;;  %v9432_v48 = vld [vmem:[#allocation73_spill] sm:$0xff] }
 0x24a   : > { %v3667_v62 = vpop.permute.xlu1 %3666  ;;  %5520 = vmatmul.mubr.msk.bf16.gmra.mrb[40].mxu0 %vm1120_vm1, %v1781_v50  ;;  %v9433_v50 = vld [vmem:[#allocation80_spill] sm:$0xff] }
 0x24b   : > { %v3760_v12 = vmul.f32 %v3667_v62, %v9423_v13  ;;  %v9434_v62 = vld [vmem:[#allocation96_spill] sm:$0xff] }
 0x24c   : > { %6175 = vset.pattern.permute.xlu1 %v9424_v20 }
 0x24d   : > { %v3786_v3 = vpack.c.bf16 %v3760_v12, %v3759_v16  ;;  %4055 = vperm.xlu1 %6175, %v6250_v42   ;;  %v1761_v42 = vmul.f32 %v8341_v26, %v9433_v50  ;;  %v6254_v16 = vld [vmem:[%s8907_s1 + $0x28] sm:$0xff] }
 0x24f   : > { %v1666_v41 = vpop.permute.xlu1 %1665  ;;  %5700 = vmatmul.mubr.msk.bf16.gmra.mrb[0].mxu1 %vm1120_vm1, %v3786_v3  ;;  %v9435_v3 = vld [vmem:[#allocation68_spill] sm:$0xff] }
 0x250   : > { %v1756_v21 = vmul.f32 %v1666_v41, %v9426_v9  ;;  %v9436_v41 = vld [vmem:[#allocation69_spill] sm:$0xff] }
 0x251   : > { %4059 = vperm.xlu1 %6175, %v6251_v61  }
 0x252   : > { %v1782_v56 = vpack.c.bf16 %v1757_v34, %v1756_v21  ;;  %v9437_v21 = vld [vmem:[#allocation71_spill] sm:$0xff] }
 0x254   : > { %v3671_v39 = vpop.permute.xlu1 %3670  ;;  %5523 = vmatprep.mubr.msk.bf16.mxu0 %vm1120_vm1, %v1782_v56 }
 0x255   : > { %6176 = vset.pattern.permute.xlu1 %v9421_v45  ;;  %v3761_v59 = vmul.f32 %v3671_v39, %v9427_v14  ;;  %v9438_v39 = vld [vmem:[#allocation97_spill] sm:$0xff] }
 0x256   : > { %2062 = vperm.xlu1 %6176, %v6252_v51   ;;  %v6255_v14 = vld [vmem:[%s8907_s1 + $0x40] sm:$0xff] }
 0x258   : > { %v3675_v5 = vpop.permute.xlu1 %3674 }
 0x259   : > { %v3762_v11 = vmul.f32 %v3675_v5, %v9428_v2  ;;  %v9439_v5 = vld [vmem:[#allocation102_spill] sm:$0xff] }
 0x25a   : > { %6179 = vset.pattern.permute.xlu1 %v9424_v20 }
 0x25b   : > { %v3787_v17 = vpack.c.bf16 %v3762_v11, %v3761_v59  ;;  %4067 = vperm.xlu1 %6179, %v6252_v51   ;;  %v1762_v51 = vmul.f32 %v8357_v53, %v9438_v39  ;;  %v3695_v59 = vpop.permute.xlu0 %3694  ;;  %v6256_v53 = vld [vmem:[%s8907_s1 + $0x50] sm:$0xff] }
 0x25d   : > { %v1678_v7 = vpop.permute.xlu1 %1677  ;;  %5703 = vmatprep.mubr.msk.bf16.mxu1 %vm1120_vm1, %v3787_v17 }
 0x25e   : > { %v1759_v30 = vmul.f32 %v1678_v7, %v9430_v6  ;;  %v9441_v7 = vld [vmem:[#allocation84_spill] sm:$0xff] }
 0x25f   : > { %6180 = vset.pattern.permute.xlu1 %v9421_v45 }
 0x260   : > { %v1783_v54 = vpack.c.bf16 %v1759_v30, %v1758_v38  ;;  %2066 = vperm.xlu1 %6180, %v6253_v58  }
 0x262   : > { %v3683_v35 = vpop.permute.xlu1 %3682  ;;  %5524 = vmatmul.mubr.msk.bf16.gmra.mrb[44].mxu0 %vm1120_vm1, %v1783_v54 }
 0x263   : > { %v3764_v22 = vmul.f32 %v3683_v35, %v9432_v48 }
 0x264   : > { %6181 = vset.pattern.permute.xlu1 %v9424_v20 }
 0x265   : > { %v3788_v57 = vpack.c.bf16 %v3764_v22, %v3763_v31  ;;  %4071 = vperm.xlu1 %6181, %v6253_v58   ;;  %v9442_v58 = vld [vmem:[#allocation101_spill] sm:$0xff]  ;;  %v6258_v22 = vld [vmem:[%s8907_s1 + $0x70] sm:$0xff] }
 0x266   : > { %v1765_v35 = vmul.f32 %v8365_v8, %v9442_v58  ;;  %v9445_v8 = vld [vmem:[#allocation82_spill] sm:$0xff] }
 0x267   : > { %v1682_v32 = vpop.permute.xlu1 %1681  ;;  %5704 = vmatmul.mubr.msk.bf16.gmra.mrb[4].mxu1 %vm1120_vm1, %v3788_v57 }
 0x268   : > { %v1760_v33 = vmul.f32 %v1682_v32, %v9434_v62  ;;  %v6259_v32 = vld [vmem:[%s8907_s1 + $0x80] sm:$0xff] }
 0x269   : > { %4075 = vperm.xlu1 %6181, %v6254_v16  }
 0x26a   : > { %v1784_v13 = vpack.c.bf16 %v1761_v42, %v1760_v33  ;;  %v9444_v33 = vld [vmem:[#allocation76_spill] sm:$0xff] }
 0x26c   : > { %v3687_v12 = vpop.permute.xlu1 %3686  ;;  %5527 = vmatprep.mubr.msk.bf16.mxu0 %vm1120_vm1, %v1784_v13 }
 0x26d   : > { %6182 = vset.pattern.permute.xlu1 %v9421_v45  ;;  %v3765_v34 = vmul.f32 %v3687_v12, %v9436_v41  ;;  %v9446_v41 = vld [vmem:[#allocation61_spill] sm:$0xff] }
 0x26e   : > { %2078 = vperm.xlu1 %6182, %v9435_v3  }
 0x270   : > { %v3691_v29 = vpop.permute.xlu1 %3690 }
 0x271   : > { %v3766_v26 = vmul.f32 %v3691_v29, %v9437_v21  ;;  %v9447_v21 = vld [vmem:[#allocation132_spill] sm:$0xff] }
 0x272   : > { %6184 = vset.pattern.permute.xlu1 %v9424_v20  ;;  %v9440_v20 = vld [vmem:[#allocation79_spill] sm:$0xff] }
 0x273   : > { %v3789_v61 = vpack.c.bf16 %v3766_v26, %v3765_v34  ;;  %4083 = vperm.xlu1 %6184, %v9435_v3   ;;  %v3767_v17 = vmul.f32 %v3695_v59, %v9440_v20  ;;  %v6260_v3 = vld [vmem:[%s8907_s1 + $0x90] sm:$0xff]  ;;  %v1766_v34 = vmul.f32 %v8371_v18, %v9446_v41 }
 0x274   : > { %v6262_v18 = vld [vmem:[%s8907_s1 + $0xb0] sm:$0xff] }
 0x275   : > { %v1694_v56 = vpop.permute.xlu1 %1693  ;;  %5707 = vmatprep.mubr.msk.bf16.mxu1 %vm1120_vm1, %v3789_v61  ;;  %v6261_v61 = vld [vmem:[%s8907_s1 + $0xa0] sm:$0xff] }
 0x276   : > { %v1763_v45 = vmul.f32 %v1694_v56, %v9439_v5  ;;  %v3711_v56 = vpop.permute.xlu0 %3710 }
 0x277   : > { %4087 = vperm.xlu1 %6184, %v6255_v14   ;;  %v9448_v14 = vld [vmem:[#allocation92_spill] sm:$0xff] }
 0x278   : > { %v1785_v2 = vpack.c.bf16 %v1763_v45, %v1762_v51  ;;  %v3771_v59 = vmul.f32 %v3711_v56, %v9448_v14  ;;  %v9457_v56 = vld [vmem:[#allocation108_spill] sm:$0xff] }
 0x27a   : > { %v3699_v11 = vpop.permute.xlu1 %3698  ;;  %5528 = vmatmul.mubr.msk.bf16.gmra.mrb[48].mxu0 %vm1120_vm1, %v1785_v2  ;;  %v9449_v2 = vld [vmem:[#allocation95_spill] sm:$0xff] }
 0x27b   : > { %v3768_v38 = vmul.f32 %v3699_v11, %v9441_v7  ;;  %4095 = vperm.xlu1 %6184, %v6256_v53  }
 0x27d   : > { %v3790_v30 = vpack.c.bf16 %v3768_v38, %v3767_v17  ;;  %v6263_v17 = vld [vmem:[%s8907_s1 + $0xc0] sm:$0xff]  ;;  %v9450_v38 = vld [vmem:[#allocation8_spill] sm:$0xff] }
 0x27e   : > { %v1769_v53 = vmul.f32 %v8383_v63, %v9450_v38  ;;  %v6265_v63 = vld [vmem:[%s8907_s1 + $0xf0] sm:$0xff] }
 0x27f   : > { %4103 = vperm.xlu1 %6184, %v6257_v27   ;;  %v1698_v54 = vpop.permute.xlu1 %1697  ;;  %5708 = vmatmul.mubr.msk.bf16.gmra.mrb[8].mxu1 %vm1120_vm1, %v3790_v30  ;;  %v9451_v30 = vld [vmem:[#allocation43_spill] sm:$0xff] }
 0x280   : > { %v1764_v31 = vmul.f32 %v1698_v54, %v9443_v23 }
 0x282   : > { %v1786_v48 = vpack.c.bf16 %v1765_v35, %v1764_v31  ;;  %v6264_v35 = vld [vmem:[%s8907_s1 + $0xd0] sm:$0xff] }
 0x283   : > { %4111 = vperm.xlu1 %6184, %v6258_v22   ;;  %v9452_v22 = vld [vmem:[#allocation90_spill] sm:$0xff] }
 0x284   : > { %v3703_v57 = vpop.permute.xlu1 %3702  ;;  %5531 = vmatprep.mubr.msk.bf16.mxu0 %vm1120_vm1, %v1786_v48 }
 0x285   : > { %v3769_v16 = vmul.f32 %v3703_v57, %v9444_v33 }
 0x287   : > { %4119 = vperm.xlu1 %6184, %v6259_v32   ;;  %v9453_v32 = vld [vmem:[#allocation94_spill] sm:$0xff] }
 0x288   : > { %v3707_v42 = vpop.permute.xlu1 %3706 }
 0x289   : > { %v3770_v13 = vmul.f32 %v3707_v42, %v9445_v8  ;;  %v9454_v8 = vld [vmem:[#allocation119_spill] sm:$0xff] }
 0x28b   : > { %v3791_v12 = vpack.c.bf16 %v3770_v13, %v3769_v16  ;;  %4127 = vperm.xlu1 %6184, %v6260_v3   ;;  %v1770_v13 = vmul.f32 %v8397_v60, %v9454_v8 }
 0x28d   : > { %v1710_v29 = vpop.permute.xlu1 %1709  ;;  %5711 = vmatprep.mubr.msk.bf16.mxu1 %vm1120_vm1, %v3791_v12  ;;  %v9455_v12 = vld [vmem:[#allocation112_spill] sm:$0xff] }
 0x28e   : > { %v1767_v26 = vmul.f32 %v1710_v29, %v9447_v21 }
 0x28f   : > { %4135 = vperm.xlu1 %6184, %v6261_v61  }
 0x290   : > { %v1787_v51 = vpack.c.bf16 %v1767_v26, %v1766_v34  ;;  %v9456_v26 = vld [vmem:[#allocation106_spill] sm:$0xff] }
 0x292   : > { %v3715_v45 = vpop.permute.xlu1 %3714  ;;  %5532 = vmatmul.mubr.msk.bf16.gmra.mrb[52].mxu0 %vm1120_vm1, %v1787_v51 }
 0x293   : > { %v3772_v11 = vmul.f32 %v3715_v45, %v9449_v2  ;;  %4143 = vperm.xlu1 %6184, %v6262_v18  }
 0x295   : > { %v3792_v20 = vpack.c.bf16 %v3772_v11, %v3771_v59  ;;  %v9458_v59 = vld [vmem:[#allocation9_spill] sm:$0xff]  ;;  %v9459_v11 = vld [vmem:[#allocation7_spill] sm:$0xff] }
 0x296   : > { %v1773_v2 = vmul.f32 %v8407_v25, %v9458_v59 }
 0x297   : > { %4151 = vperm.xlu1 %6184, %v6263_v17   ;;  %v1714_v7 = vpop.permute.xlu1 %1713  ;;  %5712 = vmatmul.mubr.msk.bf16.gmra.mrb[12].mxu1 %vm1120_vm1, %v3792_v20 }
 0x298   : > { %v1768_v27 = vmul.f32 %v1714_v7, %v9451_v30 }
 0x29a   : > { %v1788_v54 = vpack.c.bf16 %v1769_v53, %v1768_v27  ;;  %v9460_v53 = vld [vmem:[#allocation105_spill] sm:$0xff] }
 0x29b   : > { %4159 = vperm.xlu1 %6184, %v6264_v35  }
 0x29c   : > { %v3719_v31 = vpop.permute.xlu1 %3718  ;;  %5535 = vmatprep.mubr.msk.bf16.mxu0 %vm1120_vm1, %v1788_v54  ;;  %v9461_v54 = vld [vmem:[#allocation107_spill] sm:$0xff] }
 0x29d   : > { %v3773_v57 = vmul.f32 %v3719_v31, %v9452_v22 }
 0x29f   : > { %4167 = vperm.xlu1 %6184, %v8388_v52   ;;  %v3727_v52 = vpop.permute.xlu0 %3726 }
 0x2a0   : > { %v3723_v48 = vpop.permute.xlu1 %3722  ;;  %v3775_v61 = vmul.f32 %v3727_v52, %v9456_v26  ;;  %v9465_v52 = vld [vmem:[#allocation93_spill] sm:$0xff] }
 0x2a1   : > { %v3774_v42 = vmul.f32 %v3723_v48, %v9453_v32  ;;  %v9463_v32 = vld [vmem:[#allocation125_spill] sm:$0xff] }
 0x2a3   : > { %v3793_v33 = vpack.c.bf16 %v3774_v42, %v3773_v57  ;;  %4175 = vperm.xlu1 %6184, %v6265_v63   ;;  %v3743_v20 = vpop.permute.xlu0 %3742  ;;  %v9462_v57 = vld [vmem:[#allocation41_spill] sm:$0xff] }
 0x2a4   : > { %v1774_v25 = vmul.f32 %v8413_v43, %v9462_v57 }
 0x2a5   : > { %v1726_v16 = vpop.permute.xlu1 %1725  ;;  %5715 = vmatprep.mubr.msk.bf16.mxu1 %vm1120_vm1, %v3793_v33 }
 0x2a6   : > { %v1771_v3 = vmul.f32 %v1726_v16, %v9455_v12 }
 0x2a7   : > { %v4064_v31 = vpop.permute.xlu0 %4063 }
 0x2a8   : > { %v1789_v29 = vpack.c.bf16 %v1771_v3, %v1770_v13  ;;  %v9464_v13 = vld [vmem:[#allocation98_spill] sm:$0xff] }
 0x2a9   : > { %v3779_v3 = vmul.f32 %v3743_v20, %v9464_v13 }
 0x2aa   : > { %v3731_v34 = vpop.permute.xlu1 %3730  ;;  %5536 = vmatmul.mubr.msk.bf16.gmra.mrb[56].mxu0 %vm1120_vm1, %v1789_v29 }
 0x2ab   : > { %v3776_v51 = vmul.f32 %v3731_v34, %v9457_v56  ;;  %v2055_v33 = vpop.permute.xlu0 %2054 }
 0x2ac   : > { %v2178_v56 = vmul.f32 %v2055_v33, %v7994_v4  ;;  %v9467_v4 = vld [vmem:[#allocation110_spill] sm:$0xff]  ;;  %v9468_v33 = vld [vmem:[#allocation5_spill] sm:$0xff] }
 0x2ad   : > { %v3794_v45 = vpack.c.bf16 %v3776_v51, %v3775_v61 }
 0x2af   : > { %v1730_v14 = vpop.permute.xlu1 %1729  ;;  %5716 = vmatmul.mubr.msk.bf16.gmra.mrb[16].mxu1 %vm1120_vm1, %v3794_v45  ;;  %v2059_v26 = vpop.permute.xlu0 %2058 }
 0x2b0   : > { %v1772_v60 = vmul.f32 %v1730_v14, %v9459_v11 }
 0x2b2   : > { %v1790_v18 = vpack.c.bf16 %v1773_v2, %v1772_v60 }
 0x2b3   : > { %v2071_v45 = vpop.permute.xlu0 %2070 }
 0x2b4   : > { %v3735_v17 = vpop.permute.xlu1 %3734  ;;  %5539 = vmatprep.mubr.msk.bf16.mxu0 %vm1120_vm1, %v1790_v18 }
 0x2b5   : > { %v3777_v27 = vmul.f32 %v3735_v17, %v9460_v53  ;;  %v9466_v53 = vld [vmem:[#allocation6_spill] sm:$0xff] }
 0x2b7   : > { %v2075_v20 = vpop.permute.xlu0 %2074 }
 0x2b8   : > { %v3739_v7 = vpop.permute.xlu1 %3738 }
 0x2b9   : > { %v3778_v35 = vmul.f32 %v3739_v7, %v9461_v54 }
 0x2bb   : > { %v3795_v48 = vpack.c.bf16 %v3778_v35, %v3777_v27  ;;  %v2179_v27 = vmul.f32 %v2059_v26, %v9466_v53 }
 0x2bd   : > { %v1742_v22 = vpop.permute.xlu1 %1741  ;;  %5719 = vmatprep.mubr.msk.bf16.mxu1 %vm1120_vm1, %v3795_v48 }
 0x2be   : > { %v1775_v42 = vmul.f32 %v1742_v22, %v9463_v32  ;;  %v4184_v22 = vmul.f32 %v4064_v31, %v9410_v46 }
 0x2c0   : > { %v1791_v63 = vpack.c.bf16 %v1775_v42, %v1774_v25 }
 0x2c2   : > { %v3747_v16 = vpop.permute.xlu1 %3746  ;;  %5540 = vmatmul.mubr.msk.bf16.gmra.mrb[60].mxu0 %vm1120_vm1, %v1791_v63  ;;  %v2182_v63 = vmul.f32 %v2071_v45, %v9468_v33 }
 0x2c3   : > { %v3780_v29 = vmul.f32 %v3747_v16, %v9465_v52  ;;  %v9469_v16 = vld [vmem:[#allocation123_spill] sm:$0xff] }
 0x2c5   : > { %v3796_v34 = vpack.c.bf16 %v3780_v29, %v3779_v3 }
 0x2c7   : > { %v2051_v61 = vpop.permute.xlu1 %2050  ;;  %5720 = vmatmul.mubr.msk.bf16.gmra.mrb[20].mxu1 %vm1120_vm1, %v3796_v34 }
 0x2c8   : > { %v2177_v43 = vmul.f32 %v2051_v61, %v7982_v40  ;;  %v4080_v40 = vpop.permute.xlu0 %4079 }
 0x2ca   : > { %v2209_v51 = vpack.c.bf16 %v2178_v56, %v2177_v43  ;;  %v9470_v56 = vld [vmem:[#allocation10_spill] sm:$0xff] }
 0x2cb   : > { %v2183_v43 = vmul.f32 %v2075_v20, %v9470_v56 }
 0x2cc   : > { %v4056_v14 = vpop.permute.xlu1 %4055  ;;  %5547 = vmatprep.mubr.msk.bf16.mxu0 %vm1120_vm1, %v2209_v51  ;;  %v9471_v51 = vld [vmem:[#allocation40_spill] sm:$0xff] }
 0x2cd   : > { %v4182_v60 = vmul.f32 %v4056_v14, %v9406_v28 }
 0x2d0   : > { %v4060_v2 = vpop.permute.xlu1 %4059 }
 0x2d1   : > { %v4183_v18 = vmul.f32 %v4060_v2, %v9405_v37  ;;  %v4092_v37 = vpop.permute.xlu0 %4091 }
 0x2d2   : > { %v4191_v53 = vmul.f32 %v4092_v37, %v9425_v0 }
 0x2d3   : > { %v4214_v17 = vpack.c.bf16 %v4183_v18, %v4182_v60  ;;  %v4188_v18 = vmul.f32 %v4080_v40, %v9419_v10 }
 0x2d5   : > { %v2063_v7 = vpop.permute.xlu1 %2062  ;;  %5727 = vmatprep.mubr.msk.bf16.mxu1 %vm1120_vm1, %v4214_v17  ;;  %v4100_v52 = vpop.permute.xlu0 %4099 }
 0x2d6   : > { %v2180_v54 = vmul.f32 %v2063_v7, %v9467_v4 }
 0x2d8   : > { %v2210_v35 = vpack.c.bf16 %v2180_v54, %v2179_v27  ;;  %v4193_v54 = vmul.f32 %v4100_v52, %v9430_v6 }
 0x2da   : > { %v4068_v48 = vpop.permute.xlu1 %4067  ;;  %5548 = vmatmul.mubr.msk.bf16.vlgmr.msra.gmra.mrb[32].mxu0 %vm1120_vm1, %v2210_v35 }
 0x2db   : > { %v4185_v28 = vmul.f32 %v4068_v48, %v9411_v19  ;;  %v4108_v19 = vpop.permute.xlu0 %4107 }
 0x2dc   : > { %v4195_v48 = vmul.f32 %v4108_v19, %v9433_v50 }
 0x2dd   : > { %v4215_v25 = vpack.c.bf16 %v4185_v28, %v4184_v22 }
 0x2df   : > { %v2067_v42 = vpop.permute.xlu1 %2066  ;;  %5728 = vmatmul.mubr.msk.bf16.vlgmr.msra.gmra.mrb[24].mxu1 %vm1120_vm1, %v4215_v25  ;;  %v4116_v14 = vpop.permute.xlu0 %4115 }
 0x2e0   : > { %v2181_v13 = vmul.f32 %v2067_v42, %v9469_v16  ;;  %v4197_v25 = vmul.f32 %v4116_v14, %v9439_v5 }
 0x2e2   : > { %v2211_v3 = vpack.c.bf16 %v2182_v63, %v2181_v13 }
 0x2e4   : > { %v4072_v29 = vpop.permute.xlu1 %4071  ;;  %5551 = vmatprep.mubr.msk.bf16.mxu0 %vm1120_vm1, %v2211_v3 }
 0x2e5   : > { %v4186_v26 = vmul.f32 %v4072_v29, %v9415_v49 }
 0x2e8   : > { %v4076_v34 = vpop.permute.xlu1 %4075 }
 0x2e9   : > { %v4187_v46 = vmul.f32 %v4076_v34, %v9414_v15  ;;  %v4124_v15 = vpop.permute.xlu0 %4123 }
 0x2ea   : > { %v4199_v42 = vmul.f32 %v4124_v15, %v9442_v58 }
 0x2eb   : > { %v4216_v31 = vpack.c.bf16 %v4187_v46, %v4186_v26 }
 0x2ed   : > { %v2079_v61 = vpop.permute.xlu1 %2078  ;;  %5731 = vmatprep.mubr.msk.bf16.mxu1 %vm1120_vm1, %v4216_v31  ;;  %v4132_v10 = vpop.permute.xlu0 %4131 }
 0x2ee   : > { %v2184_v45 = vmul.f32 %v2079_v61, %v9471_v51  ;;  %v4201_v16 = vmul.f32 %v4132_v10, %v9447_v21 }
 0x2f0   : > { %v2212_v2 = vpack.c.bf16 %v2184_v45, %v2183_v43 }
 0x2f2   : > { %v4084_v60 = vpop.permute.xlu1 %4083  ;;  %5552 = vmatmul.mubr.msk.bf16.gmra.mrb[36].mxu0 %vm1120_vm1, %v2212_v2 }
 0x2f3   : > { %v4189_v49 = vmul.f32 %v4084_v60, %v9420_v1 }
 0x2f5   : > { %v4217_v17 = vpack.c.bf16 %v4189_v49, %v4188_v18 }
 0x2f6   : > { %v4088_v7 = vpop.permute.xlu1 %4087 }
 0x2f7   : > { %v4190_v27 = vmul.f32 %v4088_v7, %v9426_v9  ;;  %5732 = vmatmul.mubr.msk.bf16.gmra.mrb[28].mxu1 %vm1120_vm1, %v4217_v17  ;;  %v4140_v9 = vpop.permute.xlu0 %4139 }
 0x2f8   : > { %v4203_v52 = vmul.f32 %v4140_v9, %v9450_v38 }
 0x2f9   : > { %v4218_v20 = vpack.c.bf16 %v4191_v53, %v4190_v27  ;;  %v6211_v53 = vld [vmem:[%s8912_s6] sm:$0xff]  }
 0x2fa   : > { %v4096_v4 = vpop.permute.xlu1 %4095  ;;  %5759 = vmatprep.subr.bf16.mxu0 %v6211_v53 }
 0x2fb   : > { %v4192_v35 = vmul.f32 %v4096_v4, %v9429_v55  ;;  %5735 = vmatprep.mubr.msk.bf16.mxu1 %vm1120_vm1, %v4218_v20  ;;  %v4148_v50 = vpop.permute.xlu0 %4147  ;;  %5760 = vmatpush3.bf16.msra.mxu0 %v6211_v53 }
 0x2fc   : > { %v4205_v34 = vmul.f32 %v4148_v50, %v9455_v12 }
 0x2fd   : > { %v4219_v40 = vpack.c.bf16 %v4193_v54, %v4192_v35 }
 0x2fe   : > { %v4104_v1 = vpop.permute.xlu1 %4103 }
 0x2ff   : > { %v4194_v22 = vmul.f32 %v4104_v1, %v9434_v62  ;;  %5736 = vmatmul.mubr.msk.bf16.gmra.mrb[0].mxu1 %vm1120_vm1, %v4219_v40  ;;  %v4156_v5 = vpop.permute.xlu0 %4155 }
 0x300   : > { %v4207_v19 = vmul.f32 %v4156_v5, %v9458_v59 }
 0x301   : > { %v4220_v0 = vpack.c.bf16 %v4195_v48, %v4194_v22 }
 0x302   : > { %v4112_v28 = vpop.permute.xlu1 %4111 }
 0x303   : > { %v4196_v6 = vmul.f32 %v4112_v28, %v9438_v39  ;;  %5739 = vmatprep.mubr.msk.bf16.mxu1 %vm1120_vm1, %v4220_v0 }
 0x305   : > { %v4221_v55 = vpack.c.bf16 %v4197_v25, %v4196_v6 }
 0x306   : > { %v4120_v37 = vpop.permute.xlu1 %4119 }
 0x307   : > { %v4198_v33 = vmul.f32 %v4120_v37, %v9443_v23  ;;  %5740 = vmatmul.mubr.msk.bf16.gmra.mrb[4].mxu1 %vm1120_vm1, %v4221_v55 }
 0x309   : > { %v4222_v62 = vpack.c.bf16 %v4199_v42, %v4198_v33 }
 0x30a   : > { %v4128_v63 = vpop.permute.xlu1 %4127 }
 0x30b   : > { %v4200_v13 = vmul.f32 %v4128_v63, %v9446_v41  ;;  %5743 = vmatprep.mubr.msk.bf16.mxu1 %vm1120_vm1, %v4222_v62  ;;  %v4164_v41 = vpop.permute.xlu0 %4163  ;;  %v8674_v62 = vld [vmem:[%s8911_s5] ss:$0 sm:$0xff] }
 0x30c   : > { %v4209_v56 = vmul.f32 %v4164_v41, %v9463_v32 }
 0x30d   : > { %v4223_v39 = vpack.c.bf16 %v4201_v16, %v4200_v13 }
 0x30e   : > { %v4136_v3 = vpop.permute.xlu1 %4135 }
 0x30f   : > { %v4202_v58 = vmul.f32 %v4136_v3, %v9451_v30  ;;  %5744 = vmatmul.mubr.msk.bf16.gmra.mrb[8].mxu1 %vm1120_vm1, %v4223_v39  ;;  %v4172_v30 = vpop.permute.xlu0 %4171 }
 0x310   : > { %v4211_v59 = vmul.f32 %v4172_v30, %v9357_v47 }
 0x311   : > { %v4224_v23 = vpack.c.bf16 %v4203_v52, %v4202_v58 }
 0x312   : > { %v4144_v29 = vpop.permute.xlu1 %4143 }
 0x313   : > { %v4204_v26 = vmul.f32 %v4144_v29, %v9454_v8  ;;  %5747 = vmatprep.mubr.msk.bf16.mxu1 %vm1120_vm1, %v4224_v23  ;;  %v4180_v2 = vpop.permute.xlu0 %4179 }
 0x314   : > { %v4213_v18 = vmul.f32 %v4180_v2, %v9403_v24 }
 0x315   : > { %v4225_v21 = vpack.c.bf16 %v4205_v34, %v4204_v26 }
 0x316   : > { %v4152_v46 = vpop.permute.xlu1 %4151 }
 0x317   : > { %v4206_v31 = vmul.f32 %v4152_v46, %v9459_v11  ;;  %5748 = vmatmul.mubr.msk.bf16.gmra.mrb[12].mxu1 %vm1120_vm1, %v4225_v21 }
 0x319   : > { %v4226_v38 = vpack.c.bf16 %v4207_v19, %v4206_v31 }
 0x31a   : > { %v4160_v61 = vpop.permute.xlu1 %4159 }
 0x31b   : > { %v4208_v12 = vmul.f32 %v4160_v61, %v9462_v57  ;;  %5751 = vmatprep.mubr.msk.bf16.mxu1 %vm1120_vm1, %v4226_v38 }
 0x31d   : > { %v4227_v8 = vpack.c.bf16 %v4209_v56, %v4208_v12  ;;  %v8610_v43 = vpop.f32.mrb[40].mxu0 }
 0x31e   : > { %v4168_v51 = vpop.permute.xlu1 %4167  ;;  %v8612_v45 = vpop.f32.mrb[41].mxu0 }
 0x31f   : > { %v4210_v11 = vmul.f32 %v4168_v51, %v8139_v36  ;;  %v8616_v14 = vpop.f32.mrb[42].mxu0  ;;  %5752 = vmatmul.mubr.msk.bf16.gmra.mrb[16].mxu1 %vm1120_vm1, %v4227_v8 }
 0x320   : > { %v8619_v32 = vpop.f32.mrb[43].mxu0 }
 0x321   : > { %v4228_v57 = vpack.c.bf16 %v4211_v59, %v4210_v11 }
 0x322   : > { %v4176_v60 = vpop.permute.xlu1 %4175 }
 0x323   : > { %v4212_v49 = vmul.f32 %v4176_v60, %v9402_v44  ;;  %5755 = vmatprep.mubr.msk.bf16.mxu1 %vm1120_vm1, %v4228_v57  ;;  %v6212_v44 = vld [vmem:[%s8912_s6 + $0x8] sm:$0xff]  }
 0x324   : > { %5761 = vmatprep.subr.bf16.mxu0 %v6212_v44 }
 0x325   : > { %v4229_v17 = vpack.c.bf16 %v4213_v18, %v4212_v49  ;;  %5762 = vmatpush3.bf16.msra.mxu0 %v6212_v44 }
 0x327   : > { %5756 = vmatmul.mubr.msk.bf16.gmra.mrb[20].mxu1 %vm1120_vm1, %v4229_v17 }
 0x335   : > { %v8625_v47 = vpop.f32.mrb[44].mxu0 }
 0x336   : > { %v8627_v36 = vpop.f32.mrb[45].mxu0 }
 0x337   : > { %v8629_v15 = vpop.f32.mrb[46].mxu0 }
 0x338   : > { %v8631_v7 = vpop.f32.mrb[47].mxu0 }
 0x34d   : > { %v8639_v24 = vpop.f32.mrb[48].mxu0 }
 0x34e   : > { %v8641_v27 = vpop.f32.mrb[49].mxu0 }
 0x34f   : > { %v8643_v20 = vpop.f32.mrb[50].mxu0 }
 0x350   : > { %v8645_v4 = vpop.f32.mrb[51].mxu0 }
 0x365   : > { %v8647_v54 = vpop.f32.mrb[52].mxu0 }
 0x366   : > { %v8649_v35 = vpop.f32.mrb[53].mxu0 }
 0x367   : > { %v8651_v10 = vpop.f32.mrb[54].mxu0 }
 0x368   : > { %v8653_v40 = vpop.f32.mrb[55].mxu0 }
 0x37d   : > { %v8655_v1 = vpop.f32.mrb[56].mxu0 }
 0x37e   : > { %v8657_v48 = vpop.f32.mrb[57].mxu0 }
 0x37f   : > { %v8659_v22 = vpop.f32.mrb[58].mxu0 }
 0x380   : > { %v8661_v0 = vpop.f32.mrb[59].mxu0 }
 0x395   : > { %v8663_v9 = vpop.f32.mrb[60].mxu0 }
 0x396   : > { %v8665_v28 = vpop.f32.mrb[61].mxu0 }
 0x397   : > { %v8667_v25 = vpop.f32.mrb[62].mxu0 }
 0x398   : > { %v8669_v6 = vpop.f32.mrb[63].mxu0 }
 0x3ad   : > { %v5549_v55 = vpop.f32.mrb[32].mxu0 }
 0x3ae   : > { %v2323_v37 = vpop.f32.mrb[33].mxu0 }
 0x3af   : > { %v5550_v42 = vpop.f32.mrb[34].mxu0 }
 0x3b0   : > { %v2326_v33 = vpop.f32.mrb[35].mxu0 }
 0x3b2   : > { %v5729_v50 = vpop.f32.mrb[24].mxu1 }
 0x3b3   : > { %v5799_v63 = vadd.f32 %v5729_v50, %v5549_v55  ;;  %v4328_v16 = vpop.f32.mrb[25].mxu1 }
 0x3b4   : > { %v5800_v13 = vadd.f32 %v4328_v16, %v2323_v37  ;;  %v5730_v39 = vpop.f32.mrb[26].mxu1 }
 0x3b5   : > { %v4496_v5 = vadd.f32 %v5799_v63, %v8674_v62  ;;  %v5801_v3 = vadd.f32 %v5730_v39, %v5550_v42  ;;  %v4331_v52 = vpop.f32.mrb[27].mxu1 }
 0x3b6   : > { %v4494_v58 = vadd.f32 %v5800_v13, %v8674_v62  ;;  %v5802_v23 = vadd.f32 %v4331_v52, %v2326_v33 }
 0x3b7   : > { %v4497_v29 = vadd.f32 %v5801_v3, %v8674_v62  ;;  %v4528_v26 = vmax.f32 %v4496_v5, 0.0 }
 0x3b8   : > { %v4495_v34 = vadd.f32 %v5802_v23, %v8674_v62  ;;  %v4526_v21 = vmax.f32 %v4494_v58, 0.0 }
 0x3b9   : > { %v4529_v41 = vmax.f32 %v4497_v29, 0.0 }
 0x3ba   : > { %v4527_v46 = vmax.f32 %v4495_v34, 0.0 }
 0x3bb   : > { %v4559_v19 = vpack.c.bf16 %v4529_v41, %v4528_v26 }
 0x3bc   : > { %v4558_v31 = vpack.c.bf16 %v4527_v46, %v4526_v21 }
 0x3be   : > { %5763 = vmatprep.mubr.msk.bf16.mxu0 %vm1120_vm1, %v4558_v31 }
 0x3bf   : > { %5764 = vmatmul.mubr.msk.bf16.vlgmr.msra.gmra.mrb[64].mxu0 %vm1120_vm1, %v4559_v19 }
 0x3c5   : > { %v5553_v38 = vpop.f32.mrb[36].mxu0 }
 0x3c6   : > { %v2339_v30 = vpop.f32.mrb[37].mxu0 }
 0x3c7   : > { %v5554_v61 = vpop.f32.mrb[38].mxu0 }
 0x3c8   : > { %v2342_v56 = vpop.f32.mrb[39].mxu0 }
 0x3ca   : > { %v5733_v12 = vpop.f32.mrb[28].mxu1 }
 0x3cb   : > { %v5803_v8 = vadd.f32 %v5733_v12, %v5553_v38  ;;  %v4344_v51 = vpop.f32.mrb[29].mxu1 }
 0x3cc   : > { %v5804_v59 = vadd.f32 %v4344_v51, %v2339_v30  ;;  %v5734_v11 = vpop.f32.mrb[30].mxu1 }
 0x3cd   : > { %v4500_v2 = vadd.f32 %v5803_v8, %v8674_v62  ;;  %v5805_v57 = vadd.f32 %v5734_v11, %v5554_v61  ;;  %v4347_v60 = vpop.f32.mrb[31].mxu1 }
 0x3ce   : > { %v4498_v18 = vadd.f32 %v5804_v59, %v8674_v62  ;;  %v5806_v49 = vadd.f32 %v4347_v60, %v2342_v56 }
 0x3cf   : > { %v4501_v17 = vadd.f32 %v5805_v57, %v8674_v62  ;;  %v4532_v44 = vmax.f32 %v4500_v2, 0.0 }
 0x3d0   : > { %v4499_v53 = vadd.f32 %v5806_v49, %v8674_v62  ;;  %v4530_v37 = vmax.f32 %v4498_v18, 0.0 }
 0x3d1   : > { %v4533_v55 = vmax.f32 %v4501_v17, 0.0 }
 0x3d2   : > { %v4531_v42 = vmax.f32 %v4499_v53, 0.0  ;;  %v5737_v33 = vpop.f32.mrb[0].mxu1 }
 0x3d3   : > { %v4561_v50 = vpack.c.bf16 %v4533_v55, %v4532_v44  ;;  %v5807_v63 = vadd.f32 %v5737_v33, %v8610_v43  ;;  %v4360_v16 = vpop.f32.mrb[1].mxu1 }
 0x3d4   : > { %v4560_v13 = vpack.c.bf16 %v4531_v42, %v4530_v37  ;;  %v5808_v39 = vadd.f32 %v4360_v16, %v8612_v45  ;;  %v5738_v5 = vpop.f32.mrb[2].mxu1 }
 0x3d5   : > { %v4504_v3 = vadd.f32 %v5807_v63, %v8674_v62  ;;  %v5809_v52 = vadd.f32 %v5738_v5, %v8616_v14  ;;  %v4363_v58 = vpop.f32.mrb[3].mxu1 }
 0x3d6   : > { %v4502_v23 = vadd.f32 %v5808_v39, %v8674_v62  ;;  %v5810_v29 = vadd.f32 %v4363_v58, %v8619_v32  ;;  %5767 = vmatprep.mubr.msk.bf16.mxu0 %vm1120_vm1, %v4560_v13 }
 0x3d7   : > { %v4505_v34 = vadd.f32 %v5809_v52, %v8674_v62  ;;  %5768 = vmatmul.mubr.msk.bf16.gmra.mrb[68].mxu0 %vm1120_vm1, %v4561_v50  ;;  %v4536_v26 = vmax.f32 %v4504_v3, 0.0 }
 0x3d8   : > { %v4503_v43 = vadd.f32 %v5810_v29, %v8674_v62  ;;  %v4534_v41 = vmax.f32 %v4502_v23, 0.0 }
 0x3d9   : > { %v4537_v45 = vmax.f32 %v4505_v34, 0.0 }
 0x3da   : > { %v4535_v21 = vmax.f32 %v4503_v43, 0.0  ;;  %v5741_v46 = vpop.f32.mrb[4].mxu1 }
 0x3db   : > { %v4563_v19 = vpack.c.bf16 %v4537_v45, %v4536_v26  ;;  %v5811_v14 = vadd.f32 %v5741_v46, %v8625_v47  ;;  %v4376_v31 = vpop.f32.mrb[5].mxu1 }
 0x3dc   : > { %v4562_v38 = vpack.c.bf16 %v4535_v21, %v4534_v41  ;;  %v5812_v32 = vadd.f32 %v4376_v31, %v8627_v36  ;;  %v5742_v30 = vpop.f32.mrb[6].mxu1 }
 0x3dd   : > { %v4508_v61 = vadd.f32 %v5811_v14, %v8674_v62  ;;  %v5813_v56 = vadd.f32 %v5742_v30, %v8629_v15  ;;  %v4379_v12 = vpop.f32.mrb[7].mxu1 }
 0x3de   : > { %v4506_v8 = vadd.f32 %v5812_v32, %v8674_v62  ;;  %v5814_v51 = vadd.f32 %v4379_v12, %v8631_v7  ;;  %5771 = vmatprep.mubr.msk.bf16.mxu0 %vm1120_vm1, %v4562_v38 }
 0x3df   : > { %v4509_v59 = vadd.f32 %v5813_v56, %v8674_v62  ;;  %5772 = vmatmul.mubr.msk.bf16.gmra.mrb[72].mxu0 %vm1120_vm1, %v4563_v19  ;;  %v4540_v11 = vmax.f32 %v4508_v61, 0.0 }
 0x3e0   : > { %v4507_v47 = vadd.f32 %v5814_v51, %v8674_v62  ;;  %v4538_v2 = vmax.f32 %v4506_v8, 0.0 }
 0x3e1   : > { %v4541_v36 = vmax.f32 %v4509_v59, 0.0 }
 0x3e2   : > { %v4539_v57 = vmax.f32 %v4507_v47, 0.0  ;;  %v5745_v60 = vpop.f32.mrb[8].mxu1 }
 0x3e3   : > { %v4565_v18 = vpack.c.bf16 %v4541_v36, %v4540_v11  ;;  %v5815_v15 = vadd.f32 %v5745_v60, %v8639_v24  ;;  %v4392_v49 = vpop.f32.mrb[9].mxu1 }
 0x3e4   : > { %v4564_v17 = vpack.c.bf16 %v4539_v57, %v4538_v2  ;;  %v5816_v7 = vadd.f32 %v4392_v49, %v8641_v27  ;;  %v5746_v53 = vpop.f32.mrb[10].mxu1 }
 0x3e5   : > { %v4512_v44 = vadd.f32 %v5815_v15, %v8674_v62  ;;  %v5817_v55 = vadd.f32 %v5746_v53, %v8643_v20  ;;  %v4395_v37 = vpop.f32.mrb[11].mxu1 }
 0x3e6   : > { %v4510_v42 = vadd.f32 %v5816_v7, %v8674_v62  ;;  %v5818_v33 = vadd.f32 %v4395_v37, %v8645_v4  ;;  %5775 = vmatprep.mubr.msk.bf16.mxu0 %vm1120_vm1, %v4564_v17 }
 0x3e7   : > { %v4513_v50 = vadd.f32 %v5817_v55, %v8674_v62  ;;  %5776 = vmatmul.mubr.msk.bf16.gmra.mrb[76].mxu0 %vm1120_vm1, %v4565_v18  ;;  %v4544_v63 = vmax.f32 %v4512_v44, 0.0 }
 0x3e8   : > { %v4511_v24 = vadd.f32 %v5818_v33, %v8674_v62  ;;  %v4542_v16 = vmax.f32 %v4510_v42, 0.0 }
 0x3e9   : > { %v4545_v27 = vmax.f32 %v4513_v50, 0.0 }
 0x3ea   : > { %v4543_v13 = vmax.f32 %v4511_v24, 0.0  ;;  %v5749_v39 = vpop.f32.mrb[12].mxu1 }
 0x3eb   : > { %v4567_v5 = vpack.c.bf16 %v4545_v27, %v4544_v63  ;;  %v5819_v20 = vadd.f32 %v5749_v39, %v8647_v54  ;;  %v4408_v3 = vpop.f32.mrb[13].mxu1 }
 0x3ec   : > { %v4566_v52 = vpack.c.bf16 %v4543_v13, %v4542_v16  ;;  %v5820_v4 = vadd.f32 %v4408_v3, %v8649_v35  ;;  %v5750_v58 = vpop.f32.mrb[14].mxu1  ;;  %v6266_v16 = vld [vmem:[%s6529_s19 + $0x10] sm:$0xff] }
 0x3ed   : > { %v4516_v23 = vadd.f32 %v5819_v20, %v8674_v62  ;;  %v5821_v29 = vadd.f32 %v5750_v58, %v8651_v10  ;;  %v4411_v34 = vpop.f32.mrb[15].mxu1  ;;  %v6267_v20 = vld [vmem:[%s6529_s19] sm:$0xff]  ;;  %v6268_v58 = vld [vmem:[%s6529_s19 + $0x18] sm:$0xff] }
 0x3ee   : > { %v4514_v43 = vadd.f32 %v5820_v4, %v8674_v62  ;;  %v5822_v26 = vadd.f32 %v4411_v34, %v8653_v40  ;;  %5779 = vmatprep.mubr.msk.bf16.mxu0 %vm1120_vm1, %v4566_v52  ;;  %v6269_v34 = vld [vmem:[%s6529_s19 + $0x8] sm:$0xff] }
 0x3ef   : > { %v4517_v45 = vadd.f32 %v5821_v29, %v8674_v62  ;;  %5780 = vmatmul.mubr.msk.bf16.gmra.mrb[80].mxu0 %vm1120_vm1, %v4567_v5  ;;  %v4548_v41 = vmax.f32 %v4516_v23, 0.0 }
 0x3f0   : > { %v4515_v54 = vadd.f32 %v5822_v26, %v8674_v62  ;;  %v4546_v21 = vmax.f32 %v4514_v43, 0.0 }
 0x3f1   : > { %v4549_v35 = vmax.f32 %v4517_v45, 0.0 }
 0x3f2   : > { %v4547_v46 = vmax.f32 %v4515_v54, 0.0  ;;  %v5753_v19 = vpop.f32.mrb[16].mxu1 }
 0x3f3   : > { %v4569_v14 = vpack.c.bf16 %v4549_v35, %v4548_v41  ;;  %v5823_v10 = vadd.f32 %v5753_v19, %v8655_v1  ;;  %v4424_v31 = vpop.f32.mrb[17].mxu1  ;;  %v6270_v19 = vld [vmem:[%s6529_s19 + $0x30] sm:$0xff] }
 0x3f4   : > { %v4568_v38 = vpack.c.bf16 %v4547_v46, %v4546_v21  ;;  %v5824_v40 = vadd.f32 %v4424_v31, %v8657_v48  ;;  %v5754_v32 = vpop.f32.mrb[18].mxu1 }
 0x3f5   : > { %v4520_v30 = vadd.f32 %v5823_v10, %v8674_v62  ;;  %v5825_v61 = vadd.f32 %v5754_v32, %v8659_v22  ;;  %v4427_v56 = vpop.f32.mrb[19].mxu1 }
 0x3f6   : > { %v4518_v12 = vadd.f32 %v5824_v40, %v8674_v62  ;;  %v5826_v8 = vadd.f32 %v4427_v56, %v8661_v0  ;;  %5783 = vmatprep.mubr.msk.bf16.mxu0 %vm1120_vm1, %v4568_v38  ;;  %v6271_v38 = vld [vmem:[%s6529_s19 + $0x20] sm:$0xff] }
 0x3f7   : > { %v4521_v51 = vadd.f32 %v5825_v61, %v8674_v62  ;;  %5784 = vmatmul.mubr.msk.bf16.gmra.mrb[84].mxu0 %vm1120_vm1, %v4569_v14  ;;  %v4552_v59 = vmax.f32 %v4520_v30, 0.0  ;;  %v6272_v61 = vld [vmem:[%s6529_s19 + $0x38] sm:$0xff] }
 0x3f8   : > { %v4519_v1 = vadd.f32 %v5826_v8, %v8674_v62  ;;  %v4550_v47 = vmax.f32 %v4518_v12, 0.0  ;;  %v6273_v8 = vld [vmem:[%s6529_s19 + $0x28] sm:$0xff] }
 0x3f9   : > { %v4553_v48 = vmax.f32 %v4521_v51, 0.0 }
 0x3fa   : > { %v4551_v11 = vmax.f32 %v4519_v1, 0.0  ;;  %v5757_v36 = vpop.f32.mrb[20].mxu1 }
 0x3fb   : > { %v4571_v2 = vpack.c.bf16 %v4553_v48, %v4552_v59  ;;  %v5827_v22 = vadd.f32 %v5757_v36, %v8663_v9  ;;  %v4440_v57 = vpop.f32.mrb[21].mxu1 }
 0x3fc   : > { %v4570_v60 = vpack.c.bf16 %v4551_v11, %v4550_v47  ;;  %v5828_v0 = vadd.f32 %v4440_v57, %v8665_v28  ;;  %v5758_v18 = vpop.f32.mrb[22].mxu1 }
 0x3fd   : > { %v4524_v15 = vadd.f32 %v5827_v22, %v8674_v62  ;;  %v5829_v49 = vadd.f32 %v5758_v18, %v8667_v25  ;;  %v4443_v17 = vpop.f32.mrb[23].mxu1  ;;  %v6274_v22 = vld [vmem:[%s6529_s19 + $0x50] sm:$0xff]  ;;  %v6275_v18 = vld [vmem:[%s6529_s19 + $0x40] sm:$0xff] }
 0x3fe   : > { %v4522_v7 = vadd.f32 %v5828_v0, %v8674_v62  ;;  %v5830_v53 = vadd.f32 %v4443_v17, %v8669_v6  ;;  %5787 = vmatprep.mubr.msk.bf16.mxu0 %vm1120_vm1, %v4570_v60  ;;  %v8752_v6 = vld [vmem:[%s8913_s7] ss:$0 sm:$0xff] }
 0x3ff   : > { %v4525_v9 = vadd.f32 %v5829_v49, %v8674_v62  ;;  %5788 = vmatmul.mubr.msk.bf16.gmra.mrb[88].mxu0 %vm1120_vm1, %v4571_v2  ;;  %v4556_v44 = vmax.f32 %v4524_v15, 0.0 }
 0x400   : > { %v4523_v28 = vadd.f32 %v5830_v53, %v8674_v62  ;;  %v4554_v37 = vmax.f32 %v4522_v7, 0.0  ;;  %v6276_v7 = vld [vmem:[%s6529_s19 + $0x58] sm:$0xff] }
 0x401   : > { %v4557_v55 = vmax.f32 %v4525_v9, 0.0 }
 0x402   : > { %v4555_v25 = vmax.f32 %v4523_v28, 0.0  ;;  %v6277_v28 = vld [vmem:[%s6529_s19 + $0x48] sm:$0xff] }
 0x403   : > { %v4573_v42 = vpack.c.bf16 %v4557_v55, %v4556_v44 }
 0x404   : > { %v4572_v33 = vpack.c.bf16 %v4555_v25, %v4554_v37 }
 0x406   : > { %5791 = vmatprep.mubr.msk.bf16.mxu0 %vm1120_vm1, %v4572_v33 }
 0x407   : > { %5792 = vmatmul.mubr.msk.bf16.gmra.mrb[92].mxu0 %vm1120_vm1, %v4573_v42 }
 0x492   : > { %v5765_v62 = vpop.f32.mrb[64].mxu0 }
 0x493   : > { %v4688_v50 = vadd.f32 %v5765_v62, %v8752_v6  ;;  %v4679_v24 = vpop.f32.mrb[65].mxu0 }
 0x494   : > { %v4680_v63 = vadd.f32 %v8752_v6, %v4679_v24  ;;  %v5766_v27 = vpop.f32.mrb[66].mxu0  ;;  %v6278_v24 = vld [vmem:[%s6529_s19 + $0x70] sm:$0xff] }
 0x495   : > { %v4808_v13 = vadd.f32 %v6266_v16, %v4688_v50  ;;  %v4691_v39 = vadd.f32 %v5766_v27, %v8752_v6  ;;  %v4682_v5 = vpop.f32.mrb[67].mxu0 }
 0x496   : > { %v4806_v3 = vadd.f32 %v6267_v20, %v4680_v63  ;;  %v4683_v52 = vadd.f32 %v8752_v6, %v4682_v5 }
 0x497   : > { %v4840_v4 = vmax.f32 %v4808_v13, 0.0  ;;  %v4809_v23 = vadd.f32 %v6268_v58, %v4691_v39  ;;  %v6279_v13 = vld [vmem:[%s6529_s19 + $0x60] sm:$0xff]  ;;  %v6281_v58 = vld [vmem:[%s6529_s19 + $0x68] sm:$0xff] }
 0x498   : > { %v4838_v29 = vmax.f32 %v4806_v3, 0.0  ;;  %v4807_v43 = vadd.f32 %v6269_v34, %v4683_v52  ;;  %v6280_v3 = vld [vmem:[%s6529_s19 + $0x78] sm:$0xff] }
 0x499   : > { %4872 = vst [vmem:[%s8764_s26 + $0x10] sm:$0xff] %v4840_v4  ;;  %v4841_v26 = vmax.f32 %v4809_v23, 0.0 }
 0x49a   : > { %4870 = vst [vmem:[%s8764_s26] sm:$0xff] %v4838_v29  ;;  %v4839_v45 = vmax.f32 %v4807_v43, 0.0 }
 0x49b   : > { %4873 = vst [vmem:[%s8764_s26 + $0x18] sm:$0xff] %v4841_v26 }
 0x49c   : > { %4871 = vst [vmem:[%s8764_s26 + $0x8] sm:$0xff] %v4839_v45 }
 0x4aa   : > { %v5769_v54 = vpop.f32.mrb[68].mxu0 }
 0x4ab   : > { %v4704_v41 = vadd.f32 %v5769_v54, %v8752_v6  ;;  %v4695_v35 = vpop.f32.mrb[69].mxu0 }
 0x4ac   : > { %v4696_v21 = vadd.f32 %v8752_v6, %v4695_v35  ;;  %v5770_v46 = vpop.f32.mrb[70].mxu0  ;;  %v6282_v35 = vld [vmem:[%s6529_s19 + $0x90] sm:$0xff] }
 0x4ad   : > { %v4812_v14 = vadd.f32 %v6270_v19, %v4704_v41  ;;  %v4707_v10 = vadd.f32 %v5770_v46, %v8752_v6  ;;  %v4698_v31 = vpop.f32.mrb[71].mxu0 }
 0x4ae   : > { %v4810_v40 = vadd.f32 %v6271_v38, %v4696_v21  ;;  %v4699_v32 = vadd.f32 %v8752_v6, %v4698_v31 }
 0x4af   : > { %v4844_v30 = vmax.f32 %v4812_v14, 0.0  ;;  %v4813_v56 = vadd.f32 %v6272_v61, %v4707_v10  ;;  %v6283_v14 = vld [vmem:[%s6529_s19 + $0x80] sm:$0xff]  ;;  %v6285_v61 = vld [vmem:[%s6529_s19 + $0x88] sm:$0xff] }
 0x4b0   : > { %v4842_v12 = vmax.f32 %v4810_v40, 0.0  ;;  %v4811_v51 = vadd.f32 %v6273_v8, %v4699_v32  ;;  %v6284_v40 = vld [vmem:[%s6529_s19 + $0x98] sm:$0xff] }
 0x4b1   : > { %4876 = vst [vmem:[%s8764_s26 + $0x30] sm:$0xff] %v4844_v30  ;;  %v4845_v1 = vmax.f32 %v4813_v56, 0.0 }
 0x4b2   : > { %4874 = vst [vmem:[%s8764_s26 + $0x20] sm:$0xff] %v4842_v12  ;;  %v4843_v59 = vmax.f32 %v4811_v51, 0.0  ;;  %v5773_v48 = vpop.f32.mrb[72].mxu0 }
 0x4b3   : > { %4877 = vst [vmem:[%s8764_s26 + $0x38] sm:$0xff] %v4845_v1  ;;  %v4720_v47 = vadd.f32 %v5773_v48, %v8752_v6  ;;  %v4711_v11 = vpop.f32.mrb[73].mxu0 }
 0x4b4   : > { %4875 = vst [vmem:[%s8764_s26 + $0x28] sm:$0xff] %v4843_v59  ;;  %v4712_v36 = vadd.f32 %v8752_v6, %v4711_v11  ;;  %v5774_v2 = vpop.f32.mrb[74].mxu0  ;;  %v6286_v11 = vld [vmem:[%s6529_s19 + $0xb0] sm:$0xff] }
 0x4b5   : > { %v4816_v57 = vadd.f32 %v6274_v22, %v4720_v47  ;;  %v4723_v60 = vadd.f32 %v5774_v2, %v8752_v6  ;;  %v4714_v0 = vpop.f32.mrb[75].mxu0 }
 0x4b6   : > { %v4814_v15 = vadd.f32 %v6275_v18, %v4712_v36  ;;  %v4715_v49 = vadd.f32 %v8752_v6, %v4714_v0 }
 0x4b7   : > { %v4848_v17 = vmax.f32 %v4816_v57, 0.0  ;;  %v4817_v53 = vadd.f32 %v6276_v7, %v4723_v60  ;;  %v6287_v57 = vld [vmem:[%s6529_s19 + $0xa0] sm:$0xff]  ;;  %v6289_v7 = vld [vmem:[%s6529_s19 + $0xa8] sm:$0xff] }
 0x4b8   : > { %v4846_v9 = vmax.f32 %v4814_v15, 0.0  ;;  %v4815_v44 = vadd.f32 %v6277_v28, %v4715_v49  ;;  %v6288_v15 = vld [vmem:[%s6529_s19 + $0xb8] sm:$0xff] }
 0x4b9   : > { %4880 = vst [vmem:[%s8764_s26 + $0x50] sm:$0xff] %v4848_v17  ;;  %v4849_v55 = vmax.f32 %v4817_v53, 0.0 }
 0x4ba   : > { %4878 = vst [vmem:[%s8764_s26 + $0x40] sm:$0xff] %v4846_v9  ;;  %v4847_v37 = vmax.f32 %v4815_v44, 0.0  ;;  %v5777_v25 = vpop.f32.mrb[76].mxu0 }
 0x4bb   : > { %4881 = vst [vmem:[%s8764_s26 + $0x58] sm:$0xff] %v4849_v55  ;;  %v4736_v42 = vadd.f32 %v5777_v25, %v8752_v6  ;;  %v4727_v33 = vpop.f32.mrb[77].mxu0 }
 0x4bc   : > { %4879 = vst [vmem:[%s8764_s26 + $0x48] sm:$0xff] %v4847_v37  ;;  %v4728_v62 = vadd.f32 %v8752_v6, %v4727_v33  ;;  %v5778_v50 = vpop.f32.mrb[78].mxu0  ;;  %v6290_v33 = vld [vmem:[%s6529_s19 + $0xd0] sm:$0xff] }
 0x4bd   : > { %v4820_v63 = vadd.f32 %v6278_v24, %v4736_v42  ;;  %v4739_v27 = vadd.f32 %v5778_v50, %v8752_v6  ;;  %v4730_v16 = vpop.f32.mrb[79].mxu0 }
 0x4be   : > { %v4818_v39 = vadd.f32 %v6279_v13, %v4728_v62  ;;  %v4731_v5 = vadd.f32 %v8752_v6, %v4730_v16 }
 0x4bf   : > { %v4852_v20 = vmax.f32 %v4820_v63, 0.0  ;;  %v4821_v52 = vadd.f32 %v6280_v3, %v4739_v27  ;;  %v6291_v63 = vld [vmem:[%s6529_s19 + $0xc0] sm:$0xff]  ;;  %v6293_v3 = vld [vmem:[%s6529_s19 + $0xc8] sm:$0xff] }
 0x4c0   : > { %v4850_v4 = vmax.f32 %v4818_v39, 0.0  ;;  %v4819_v23 = vadd.f32 %v6281_v58, %v4731_v5  ;;  %v6292_v39 = vld [vmem:[%s6529_s19 + $0xd8] sm:$0xff] }
 0x4c1   : > { %4884 = vst [vmem:[%s8764_s26 + $0x70] sm:$0xff] %v4852_v20  ;;  %v4853_v29 = vmax.f32 %v4821_v52, 0.0 }
 0x4c2   : > { %4882 = vst [vmem:[%s8764_s26 + $0x60] sm:$0xff] %v4850_v4  ;;  %v4851_v34 = vmax.f32 %v4819_v23, 0.0  ;;  %v5781_v43 = vpop.f32.mrb[80].mxu0 }
 0x4c3   : > { %4885 = vst [vmem:[%s8764_s26 + $0x78] sm:$0xff] %v4853_v29  ;;  %v4752_v26 = vadd.f32 %v5781_v43, %v8752_v6  ;;  %v4743_v45 = vpop.f32.mrb[81].mxu0 }
 0x4c4   : > { %4883 = vst [vmem:[%s8764_s26 + $0x68] sm:$0xff] %v4851_v34  ;;  %v4744_v54 = vadd.f32 %v8752_v6, %v4743_v45  ;;  %v5782_v41 = vpop.f32.mrb[82].mxu0  ;;  %v6294_v45 = vld [vmem:[%s6529_s19 + $0xf0] sm:$0xff] }
 0x4c5   : > { %v4824_v21 = vadd.f32 %v6282_v35, %v4752_v26  ;;  %v4755_v46 = vadd.f32 %v5782_v41, %v8752_v6  ;;  %v4746_v19 = vpop.f32.mrb[83].mxu0 }
 0x4c6   : > { %v4822_v10 = vadd.f32 %v6283_v14, %v4744_v54  ;;  %v4747_v31 = vadd.f32 %v8752_v6, %v4746_v19 }
 0x4c7   : > { %v4856_v38 = vmax.f32 %v4824_v21, 0.0  ;;  %v4825_v32 = vadd.f32 %v6284_v40, %v4755_v46  ;;  %v6295_v21 = vld [vmem:[%s6529_s19 + $0xe0] sm:$0xff]  ;;  %v6297_v40 = vld [vmem:[%s6529_s19 + $0xe8] sm:$0xff] }
 0x4c8   : > { %v4854_v30 = vmax.f32 %v4822_v10, 0.0  ;;  %v4823_v56 = vadd.f32 %v6285_v61, %v4747_v31  ;;  %v6296_v10 = vld [vmem:[%s6529_s19 + $0xf8] sm:$0xff]  ;;  %s6298_s19 = scalar_lea.vmem %s8858_s12, 4096 }
 0x4c9   : > { %4888 = vst [vmem:[%s8764_s26 + $0x90] sm:$0xff] %v4856_v38  ;;  %v4857_v12 = vmax.f32 %v4825_v32, 0.0  ;;  %p6299_p11 = scmp.ne.s32.totalorder %s8858_s12, %s6298_s19  ;;  %p6306_p1 = scmp.lt.s32.totalorder %s6304_s24, %s6298_s19 }
 0x4ca   : > { %4886 = vst [vmem:[%s8764_s26 + $0x80] sm:$0xff] %v4854_v30  ;;  %v4855_v8 = vmax.f32 %v4823_v56, 0.0  ;;  %v5785_v51 = vpop.f32.mrb[84].mxu0 }
 0x4cb   : > { %4889 = vst [vmem:[%s8764_s26 + $0x98] sm:$0xff] %v4857_v12  ;;  %v4768_v1 = vadd.f32 %v5785_v51, %v8752_v6  ;;  %v4759_v59 = vpop.f32.mrb[85].mxu0  ;;  %p6300_p12 = pnand %p6299_p11, %p6456_p5  ;;  %p6307_p2 = por %p6306_p1, %p6305_p0 }
 0x4cc   : > { %4887 = vst [vmem:[%s8764_s26 + $0x88] sm:$0xff] %v4855_v8  ;;  %v4760_v48 = vadd.f32 %v8752_v6, %v4759_v59  ;;  %v5786_v47 = vpop.f32.mrb[86].mxu0 }
 0x4cd   : > { %v4828_v36 = vadd.f32 %v6286_v11, %v4768_v1  ;;  %v4771_v2 = vadd.f32 %v5786_v47, %v8752_v6  ;;  %v4762_v22 = vpop.f32.mrb[87].mxu0  ;;  %p6301_p13 = pneg %p6300_p12 }
 0x4ce   : > { %v4826_v60 = vadd.f32 %v6287_v57, %v4760_v48  ;;  %v4763_v0 = vadd.f32 %v8752_v6, %v4762_v22 }
 0x4cf   : > { %v4860_v18 = vmax.f32 %v4828_v36, 0.0  ;;  %v4829_v49 = vadd.f32 %v6288_v15, %v4771_v2  ;;  %p6308_p3 = pnand %p6307_p2, %p6301_p13 }
 0x4d0   : > { %v4858_v17 = vmax.f32 %v4826_v60, 0.0  ;;  %v4827_v53 = vadd.f32 %v6289_v7, %v4763_v0 }
 0x4d1   : > { %4892 = vst [vmem:[%s8764_s26 + $0xb0] sm:$0xff] %v4860_v18  ;;  %v4861_v9 = vmax.f32 %v4829_v49, 0.0 }
 0x4d2   : > { %4890 = vst [vmem:[%s8764_s26 + $0xa0] sm:$0xff] %v4858_v17  ;;  %v4859_v28 = vmax.f32 %v4827_v53, 0.0  ;;  %v5789_v44 = vpop.f32.mrb[88].mxu0 }
 0x4d3   : > { %4893 = vst [vmem:[%s8764_s26 + $0xb8] sm:$0xff] %v4861_v9  ;;  %v4784_v55 = vadd.f32 %v5789_v44, %v8752_v6  ;;  %v4775_v37 = vpop.f32.mrb[89].mxu0 }
 0x4d4   : > { %4891 = vst [vmem:[%s8764_s26 + $0xa8] sm:$0xff] %v4859_v28  ;;  %v4776_v25 = vadd.f32 %v8752_v6, %v4775_v37  ;;  %v5790_v42 = vpop.f32.mrb[90].mxu0 }
 0x4d5   : > { %v4832_v62 = vadd.f32 %v6290_v33, %v4784_v55  ;;  %v4787_v50 = vadd.f32 %v5790_v42, %v8752_v6  ;;  %v4778_v24 = vpop.f32.mrb[91].mxu0 }
 0x4d6   : > { %v4830_v27 = vadd.f32 %v6291_v63, %v4776_v25  ;;  %v4779_v16 = vadd.f32 %v8752_v6, %v4778_v24 }
 0x4d7   : > { %v4864_v13 = vmax.f32 %v4832_v62, 0.0  ;;  %v4833_v5 = vadd.f32 %v6292_v39, %v4787_v50 }
 0x4d8   : > { %v4862_v20 = vmax.f32 %v4830_v27, 0.0  ;;  %v4831_v52 = vadd.f32 %v6293_v3, %v4779_v16 }
 0x4d9   : > { %4896 = vst [vmem:[%s8764_s26 + $0xd0] sm:$0xff] %v4864_v13  ;;  %v4865_v4 = vmax.f32 %v4833_v5, 0.0 }
 0x4da   : > { %4894 = vst [vmem:[%s8764_s26 + $0xc0] sm:$0xff] %v4862_v20  ;;  %v4863_v58 = vmax.f32 %v4831_v52, 0.0  ;;  %v5793_v23 = vpop.f32.mrb[92].mxu0 }
 0x4db   : > { %4897 = vst [vmem:[%s8764_s26 + $0xd8] sm:$0xff] %v4865_v4  ;;  %v4800_v29 = vadd.f32 %v5793_v23, %v8752_v6  ;;  %v4791_v34 = vpop.f32.mrb[93].mxu0 }
 0x4dc   : > { %4895 = vst [vmem:[%s8764_s26 + $0xc8] sm:$0xff] %v4863_v58  ;;  %v4792_v43 = vadd.f32 %v8752_v6, %v4791_v34  ;;  %v5794_v26 = vpop.f32.mrb[94].mxu0 }
 0x4dd   : > { %v4836_v54 = vadd.f32 %v6294_v45, %v4800_v29  ;;  %v4803_v41 = vadd.f32 %v5794_v26, %v8752_v6  ;;  %v4794_v35 = vpop.f32.mrb[95].mxu0 }
 0x4de   : > { %v4834_v46 = vadd.f32 %v6295_v21, %v4792_v43  ;;  %v4795_v19 = vadd.f32 %v8752_v6, %v4794_v35 }
 0x4df   : > { %v4868_v14 = vmax.f32 %v4836_v54, 0.0  ;;  %v4837_v31 = vadd.f32 %v6296_v10, %v4803_v41 }
 0x4e0   : > { %v4866_v38 = vmax.f32 %v4834_v46, 0.0  ;;  %v4835_v32 = vadd.f32 %v6297_v40, %v4795_v19 }
 0x4e1   : > { %4900 = vst [vmem:[%s8764_s26 + $0xf0] sm:$0xff] %v4868_v14  ;;  %v4869_v30 = vmax.f32 %v4837_v31, 0.0 }
 0x4e2   : > { %4898 = vst [vmem:[%s8764_s26 + $0xe0] sm:$0xff] %v4866_v38  ;;  %v4867_v6 = vmax.f32 %v4835_v32, 0.0 }
 0x4e3   : > { %4901 = vst [vmem:[%s8764_s26 + $0xf8] sm:$0xff] %v4869_v30 }
 0x4e4   : > { %4899 = vst [vmem:[%s8764_s26 + $0xe8] sm:$0xff] %v4867_v6 }
 0x4e5   : > { %6311 = shalt.err (!%p6308_p3)
}
 0x4e6   : > { %s6312_s22 = scalar_lea.hbm %s8856_s18, 4096  ;;  %s6316_s26 = scalar_lea.hbm %s8914_s8, 8192 }
 0x4e7   : > { %p6313_p4 = scmp.ne.s32.totalorder %s8856_s18, %s6312_s22  ;;  %p6317_p9 = scmp.lt.u32.totalorder %s8856_s18, %s8914_s8 }
 0x4e8   : > { %p6318_p10 = scmp.lt.u32.totalorder %s6316_s26, %s6312_s22  ;;  %p6320_p12 = scmp.lt.u32.totalorder %s6312_s22, %s8856_s18 }
 0x4e9   : > { %p6314_p7 = pnand %p6313_p4, %p6456_p5 }
 0x4ea   : > { %p6319_p11 = por %p6318_p10, %p6317_p9 }
 0x4eb   : > { %p6315_p8 = pneg %p6314_p7 }
 0x4ec   : > { %p6321_p13 = por %p6320_p12, %p6319_p11 }
 0x4ee   : > { %p6322_p0 = pnand %p6321_p13, %p6315_p8 }
 0x4f0   : > { %6325 = shalt.err (!%p6322_p0)
}
 0x4f1   : > { %s6371_s13 = smov 128   ;;  %s6372_s19 = smov 8  }
 0x4f2   : > { %6055 = dma.vmem_to_hbm [thread:$0]  (%p6456_p5), %s8858_s12, 4096, %s8856_s18, %s8865_s9, %s6371_s13, %s6371_s13, %s6372_s19  }
 0x4f3 PF: > { %p6061_p1 = scmp.ge.s32.totalorder %s6360_s30, 2  ;;  %s4931_s20 = sand.u32 1, %s6348_s27  }
 0x4f4   : > { %s4932_s21 = scalar_lea.sflag [#allocation3], %s4931_s20 }
 0x4f5   : > { %p6058_p2 = pnand %p6061_p1, %p6460_p6 }
 0x4f7   : > { %6343 = dma.done.wait (!%p6058_p2), %s4932_s21, 4096  }
 0x4f8   : > { %6345 = vsyncadd (!%p6058_p2), %s4932_s21, 4294963200  ;;  %p18_p3 = scmp.ge.s32.totalorder %s6443_s11, 4   ;;  %s9472_s27 = smov %s6352_s28 }
 0x4f9   : > { %s9473_s28 = smov %s6356_s29  ;;  %s9474_s29 = smov %s6454_s14 }
 0x4fa   : > { %s9475_s30 = smov %s6443_s11  ;;  %20 = sbr.rel (!%p18_p3) target bundleno = 3 (0x3), region = 87 }
 0x501   :  { %4937 = vsyncpa [#allocation3], 1 }
 0x502   :  { %4939 = vsyncpa [#allocation3 + $0x1], 1 }

</bundles_post_ra>
